<compile_context>
chip_gen: v7x
topology: tpu7x:2x2x1
jax: 0.10.0
libtpu: 0.0.40
codegen_flags: <defaults>
</compile_context>

<pallas_src>
import jax
import jax.numpy as jnp
import numpy as np
from jax.experimental import pallas as pl
from jax.experimental.pallas import tpu as pltpu


def _rsb_kernel(x_ref, w2_ref, bn_b_ref, wfc1_ref, bfc1_ref, wfc2_ref, bfc2_ref,
                o_ref, xpad_ref, patches_ref):
    """One grid step processes Bt images.

    x_ref       : (Bt, H, W, Cin)       input tile (NHWC, C on the lane axis)
    w2_ref      : (9*Cin, Cout)         conv2 weights, im2col layout, BN scale folded
    bn_b_ref    : (1, Cout)             folded BatchNorm bias
    wfc1_ref    : (hidden, Cout)        fc1 weight (hidden axis leading)
    bfc1_ref    : (1, hidden)           fc1 bias
    wfc2_ref    : (hidden, Cout)        fc2 weight (hidden axis leading)
    bfc2_ref    : (1, Cout)             fc2 bias
    o_ref       : (Bt, H, W, Cout)      output tile
    xpad_ref    : (Bt, H+2, W+2, Cin)   VMEM halo scratch (borders re-zeroed per step)
    patches_ref : (Bt*H*W, 9*Cin)       VMEM im2col scratch (single materialization)
    """
    Bt, H, W, Cin = x_ref.shape
    Cout = bn_b_ref.shape[-1]
    M = Bt * H * W

    # ---- halo: zero ONLY the four 1-wide border strips (not the full scratch),
    #      then copy the tile into the interior.  Re-zeroed every step so it is
    #      safe under dimension_semantics=("parallel",) (no program_id==0 gate).
    zrow = jnp.zeros((Bt, 1, W + 2, Cin), xpad_ref.dtype)
    xpad_ref[:, 0:1, :, :] = zrow
    xpad_ref[:, H + 1:H + 2, :, :] = zrow
    zcol = jnp.zeros((Bt, H, 1, Cin), xpad_ref.dtype)
    xpad_ref[:, 1:H + 1, 0:1, :] = zcol
    xpad_ref[:, 1:H + 1, W + 1:W + 2, :] = zcol
    xpad_ref[:, 1:H + 1, 1:W + 1, :] = x_ref[...]

    # ---- im2col: each tap is a direct strided Ref-slice load, stored once into
    #      the shared patches scratch (lane-aligned 128-wide column blocks).
    for idx in range(9):
        dy, dx = idx // 3, idx % 3
        tap = xpad_ref[:, dy:dy + H, dx:dx + W, :]          # strided VMEM load
        patches_ref[:, idx * Cin:(idx + 1) * Cin] = tap.reshape(M, Cin)

    # ---- conv2 + BatchNorm(eval): one (M, 9*Cin) x (9*Cin, Cout) MXU matmul ---
    conv = jnp.dot(patches_ref[...], w2_ref[...],
                   preferred_element_type=jnp.float32) + bn_b_ref[...]
    conv3 = conv.reshape(Bt, H * W, Cout)                   # (Bt, H*W, Cout)

    # ---- squeeze-excite: per-image GAP + vectorized 2-layer MLP ---------------
    gap = jnp.mean(conv3, axis=1)                           # (Bt, Cout)
    h = jnp.sum(gap[:, None, :] * wfc1_ref[...][None, :, :], axis=-1)
    h = jnp.maximum(h + bfc1_ref[...], 0.0)                 # (Bt, hidden), ReLU
    logits = jnp.sum(h[:, :, None] * wfc2_ref[...][None, :, :], axis=1)
    logits = logits + bfc2_ref[...]                         # (Bt, Cout)
    attn = 1.0 / (1.0 + jnp.exp(-logits))                   # sigmoid (exp -> EUP)

    # ---- scale, residual (Identity == input tile), ReLU, lane-dense store -----
    residual = x_ref[...].reshape(Bt, H * W, Cin)
    out = jnp.maximum(conv3 * attn[:, None, :] + residual, 0.0)
    o_ref[...] = out.reshape(Bt, H, W, Cout).astype(o_ref.dtype)


def residual_se_block_fwd(x_nhwc, params, *, bt=None):
    """x_nhwc: (B, H, W, C) float32. Returns (B, H, W, C)."""
    w2, bn_scale, bn_bias, wfc1, bfc1, wfc2, bfc2 = params
    B, H, W, Cin = x_nhwc.shape
    Cout = w2.shape[-1]
    hidden = wfc1.shape[-1]
    assert Cin == Cout, "residual branch is Identity only when in_c == out_c"

    if bt is None:
        # Keep >= 2 grid steps (both v7x TCs get work), prefer an even step
        # count, and keep M = bt*H*W >= 256 so the MXU row dim stays full.
        cands = [c for c in (8, 4, 2, 1) if B % c == 0 and B // c >= 2]
        if not cands:
            bt = B                      # tiny batch: single step fallback
        else:
            even = [c for c in cands if (B // c) % 2 == 0]
            bt = even[0] if (even and even[0] * H * W >= 256) else cands[0]
    assert B % bt == 0, f"batch {B} must be divisible by bt={bt}"

    # One-time host-side weight prep: fold the eval-mode BN scale into the conv
    # weights (exact, conv is linear in w2), lay them out as an im2col matrix,
    # and put the SE hidden axis leading so each hidden unit is one row.
    w2_folded = (w2 * bn_scale.reshape(1, 1, 1, Cout)).reshape(9 * Cin, Cout)
    wfc1_t = wfc1.T                                         # (hidden, Cout)

    # Per-step VMEM (bt=4, H=W=8, C=128): x/out blocks + resident weights +
    # halo scratch + patches scratch ~= 3 MiB << 32 MiB scoped default.
    # pipeline_mode=pl.Buffered(1) on the constant-index weights was considered
    # and skipped (VMEM is not the constraint here).
    return pl.pallas_call(
        _rsb_kernel,
        out_shape=jax.ShapeDtypeStruct((B, H, W, Cout), x_nhwc.dtype),
        grid_spec=pltpu.PrefetchScalarGridSpec(
            num_scalar_prefetch=0,
            grid=(B // bt,),
            in_specs=[
                pl.BlockSpec((bt, H, W, Cin), lambda b: (b, 0, 0, 0)),
                pl.BlockSpec((9 * Cin, Cout), lambda b: (0, 0)),
                pl.BlockSpec((1, Cout), lambda b: (0, 0)),
                pl.BlockSpec((hidden, Cout), lambda b: (0, 0)),
                pl.BlockSpec((1, hidden), lambda b: (0, 0)),
                pl.BlockSpec((hidden, Cout), lambda b: (0, 0)),
                pl.BlockSpec((1, Cout), lambda b: (0, 0)),
            ],
            out_specs=pl.BlockSpec((bt, H, W, Cout), lambda b: (b, 0, 0, 0)),
            scratch_shapes=[
                pltpu.VMEM((bt, H + 2, W + 2, Cin), x_nhwc.dtype),   # halo
                pltpu.VMEM((bt * H * W, 9 * Cin), x_nhwc.dtype),     # im2col
            ],
        ),
        compiler_params=pltpu.CompilerParams(
            dimension_semantics=("parallel",)),
    )(x_nhwc, w2_folded, bn_bias, wfc1_t, bfc1, wfc2, bfc2)


def _reference(x_nhwc, params):
    """Pure-JAX reference of the same (effective) forward pass, full f32."""
    w2, bn_scale, bn_bias, wfc1, bfc1, wfc2, bfc2 = params
    hi = jax.lax.Precision.HIGHEST
    conv = jax.lax.conv_general_dilated(
        x_nhwc, w2, window_strides=(1, 1), padding="SAME",
        dimension_numbers=("NHWC", "HWIO", "NHWC"), precision=hi)
    conv = conv * bn_scale[0] + bn_bias[0]
    gap = jnp.mean(conv, axis=(1, 2))                        # (B, Cout)
    h1 = jnp.maximum(jnp.dot(gap, wfc1, precision=hi) + bfc1, 0.0)
    attn = jax.nn.sigmoid(jnp.dot(h1, wfc2, precision=hi) + bfc2)
    out = conv * attn[:, None, None, :] + x_nhwc             # residual = Identity
    return jnp.maximum(out, 0.0)


if __name__ == "__main__":
    key = jax.random.PRNGKey(0)
    ks = [jax.random.fold_in(key, i) for i in range(10)]

    # in_c == out_c (required by the reference forward). C = 128 keeps the
    # channel (lane) axis dense, and hidden = C // 16 = 8.
    B, C, H, W = 8, 128, 8, 8
    hidden = C // 16

    x_nchw = jax.random.normal(ks[0], (B, C, H, W), jnp.float32)  # PyTorch NCHW
    x = jnp.transpose(x_nchw, (0, 2, 3, 1))                       # -> NHWC

    # conv2 weights (no bias), HWIO.
    w2 = 0.05 * jax.random.normal(ks[1], (3, 3, C, C), jnp.float32)

    # BatchNorm2d(out_c) eval-mode parameters + running stats, folded.
    eps = 1e-5
    gamma = 1.0 + 0.1 * jax.random.normal(ks[2], (C,), jnp.float32)
    beta = 0.1 * jax.random.normal(ks[3], (C,), jnp.float32)
    running_mean = 0.1 * jax.random.normal(ks[4], (C,), jnp.float32)
    running_var = 0.5 + jax.random.uniform(ks[5], (C,), jnp.float32)
    inv_std = gamma / jnp.sqrt(running_var + eps)
    bn_scale = inv_std.reshape(1, C)
    bn_bias = (beta - running_mean * inv_std).reshape(1, C)

    # SE MLP: fc1 (C -> C//16), fc2 (C//16 -> C), stored as (in, out).
    wfc1 = 0.2 * jax.random.normal(ks[6], (C, hidden), jnp.float32)
    bfc1 = 0.1 * jax.random.normal(ks[7], (1, hidden), jnp.float32)
    wfc2 = 0.2 * jax.random.normal(ks[8], (hidden, C), jnp.float32)
    bfc2 = 0.1 * jax.random.normal(ks[9], (1, C), jnp.float32)

    params = (w2, bn_scale, bn_bias, wfc1, bfc1, wfc2, bfc2)

    out = residual_se_block_fwd(x, params)
    jax.block_until_ready(out)

    ref = _reference(x, params)
    np.testing.assert_allclose(np.asarray(out), np.asarray(ref),
                               rtol=1e-3, atol=1e-3)
    print("KERNEL_OK")
</pallas_src>

<mosaic_0001>
module attributes {stable_mosaic.version = 11 : i64} {
  func.func @_rsb_kernel(%arg0: i32, %arg1: memref<4x8x8x128xf32, #tpu.memory_space<vmem>>, %arg2: memref<1152x128xf32, #tpu.memory_space<vmem>>, %arg3: memref<1x128xf32, #tpu.memory_space<vmem>>, %arg4: memref<8x128xf32, #tpu.memory_space<vmem>>, %arg5: memref<1x8xf32, #tpu.memory_space<vmem>>, %arg6: memref<8x128xf32, #tpu.memory_space<vmem>>, %arg7: memref<1x128xf32, #tpu.memory_space<vmem>>, %arg8: memref<4x8x8x128xf32, #tpu.memory_space<vmem>>, %arg9: memref<4x10x10x128xf32, #tpu.memory_space<vmem>>, %arg10: memref<256x1152xf32, #tpu.memory_space<vmem>>) attributes {dimension_semantics = [#tpu.dimension_semantics<parallel>], iteration_bounds = array<i64: 2>, scalar_prefetch = 0 : i64, scratch_operands = 2 : i64, tpu.core_type = #tpu.core_type<tc>, window_params = [{transform_indices = @transform_0, window_bounds = array<i64: 4, 8, 8, 128>}, {pipeline_mode = #tpu.pipeline_mode<synchronous>, transform_indices = @transform_1, window_bounds = array<i64: 1152, 128>}, {pipeline_mode = #tpu.pipeline_mode<synchronous>, transform_indices = @transform_2, window_bounds = array<i64: 1, 128>}, {pipeline_mode = #tpu.pipeline_mode<synchronous>, transform_indices = @transform_3, window_bounds = array<i64: 8, 128>}, {pipeline_mode = #tpu.pipeline_mode<synchronous>, transform_indices = @transform_4, window_bounds = array<i64: 1, 8>}, {pipeline_mode = #tpu.pipeline_mode<synchronous>, transform_indices = @transform_5, window_bounds = array<i64: 8, 128>}, {pipeline_mode = #tpu.pipeline_mode<synchronous>, transform_indices = @transform_6, window_bounds = array<i64: 1, 128>}, {transform_indices = @transform_7, window_bounds = array<i64: 4, 8, 8, 128>}]} {
    %cst = arith.constant 0.000000e+00 : f32
    %0 = vector.broadcast %cst : f32 to vector<4x1x10x128xf32>
    %c0 = arith.constant 0 : index
    %c0_0 = arith.constant 0 : index
    %c0_1 = arith.constant 0 : index
    %c0_2 = arith.constant 0 : index
    %1 = vector.load %arg9[%c0, %c0_0, %c0_1, %c0_2] : memref<4x10x10x128xf32, #tpu.memory_space<vmem>>, vector<4x1x10x128xf32>
    tpu.vector_store %arg9[%c0, %c0_0, %c0_1, %c0_2], %0 {strides = array<i32>} : memref<4x10x10x128xf32, #tpu.memory_space<vmem>>, vector<4x1x10x128xf32>,
    %c0_3 = arith.constant 0 : index
    %c9 = arith.constant 9 : index
    %c0_4 = arith.constant 0 : index
    %c0_5 = arith.constant 0 : index
    %2 = vector.load %arg9[%c0_3, %c9, %c0_4, %c0_5] : memref<4x10x10x128xf32, #tpu.memory_space<vmem>>, vector<4x1x10x128xf32>
    tpu.vector_store %arg9[%c0_3, %c9, %c0_4, %c0_5], %0 {strides = array<i32>} : memref<4x10x10x128xf32, #tpu.memory_space<vmem>>, vector<4x1x10x128xf32>,
    %cst_6 = arith.constant 0.000000e+00 : f32
    %3 = vector.broadcast %cst_6 : f32 to vector<4x8x1x128xf32>
    %c0_7 = arith.constant 0 : index
    %c1 = arith.constant 1 : index
    %c0_8 = arith.constant 0 : index
    %c0_9 = arith.constant 0 : index
    %4 = vector.load %arg9[%c0_7, %c1, %c0_8, %c0_9] : memref<4x10x10x128xf32, #tpu.memory_space<vmem>>, vector<4x8x1x128xf32>
    tpu.vector_store %arg9[%c0_7, %c1, %c0_8, %c0_9], %3 {strides = array<i32>} : memref<4x10x10x128xf32, #tpu.memory_space<vmem>>, vector<4x8x1x128xf32>,
    %c0_10 = arith.constant 0 : index
    %c1_11 = arith.constant 1 : index
    %c9_12 = arith.constant 9 : index
    %c0_13 = arith.constant 0 : index
    %5 = vector.load %arg9[%c0_10, %c1_11, %c9_12, %c0_13] : memref<4x10x10x128xf32, #tpu.memory_space<vmem>>, vector<4x8x1x128xf32>
    tpu.vector_store %arg9[%c0_10, %c1_11, %c9_12, %c0_13], %3 {strides = array<i32>} : memref<4x10x10x128xf32, #tpu.memory_space<vmem>>, vector<4x8x1x128xf32>,
    %c0_14 = arith.constant 0 : index
    %c0_15 = arith.constant 0 : index
    %c0_16 = arith.constant 0 : index
    %c0_17 = arith.constant 0 : index
    %6 = vector.load %arg1[%c0_14, %c0_15, %c0_16, %c0_17] : memref<4x8x8x128xf32, #tpu.memory_space<vmem>>, vector<4x8x8x128xf32>
    %c0_18 = arith.constant 0 : index
    %c1_19 = arith.constant 1 : index
    %c1_20 = arith.constant 1 : index
    %c0_21 = arith.constant 0 : index
    %7 = vector.load %arg9[%c0_18, %c1_19, %c1_20, %c0_21] : memref<4x10x10x128xf32, #tpu.memory_space<vmem>>, vector<4x8x8x128xf32>
    tpu.vector_store %arg9[%c0_18, %c1_19, %c1_20, %c0_21], %6 {strides = array<i32>} : memref<4x10x10x128xf32, #tpu.memory_space<vmem>>, vector<4x8x8x128xf32>,
    %c0_22 = arith.constant 0 : index
    %c0_23 = arith.constant 0 : index
    %c0_24 = arith.constant 0 : index
    %c0_25 = arith.constant 0 : index
    %8 = vector.load %arg9[%c0_22, %c0_23, %c0_24, %c0_25] : memref<4x10x10x128xf32, #tpu.memory_space<vmem>>, vector<4x8x8x128xf32>
    %9 = vector.shape_cast %8 : vector<4x8x8x128xf32> to vector<256x128xf32>
    %c0_26 = arith.constant 0 : index
    %c0_27 = arith.constant 0 : index
    %10 = vector.load %arg10[%c0_26, %c0_27] : memref<256x1152xf32, #tpu.memory_space<vmem>>, vector<256x128xf32>
    tpu.vector_store %arg10[%c0_26, %c0_27], %9 {strides = array<i32>} : memref<256x1152xf32, #tpu.memory_space<vmem>>, vector<256x128xf32>,
    %c0_28 = arith.constant 0 : index
    %c0_29 = arith.constant 0 : index
    %c1_30 = arith.constant 1 : index
    %c0_31 = arith.constant 0 : index
    %11 = vector.load %arg9[%c0_28, %c0_29, %c1_30, %c0_31] : memref<4x10x10x128xf32, #tpu.memory_space<vmem>>, vector<4x8x8x128xf32>
    %12 = vector.shape_cast %11 : vector<4x8x8x128xf32> to vector<256x128xf32>
    %c0_32 = arith.constant 0 : index
    %c128 = arith.constant 128 : index
    %13 = vector.load %arg10[%c0_32, %c128] : memref<256x1152xf32, #tpu.memory_space<vmem>>, vector<256x128xf32>
    tpu.vector_store %arg10[%c0_32, %c128], %12 {strides = array<i32>} : memref<256x1152xf32, #tpu.memory_space<vmem>>, vector<256x128xf32>,
    %c0_33 = arith.constant 0 : index
    %c0_34 = arith.constant 0 : index
    %c2 = arith.constant 2 : index
    %c0_35 = arith.constant 0 : index
    %14 = vector.load %arg9[%c0_33, %c0_34, %c2, %c0_35] : memref<4x10x10x128xf32, #tpu.memory_space<vmem>>, vector<4x8x8x128xf32>
    %15 = vector.shape_cast %14 : vector<4x8x8x128xf32> to vector<256x128xf32>
    %c0_36 = arith.constant 0 : index
    %c256 = arith.constant 256 : index
    %16 = vector.load %arg10[%c0_36, %c256] : memref<256x1152xf32, #tpu.memory_space<vmem>>, vector<256x128xf32>
    tpu.vector_store %arg10[%c0_36, %c256], %15 {strides = array<i32>} : memref<256x1152xf32, #tpu.memory_space<vmem>>, vector<256x128xf32>,
    %c0_37 = arith.constant 0 : index
    %c1_38 = arith.constant 1 : index
    %c0_39 = arith.constant 0 : index
    %c0_40 = arith.constant 0 : index
    %17 = vector.load %arg9[%c0_37, %c1_38, %c0_39, %c0_40] : memref<4x10x10x128xf32, #tpu.memory_space<vmem>>, vector<4x8x8x128xf32>
    %18 = vector.shape_cast %17 : vector<4x8x8x128xf32> to vector<256x128xf32>
    %c0_41 = arith.constant 0 : index
    %c384 = arith.constant 384 : index
    %19 = vector.load %arg10[%c0_41, %c384] : memref<256x1152xf32, #tpu.memory_space<vmem>>, vector<256x128xf32>
    tpu.vector_store %arg10[%c0_41, %c384], %18 {strides = array<i32>} : memref<256x1152xf32, #tpu.memory_space<vmem>>, vector<256x128xf32>,
    %c0_42 = arith.constant 0 : index
    %c1_43 = arith.constant 1 : index
    %c1_44 = arith.constant 1 : index
    %c0_45 = arith.constant 0 : index
    %20 = vector.load %arg9[%c0_42, %c1_43, %c1_44, %c0_45] : memref<4x10x10x128xf32, #tpu.memory_space<vmem>>, vector<4x8x8x128xf32>
    %21 = vector.shape_cast %20 : vector<4x8x8x128xf32> to vector<256x128xf32>
    %c0_46 = arith.constant 0 : index
    %c512 = arith.constant 512 : index
    %22 = vector.load %arg10[%c0_46, %c512] : memref<256x1152xf32, #tpu.memory_space<vmem>>, vector<256x128xf32>
    tpu.vector_store %arg10[%c0_46, %c512], %21 {strides = array<i32>} : memref<256x1152xf32, #tpu.memory_space<vmem>>, vector<256x128xf32>,
    %c0_47 = arith.constant 0 : index
    %c1_48 = arith.constant 1 : index
    %c2_49 = arith.constant 2 : index
    %c0_50 = arith.constant 0 : index
    %23 = vector.load %arg9[%c0_47, %c1_48, %c2_49, %c0_50] : memref<4x10x10x128xf32, #tpu.memory_space<vmem>>, vector<4x8x8x128xf32>
    %24 = vector.shape_cast %23 : vector<4x8x8x128xf32> to vector<256x128xf32>
    %c0_51 = arith.constant 0 : index
    %c640 = arith.constant 640 : index
    %25 = vector.load %arg10[%c0_51, %c640] : memref<256x1152xf32, #tpu.memory_space<vmem>>, vector<256x128xf32>
    tpu.vector_store %arg10[%c0_51, %c640], %24 {strides = array<i32>} : memref<256x1152xf32, #tpu.memory_space<vmem>>, vector<256x128xf32>,
    %c0_52 = arith.constant 0 : index
    %c2_53 = arith.constant 2 : index
    %c0_54 = arith.constant 0 : index
    %c0_55 = arith.constant 0 : index
    %26 = vector.load %arg9[%c0_52, %c2_53, %c0_54, %c0_55] : memref<4x10x10x128xf32, #tpu.memory_space<vmem>>, vector<4x8x8x128xf32>
    %27 = vector.shape_cast %26 : vector<4x8x8x128xf32> to vector<256x128xf32>
    %c0_56 = arith.constant 0 : index
    %c768 = arith.constant 768 : index
    %28 = vector.load %arg10[%c0_56, %c768] : memref<256x1152xf32, #tpu.memory_space<vmem>>, vector<256x128xf32>
    tpu.vector_store %arg10[%c0_56, %c768], %27 {strides = array<i32>} : memref<256x1152xf32, #tpu.memory_space<vmem>>, vector<256x128xf32>,
    %c0_57 = arith.constant 0 : index
    %c2_58 = arith.constant 2 : index
    %c1_59 = arith.constant 1 : index
    %c0_60 = arith.constant 0 : index
    %29 = vector.load %arg9[%c0_57, %c2_58, %c1_59, %c0_60] : memref<4x10x10x128xf32, #tpu.memory_space<vmem>>, vector<4x8x8x128xf32>
    %30 = vector.shape_cast %29 : vector<4x8x8x128xf32> to vector<256x128xf32>
    %c0_61 = arith.constant 0 : index
    %c896 = arith.constant 896 : index
    %31 = vector.load %arg10[%c0_61, %c896] : memref<256x1152xf32, #tpu.memory_space<vmem>>, vector<256x128xf32>
    tpu.vector_store %arg10[%c0_61, %c896], %30 {strides = array<i32>} : memref<256x1152xf32, #tpu.memory_space<vmem>>, vector<256x128xf32>,
    %c0_62 = arith.constant 0 : index
    %c2_63 = arith.constant 2 : index
    %c2_64 = arith.constant 2 : index
    %c0_65 = arith.constant 0 : index
    %32 = vector.load %arg9[%c0_62, %c2_63, %c2_64, %c0_65] : memref<4x10x10x128xf32, #tpu.memory_space<vmem>>, vector<4x8x8x128xf32>
    %33 = vector.shape_cast %32 : vector<4x8x8x128xf32> to vector<256x128xf32>
    %c0_66 = arith.constant 0 : index
    %c1024 = arith.constant 1024 : index
    %34 = vector.load %arg10[%c0_66, %c1024] : memref<256x1152xf32, #tpu.memory_space<vmem>>, vector<256x128xf32>
    tpu.vector_store %arg10[%c0_66, %c1024], %33 {strides = array<i32>} : memref<256x1152xf32, #tpu.memory_space<vmem>>, vector<256x128xf32>,
    %c0_67 = arith.constant 0 : index
    %c0_68 = arith.constant 0 : index
    %35 = vector.load %arg10[%c0_67, %c0_68] : memref<256x1152xf32, #tpu.memory_space<vmem>>, vector<256x1152xf32>
    %c0_69 = arith.constant 0 : index
    %c0_70 = arith.constant 0 : index
    %36 = vector.load %arg2[%c0_69, %c0_70] : memref<1152x128xf32, #tpu.memory_space<vmem>>, vector<1152x128xf32>
    %cst_71 = arith.constant dense<0.000000e+00> : vector<256x128xf32>
    %37 = tpu.matmul %35, %36, %cst_71 {dimension_numbers = #tpu.dot_dimension_numbers<[1], [0], [0], [1], [0, 0, 1, 1], [], []>} : vector<256x1152xf32>, vector<1152x128xf32>, vector<256x128xf32> -> vector<256x128xf32>
    %c0_72 = arith.constant 0 : index
    %c0_73 = arith.constant 0 : index
    %38 = vector.load %arg3[%c0_72, %c0_73] : memref<1x128xf32, #tpu.memory_space<vmem>>, vector<1x128xf32>
    %39 = vector.broadcast %38 : vector<1x128xf32> to vector<256x128xf32>
    %40 = arith.addf %37, %39 : vector<256x128xf32>
    %41 = vector.shape_cast %40 : vector<256x128xf32> to vector<4x64x128xf32>
    %cst_74 = arith.constant dense<0.000000e+00> : vector<4x128xf32>
    %42 = vector.multi_reduction <add>, %41, %cst_74 [1] : vector<4x64x128xf32> to vector<4x128xf32>
    %cst_75 = arith.constant 6.400000e+01 : f32
    %43 = vector.broadcast %cst_75 : f32 to vector<4x128xf32>
    %44 = arith.divf %42, %43 : vector<4x128xf32>
    %45 = vector.shape_cast %44 : vector<4x128xf32> to vector<4x1x128xf32>
    %c0_76 = arith.constant 0 : index
    %c0_77 = arith.constant 0 : index
    %46 = vector.load %arg4[%c0_76, %c0_77] : memref<8x128xf32, #tpu.memory_space<vmem>>, vector<8x128xf32>
    %47 = vector.shape_cast %46 : vector<8x128xf32> to vector<1x8x128xf32>
    %48 = vector.broadcast %45 : vector<4x1x128xf32> to vector<4x8x128xf32>
    %49 = vector.broadcast %47 : vector<1x8x128xf32> to vector<4x8x128xf32>
    %50 = arith.mulf %48, %49 : vector<4x8x128xf32>
    %cst_78 = arith.constant dense<0.000000e+00> : vector<4x8xf32>
    %51 = vector.multi_reduction <add>, %50, %cst_78 [2] : vector<4x8x128xf32> to vector<4x8xf32>
    %c0_79 = arith.constant 0 : index
    %c0_80 = arith.constant 0 : index
    %52 = vector.load %arg5[%c0_79, %c0_80] : memref<1x8xf32, #tpu.memory_space<vmem>>, vector<1x8xf32>
    %53 = vector.broadcast %52 : vector<1x8xf32> to vector<4x8xf32>
    %54 = arith.addf %51, %53 : vector<4x8xf32>
    %cst_81 = arith.constant 0.000000e+00 : f32
    %55 = vector.broadcast %cst_81 : f32 to vector<4x8xf32>
    %56 = arith.maximumf %54, %55 : vector<4x8xf32>
    %57 = vector.shape_cast %56 : vector<4x8xf32> to vector<4x8x1xf32>
    %c0_82 = arith.constant 0 : index
    %c0_83 = arith.constant 0 : index
    %58 = vector.load %arg6[%c0_82, %c0_83] : memref<8x128xf32, #tpu.memory_space<vmem>>, vector<8x128xf32>
    %59 = vector.shape_cast %58 : vector<8x128xf32> to vector<1x8x128xf32>
    %60 = vector.broadcast %57 : vector<4x8x1xf32> to vector<4x8x128xf32>
    %61 = vector.broadcast %59 : vector<1x8x128xf32> to vector<4x8x128xf32>
    %62 = arith.mulf %60, %61 : vector<4x8x128xf32>
    %cst_84 = arith.constant dense<0.000000e+00> : vector<4x128xf32>
    %63 = vector.multi_reduction <add>, %62, %cst_84 [1] : vector<4x8x128xf32> to vector<4x128xf32>
    %c0_85 = arith.constant 0 : index
    %c0_86 = arith.constant 0 : index
    %64 = vector.load %arg7[%c0_85, %c0_86] : memref<1x128xf32, #tpu.memory_space<vmem>>, vector<1x128xf32>
    %65 = vector.broadcast %64 : vector<1x128xf32> to vector<4x128xf32>
    %66 = arith.addf %63, %65 : vector<4x128xf32>
    %cst_87 = arith.constant 0.000000e+00 : f32
    %67 = vector.broadcast %cst_87 : f32 to vector<4x128xf32>
    %68 = arith.subf %67, %66 : vector<4x128xf32>
    %69 = math.exp %68 : vector<4x128xf32>
    %cst_88 = arith.constant 1.000000e+00 : f32
    %70 = vector.broadcast %cst_88 : f32 to vector<4x128xf32>
    %71 = arith.addf %70, %69 : vector<4x128xf32>
    %cst_89 = arith.constant 1.000000e+00 : f32
    %72 = vector.broadcast %cst_89 : f32 to vector<4x128xf32>
    %73 = arith.divf %72, %71 : vector<4x128xf32>
    %c0_90 = arith.constant 0 : index
    %c0_91 = arith.constant 0 : index
    %c0_92 = arith.constant 0 : index
    %c0_93 = arith.constant 0 : index
    %74 = vector.load %arg1[%c0_90, %c0_91, %c0_92, %c0_93] : memref<4x8x8x128xf32, #tpu.memory_space<vmem>>, vector<4x8x8x128xf32>
    %75 = vector.shape_cast %74 : vector<4x8x8x128xf32> to vector<4x64x128xf32>
    %76 = vector.shape_cast %73 : vector<4x128xf32> to vector<4x1x128xf32>
    %77 = vector.broadcast %76 : vector<4x1x128xf32> to vector<4x64x128xf32>
    %78 = arith.mulf %41, %77 : vector<4x64x128xf32>
    %79 = arith.addf %78, %75 : vector<4x64x128xf32>
    %cst_94 = arith.constant 0.000000e+00 : f32
    %80 = vector.broadcast %cst_94 : f32 to vector<4x64x128xf32>
    %81 = arith.maximumf %79, %80 : vector<4x64x128xf32>
    %82 = vector.shape_cast %81 : vector<4x64x128xf32> to vector<4x8x8x128xf32>
    %c0_95 = arith.constant 0 : index
    %c0_96 = arith.constant 0 : index
    %c0_97 = arith.constant 0 : index
    %c0_98 = arith.constant 0 : index
    %83 = vector.load %arg8[%c0_95, %c0_96, %c0_97, %c0_98] : memref<4x8x8x128xf32, #tpu.memory_space<vmem>>, vector<4x8x8x128xf32>
    tpu.vector_store %arg8[%c0_95, %c0_96, %c0_97, %c0_98], %82 {strides = array<i32>} : memref<4x8x8x128xf32, #tpu.memory_space<vmem>>, vector<4x8x8x128xf32>,
    return
  }
  func.func @transform_0(%arg0: i32) -> (i32, i32, i32, i32) {
    %c0_i32 = arith.constant 0 : i32
    %c0_i32_0 = arith.constant 0 : i32
    %c0_i32_1 = arith.constant 0 : i32
    %c0_i32_2 = arith.constant 0 : i32
    return %arg0, %c0_i32, %c0_i32_0, %c0_i32_1 : i32, i32, i32, i32
  }
  func.func @transform_1(%arg0: i32) -> (i32, i32) {
    %c0_i32 = arith.constant 0 : i32
    %c0_i32_0 = arith.constant 0 : i32
    %c0_i32_1 = arith.constant 0 : i32
    return %c0_i32, %c0_i32_0 : i32, i32
  }
  func.func @transform_2(%arg0: i32) -> (i32, i32) {
    %c0_i32 = arith.constant 0 : i32
    %c0_i32_0 = arith.constant 0 : i32
    %c0_i32_1 = arith.constant 0 : i32
    return %c0_i32, %c0_i32_0 : i32, i32
  }
  func.func @transform_3(%arg0: i32) -> (i32, i32) {
    %c0_i32 = arith.constant 0 : i32
    %c0_i32_0 = arith.constant 0 : i32
    %c0_i32_1 = arith.constant 0 : i32
    return %c0_i32, %c0_i32_0 : i32, i32
  }
  func.func @transform_4(%arg0: i32) -> (i32, i32) {
    %c0_i32 = arith.constant 0 : i32
    %c0_i32_0 = arith.constant 0 : i32
    %c0_i32_1 = arith.constant 0 : i32
    return %c0_i32, %c0_i32_0 : i32, i32
  }
  func.func @transform_5(%arg0: i32) -> (i32, i32) {
    %c0_i32 = arith.constant 0 : i32
    %c0_i32_0 = arith.constant 0 : i32
    %c0_i32_1 = arith.constant 0 : i32
    return %c0_i32, %c0_i32_0 : i32, i32
  }
  func.func @transform_6(%arg0: i32) -> (i32, i32) {
    %c0_i32 = arith.constant 0 : i32
    %c0_i32_0 = arith.constant 0 : i32
    %c0_i32_1 = arith.constant 0 : i32
    return %c0_i32, %c0_i32_0 : i32, i32
  }
  func.func @transform_7(%arg0: i32) -> (i32, i32, i32, i32) {
    %c0_i32 = arith.constant 0 : i32
    %c0_i32_0 = arith.constant 0 : i32
    %c0_i32_1 = arith.constant 0 : i32
    %c0_i32_2 = arith.constant 0 : i32
    return %arg0, %c0_i32, %c0_i32_0, %c0_i32_1 : i32, i32, i32, i32
  }
}

</mosaic_0001>

<bundles_post_ra>
// kernel: tpu_custom_call.1
= control target key start
LH: loop header
LB: loop body
LE: loop exit
PB: predicated region body
PF: predicated region fallthrough
CT: control target
= control target key end

     0   :  { %12 = vsyncpa [#allocation5], 0  ;;  %s5281_s0 = inlined_call_operand.hbm [shape: f32[8,8,8,128], index: 0, kind: input, shape index: {}]   ;;  %s5282_s1 = inlined_call_operand.hbm [shape: f32[1152,128], index: 1, kind: input, shape index: {}]   ;;  %s5283_s2 = inlined_call_operand.vmem [shape: f32[1,128], index: 2, kind: input, shape index: {}]   ;;  %s5284_s3 = inlined_call_operand.vmem [shape: f32[8,128], index: 3, kind: input, shape index: {}]   ;;  %s5285_s4 = inlined_call_operand.vmem [shape: f32[1,8], index: 4, kind: input, shape index: {}]   ;;  %s5286_s5 = inlined_call_operand.vmem [shape: f32[8,128], index: 5, kind: input, shape index: {}]   ;;  %s5287_s6 = inlined_call_operand.vmem [shape: f32[1,128], index: 6, kind: input, shape index: {}]   ;;  %s5288_s7 = inlined_call_operand.hbm [shape: f32[8,8,8,128], index: 7, kind: output, shape index: {}]  }
   0x1   :  { %14 = vsyncpa [#allocation5 + $0x1], 0 }
   0x2   :  { %15 = vsyncpa [#allocation8], 0 }
   0x3   :  { %16 = vsyncpa [#allocation6], 0 }
   0x4   :  { %18 = vsyncpa [#allocation6 + $0x1], 0  ;;  %s3920_s24 = smov 0   ;;  %s3922_s25 = smov 0  }
   0x5   :  { %s3924_s26 = smov 0   ;;  %s3926_s27 = smov 0  }
   0x6 LB: > { %s3941_s28 = sadd.s32 4294967295, %s3868_s27   ;;  %s3048_s29 = sadd.s32 4294967294, %s3868_s27   ;;  %s3868_s27 = sphi %s3926_s27, %s5412_s27   ;;  %s3864_s26 = sphi %s3924_s26, %s5411_s26   ;;  %s3860_s25 = sphi %s3922_s25, %s5410_s25   ;;  %s3856_s24 = sphi %s3920_s24, %s5409_s24  }
   0x7   : > { %p44_p0 = scmp.ne.s32.totalorder %s3860_s25, %s3856_s24  ;;  %p5289_p1 = scmp.eq.s32.totalorder %s3941_s28, 0 }
   0x8   : > { %p200_p3 = scmp.eq.s32.totalorder %s3048_s29, 1  ;;  %p3049_p5 = scmp.ge.s32.totalorder %s3868_s27, 1 }
   0x9   : > { %p3950_p4 = por %p5289_p1, %p44_p0  ;;  %p207_p7 = scmp.lt.s32.totalorder %s3868_s27, 3 }
   0xa   : > { %p3955_p6 = por %p200_p3, %p44_p0  ;;  %s3870_s10 = smov [#allocation7]  }
   0xb   : > { %s5332_s30 = scalar_select %p3950_p4, 1, 0 }
   0xc   : > { %s5333_s8 = scalar_select %p3955_p6, 1, 0 }
   0xd   : > { %p3960_p8 = pnand %p3049_p5, %p207_p7  ;;  %s219_s11 = sshll.u32 %s3870_s10, 4  ;;  %s3964_s11 = int_to_ptr.vmem [resolvable:$true] %s219_s11 }
   0xe   : > { %s3976_s13 = sadd.s32 1, %s3868_s27   ;;  %s31_s14 = sadd.s32 1, %s3864_s26 }
   0xf   : > { %s5334_s9 = scalar_select %p3960_p8, 1, 0 }
  0x10   : > { %p3633_p9 = pneg %p3960_p8  ;;  %s28_s15 = ssub.s32 %s3868_s27, %s3976_s13 }
  0x11   : > { %s3740_s18 = scalar_lea.hbm %s5282_s1, 18432 }
  0x12   : > { %p3971_p11 = pnand %p3633_p9, %p5289_p1  ;;  %p3741_p12 = scmp.ne.s32.totalorder %s5282_s1, %s3740_s18 }
  0x13   : > { %p3747_p5 = scmp.lt.u32.totalorder %s3740_s18, %s5282_s1 }
  0x14   : > { %p3742_p13 = pneg %p3971_p11 }
  0x16   : > { %p3743_p0 = pnand %p3742_p13, %p3741_p12 }
  0x18   : > { %p3744_p3 = pneg %p3743_p0 }
  0x1a   : > { %p3749_p7 = pnand %p3747_p5, %p3744_p3 }
  0x1c   : > { %3752 = shalt.err (!%p3749_p7)
}
  0x1d   : > { %s3753_s23 = scalar_lea.vmem %s3964_s11, 18432  ;;  %p3761_p2 = scmp.lt.s32.totalorder %s3964_s11, %s3964_s11 }
  0x1e   : > { %p3754_p9 = scmp.ne.s32.totalorder %s3964_s11, %s3753_s23  ;;  %p3762_p6 = scmp.lt.s32.totalorder %s3753_s23, %s3753_s23 }
  0x20   : > { %p3756_p10 = pnand %p3754_p9, %p3742_p13  ;;  %p3763_p4 = por %p3762_p6, %p3761_p2 }
  0x22   : > { %p3757_p1 = pneg %p3756_p10 }
  0x24   : > { %p3764_p8 = pnand %p3763_p4, %p3757_p1 }
  0x26   : > { %3767 = shalt.err (!%p3764_p8)
}
  0x27   : > { %s5292_s29 = smov 128   ;;  %s3872_s10 = smov 8  }
  0x28   : > { %3636 = dma.hbm_to_vmem [thread:$0]  (!%p3971_p11), %s5282_s1, 18432, %s3964_s11, [#allocation8], %s5292_s29, %s5292_s29, %s3872_s10  }
  0x29   : > { %p29_p1 = scmp.eq.s32.totalorder %s28_s15, 0  ;;  %p38_p2 = scmp.ne.s32.totalorder %s3864_s26, %s3860_s25 }
  0x2a   : > { %p39_p4 = scmp.eq.s32.totalorder %s3868_s27, 0  ;;  %p3646_p6 = scmp.lt.s32.totalorder %s3868_s27, 2 }
  0x2b   : > { %s4010_s18 = scalar_select %p29_p1, %s3864_s26, %s31_s14  }
  0x2c   : > { %p40_p8 = por %p39_p4, %p38_p2  ;;  %p5336_p10 = scmp.eq.s32.totalorder %s3941_s28, 1 }
  0x2d   : > { %s248_s12 = sand.u32 1, %s3864_s26   ;;  %s3070_s20 = sshll.u32 %s3868_s27, 12 }
  0x2e   : > { %p4014_p12 = por %p5336_p10, %p38_p2  ;;  %s3052_s21 = sshll.u32 %s248_s12, 8 }
  0x2f   : > { %s4023_s16 = scalar_lea.hbm %s5281_s0, %s3070_s20  ;;  %s252_s11 = scalar_lea.vmem [#allocation4], %s3052_s21 }
  0x30   : > { %s260_s14 = sshll.u32 %s252_s11, 4  ;;  %p4025_p11 = pnand %p3646_p6, %p40_p8  ;;  %s4029_s14 = int_to_ptr.vmem [resolvable:$true] %s260_s14 }
  0x31   : > { %s4031_s17 = scalar_lea.sflag [#allocation5], %s248_s12  ;;  %s3768_s29 = scalar_lea.hbm %s4023_s16, 4096 }
  0x32   : > { %p3769_p13 = scmp.ne.s32.totalorder %s4023_s16, %s3768_s29  ;;  %p3770_p0 = pneg %p4025_p11 }
  0x33   : > { %s3773_s22 = scalar_lea.hbm %s5281_s0, 8192  ;;  %p3774_p7 = scmp.lt.u32.totalorder %s4023_s16, %s5281_s0 }
  0x34   : > { %p3771_p3 = pnand %p3770_p0, %p3769_p13  ;;  %p3775_p9 = scmp.lt.u32.totalorder %s3773_s22, %s3768_s29 }
  0x35   : > { %p3777_p2 = scmp.lt.u32.totalorder %s3768_s29, %s4023_s16 }
  0x36   : > { %p3772_p5 = pneg %p3771_p3  ;;  %p3776_p1 = por %p3775_p9, %p3774_p7 }
  0x38   : > { %p3778_p4 = por %p3777_p2, %p3776_p1 }
  0x3a   : > { %p3779_p6 = pnand %p3778_p4, %p3772_p5 }
  0x3c   : > { %3782 = shalt.err (!%p3779_p6)
}
  0x3d   : > { %s3783_s12 = scalar_lea.vmem %s4029_s14, 4096  ;;  %s3873_s20 = smov [#allocation4]  }
  0x3e   : > { %p3784_p8 = scmp.ne.s32.totalorder %s4029_s14, %s3783_s12  ;;  %s3788_s21 = sshll.u32 %s3873_s20, 4  ;;  %s3789_s21 = int_to_ptr.vmem [resolvable:$false] %s3788_s21 }
  0x3f   : > { %s3790_s23 = scalar_lea.vmem %s3789_s21, 8192  ;;  %p3791_p3 = scmp.lt.s32.totalorder %s4029_s14, %s3789_s21 }
  0x40   : > { %p3786_p10 = pnand %p3784_p8, %p3770_p0  ;;  %p3792_p7 = scmp.lt.s32.totalorder %s3790_s23, %s3783_s12 }
  0x42   : > { %p3787_p13 = pneg %p3786_p10  ;;  %p3793_p9 = por %p3792_p7, %p3791_p3 }
  0x44   : > { %p3794_p1 = pnand %p3793_p9, %p3787_p13 }
  0x46   : > { %3797 = shalt.err (!%p3794_p1)
}
  0x47   : > { %s5339_s29 = smov 128   ;;  %p5340_p0 = scmp.ne.s32.totalorder %s5334_s9, 0 }
  0x48   : > { %3640 = dma.hbm_to_vmem [thread:$0]  (!%p4025_p11), %s4023_s16, 4096, %s4029_s14, %s4031_s17, %s5339_s29, %s5339_s29, %s3872_s10  }
  0x49   : > { %272 = sbr.rel (%p5340_p0) target bundleno = 1042 (0x412), region = 48 }
  0x50   : > { %s4065_s22 = sand.u32 1, %s3860_s25   ;;  %p5341_p5 = scmp.ne.s32.totalorder %s5332_s30, 0 }
  0x51   : > { %s3057_s11 = sshll.u32 %s4065_s22, 8  ;;  %s275_s12 = scalar_lea.sflag [#allocation5], %s4065_s22 }
  0x52   : > { %s4071_s15 = scalar_lea.vmem [#allocation4], %s3057_s11 }
  0x53   : > { %3843 = dma.done.wait (%p5341_p5), %s275_s12, 4096  }
  0x54   : > { %3845 = vsyncadd (%p5341_p5), %s275_s12, 4294963200  ;;  %p5342_p11 = scmp.eq.s32.totalorder %s3941_s28, 0 }
  0x56   : > { %3847 = dma.done.wait (%p5342_p11), [#allocation8], 18432   ;;  %p5343_p2 = pmov %p5342_p11 }
  0x57   : > { %v5302_v0 = vmov 0.0|0.0   ;;  %v3875_v1 = vmov 0.0   ;;  %v1326_v2 = vld [vmem:[#allocation7] sm:$0xff]  ;;  %v1327_v3 = vld [vmem:[#allocation7 + $0x8] sm:$0xff]  ;;  %v1328_v7 = vld [vmem:[#allocation7 + $0x10] sm:$0xff]  ;;  %s5151_s12 = scalar_lea.vmem [#allocation9], %s3057_s11 }
  0x58   : > { %3849 = vsyncadd (%p5343_p2), [#allocation8], 4294948864  ;;  %3201 = vmatprep.subr.bf16.mxu1 %v5302_v0  ;;  %3249 = vmatprep.subr.bf16.mxu0 %v5302_v0  ;;  %315 = vst [vmem:[#allocation2] sm:$0xff] %v3875_v1  ;;  %v1358_v4 = vld [vmem:[#allocation7 + $0x100] sm:$0xff]  ;;  %v3202_v5 = vpack.c.bf16 %v1327_v3, %v1326_v2  ;;  %v1359_v6 = vld [vmem:[#allocation7 + $0x108] sm:$0xff]  ;;  %s3072_s11 = sshll.u32 %s3941_s28, 12 }
  0x59   : > { %316 = vst [vmem:[#allocation2 + $0x8] sm:$0x3] %v3875_v1  ;;  %317 = vst [vmem:[#allocation2 + $0xa0] sm:$0xff] %v3875_v1  ;;  %v1329_v8 = vld [vmem:[#allocation7 + $0x18] sm:$0xff]  ;;  %v3250_v9 = vpack.c.bf16 %v1359_v6, %v1358_v4  ;;  %v1360_v10 = vld [vmem:[#allocation7 + $0x110] sm:$0xff]  ;;  %s5227_s9 = scalar_lea.hbm %s5288_s7, %s3072_s11  ;;  %s2951_s10 = scalar_lea.sflag [#allocation6], %s4065_s22 }
  0x5a   : > { %318 = vst [vmem:[#allocation2 + $0xa8] sm:$0x3] %v3875_v1  ;;  %319 = vst [vmem:[#allocation2 + $0x140] sm:$0xff] %v3875_v1  ;;  %v1361_v11 = vld [vmem:[#allocation7 + $0x118] sm:$0xff]  ;;  %3203 = vmatpush1.bf16.msra.mxu1 %v3202_v5  ;;  %v3205_v12 = vpack.c.bf16 %v1329_v8, %v1328_v7  ;;  %v1330_v14 = vld [vmem:[#allocation7 + $0x20] sm:$0xff]  ;;  %s3877_s14 = smov [#allocation9]  }
  0x5b   : > { %320 = vst [vmem:[#allocation2 + $0x148] sm:$0x3] %v3875_v1  ;;  %321 = vst [vmem:[#allocation2 + $0x1e0] sm:$0xff] %v3875_v1  ;;  %3251 = vmatpush1.bf16.msra.mxu0 %v3250_v9  ;;  %3204 = vmatprep.subr.bf16.mxu1 %v5302_v0  ;;  %v3253_v13 = vpack.c.bf16 %v1361_v11, %v1360_v10  ;;  %v1331_v15 = vld [vmem:[#allocation7 + $0x28] sm:$0xff]  ;;  %v1362_v16 = vld [vmem:[#allocation7 + $0x120] sm:$0xff]  ;;  %s3802_s17 = sshll.u32 %s3877_s14, 4  ;;  %s3803_s17 = int_to_ptr.vmem [resolvable:$false] %s3802_s17 }
  0x5c   : > { %322 = vst [vmem:[#allocation2 + $0x1e8] sm:$0x3] %v3875_v1  ;;  %324 = vst [vmem:[#allocation2 + $0x90] sm:$0xff] %v3875_v1  ;;  %3252 = vmatprep.subr.bf16.mxu0 %v5302_v0  ;;  %v1363_v17 = vld [vmem:[#allocation7 + $0x128] sm:$0xff]  ;;  %v3208_v18 = vpack.c.bf16 %v1331_v15, %v1330_v14  ;;  %v1332_v20 = vld [vmem:[#allocation7 + $0x30] sm:$0xff]  ;;  %s3804_s20 = scalar_lea.vmem %s3803_s17, 8192 }
  0x5d   : > { %325 = vst [vmem:[#allocation2 + $0x98] sm:$0x3] %v3875_v1  ;;  %326 = vst [vmem:[#allocation2 + $0x130] sm:$0xff] %v3875_v1  ;;  %v3256_v19 = vpack.c.bf16 %v1363_v17, %v1362_v16  ;;  %v1333_v21 = vld [vmem:[#allocation7 + $0x38] sm:$0xff]  ;;  %v1364_v22 = vld [vmem:[#allocation7 + $0x130] sm:$0xff] }
  0x5e   : > { %327 = vst [vmem:[#allocation2 + $0x138] sm:$0x3] %v3875_v1  ;;  %328 = vst [vmem:[#allocation2 + $0x1d0] sm:$0xff] %v3875_v1  ;;  %3206 = vmatpush1.bf16.msra.mxu1 %v3205_v12  ;;  %v1365_v23 = vld [vmem:[#allocation7 + $0x138] sm:$0xff]  ;;  %v3211_v24 = vpack.c.bf16 %v1333_v21, %v1332_v20  ;;  %v1334_v26 = vld [vmem:[#allocation7 + $0x40] sm:$0xff] }
  0x5f   : > { %329 = vst [vmem:[#allocation2 + $0x1d8] sm:$0x3] %v3875_v1  ;;  %330 = vst [vmem:[#allocation2 + $0x270] sm:$0xff] %v3875_v1  ;;  %3254 = vmatpush1.bf16.msra.mxu0 %v3253_v13  ;;  %3207 = vmatprep.subr.bf16.mxu1 %v5302_v0  ;;  %v3259_v25 = vpack.c.bf16 %v1365_v23, %v1364_v22  ;;  %v1335_v27 = vld [vmem:[#allocation7 + $0x48] sm:$0xff]  ;;  %v1366_v28 = vld [vmem:[#allocation7 + $0x140] sm:$0xff] }
  0x60   : > { %331 = vst [vmem:[#allocation2 + $0x278] sm:$0x3] %v3875_v1  ;;  %333 = vst [vmem:[#allocation2 + $0x10] sm:$0x1] %v3875_v1  ;;  %3255 = vmatprep.subr.bf16.mxu0 %v5302_v0  ;;  %v1367_v29 = vld [vmem:[#allocation7 + $0x148] sm:$0xff]  ;;  %v3214_v30 = vpack.c.bf16 %v1335_v27, %v1334_v26  ;;  %v1336_v32 = vld [vmem:[#allocation7 + $0x50] sm:$0xff] }
  0x61   : > { %334 = vst [vmem:[#allocation2 + $0x20] sm:$0x1] %v3875_v1  ;;  %335 = vst [vmem:[#allocation2 + $0x30] sm:$0x1] %v3875_v1  ;;  %v3262_v31 = vpack.c.bf16 %v1367_v29, %v1366_v28  ;;  %v1337_v33 = vld [vmem:[#allocation7 + $0x58] sm:$0xff]  ;;  %v1368_v34 = vld [vmem:[#allocation7 + $0x150] sm:$0xff] }
  0x62   : > { %336 = vst [vmem:[#allocation2 + $0x40] sm:$0x1] %v3875_v1  ;;  %337 = vst [vmem:[#allocation2 + $0x50] sm:$0x1] %v3875_v1  ;;  %3209 = vmatpush1.bf16.msra.mxu1 %v3208_v18  ;;  %v1369_v35 = vld [vmem:[#allocation7 + $0x158] sm:$0xff]  ;;  %v3217_v36 = vpack.c.bf16 %v1337_v33, %v1336_v32  ;;  %v1338_v38 = vld [vmem:[#allocation7 + $0x60] sm:$0xff] }
  0x63   : > { %338 = vst [vmem:[#allocation2 + $0x60] sm:$0x1] %v3875_v1  ;;  %339 = vst [vmem:[#allocation2 + $0x70] sm:$0x1] %v3875_v1  ;;  %3257 = vmatpush1.bf16.msra.mxu0 %v3256_v19  ;;  %3210 = vmatprep.subr.bf16.mxu1 %v5302_v0  ;;  %v3265_v37 = vpack.c.bf16 %v1369_v35, %v1368_v34  ;;  %v1339_v39 = vld [vmem:[#allocation7 + $0x68] sm:$0xff]  ;;  %v1370_v40 = vld [vmem:[#allocation7 + $0x160] sm:$0xff] }
  0x64   : > { %340 = vst [vmem:[#allocation2 + $0x80] sm:$0x1] %v3875_v1  ;;  %341 = vst [vmem:[#allocation2 + $0xb0] sm:$0x1] %v3875_v1  ;;  %3258 = vmatprep.subr.bf16.mxu0 %v5302_v0  ;;  %v1371_v41 = vld [vmem:[#allocation7 + $0x168] sm:$0xff]  ;;  %v4174_v43 = vld [vmem:[%s4071_s15] sm:$0xff]  ;;  %v3220_v44 = vpack.c.bf16 %v1339_v39, %v1338_v38 }
  0x65   : > { %342 = vst [vmem:[#allocation2 + $0xc0] sm:$0x1] %v3875_v1  ;;  %343 = vst [vmem:[#allocation2 + $0xd0] sm:$0x1] %v3875_v1  ;;  %v525_v42 = vld [vmem:[#allocation2 + $0x1] sm:$0xff]  ;;  %v4181_v46 = vld [vmem:[%s4071_s15 + $0x10] sm:$0xff]  ;;  %v3268_v47 = vpack.c.bf16 %v1371_v41, %v1370_v40 }
  0x66   : > { %344 = vst [vmem:[#allocation2 + $0xe0] sm:$0x1] %v3875_v1  ;;  %345 = vst [vmem:[#allocation2 + $0xf0] sm:$0x1] %v3875_v1  ;;  %3212 = vmatpush1.bf16.msra.mxu1 %v3211_v24  ;;  %1541 = vmatprep.mubr.f32.mxu1 %v525_v42  ;;  %v4178_v45 = vld [vmem:[%s4071_s15 + $0x8] sm:$0xff]  ;;  %v1340_v48 = vld [vmem:[#allocation7 + $0x70] sm:$0xff] }
  0x67   : > { %346 = vst [vmem:[#allocation2 + $0x100] sm:$0x1] %v3875_v1  ;;  %347 = vst [vmem:[#allocation2 + $0x110] sm:$0x1] %v3875_v1  ;;  %3260 = vmatpush1.bf16.msra.mxu0 %v3259_v25  ;;  %3213 = vmatprep.subr.bf16.mxu1 %v5302_v0  ;;  %v1341_v49 = vld [vmem:[#allocation7 + $0x78] sm:$0xff]  ;;  %v1372_v51 = vld [vmem:[#allocation7 + $0x170] sm:$0xff] }
  0x68   : > { %348 = vst [vmem:[#allocation2 + $0x120] sm:$0x1] %v3875_v1  ;;  %349 = vst [vmem:[#allocation2 + $0x150] sm:$0x1] %v3875_v1  ;;  %3261 = vmatprep.subr.bf16.mxu0 %v5302_v0  ;;  %v4187_v50 = vld [vmem:[%s4071_s15 + $0x18] sm:$0xff]  ;;  %v4192_v53 = vld [vmem:[%s4071_s15 + $0x20] sm:$0xff]  ;;  %v3223_v55 = vpack.c.bf16 %v1341_v49, %v1340_v48 }
  0x69   : > { %350 = vst [vmem:[#allocation2 + $0x160] sm:$0x1] %v3875_v1  ;;  %351 = vst [vmem:[#allocation2 + $0x170] sm:$0x1] %v3875_v1  ;;  %v1373_v52 = vld [vmem:[#allocation7 + $0x178] sm:$0xff]  ;;  %v4196_v54 = vld [vmem:[%s4071_s15 + $0x28] sm:$0xff] }
  0x6a   : > { %352 = vst [vmem:[#allocation2 + $0x180] sm:$0x1] %v3875_v1  ;;  %353 = vst [vmem:[#allocation2 + $0x190] sm:$0x1] %v3875_v1  ;;  %3215 = vmatpush1.bf16.msra.mxu1 %v3214_v30  ;;  %v4200_v56 = vld [vmem:[%s4071_s15 + $0x30] sm:$0xff]  ;;  %v3271_v57 = vpack.c.bf16 %v1373_v52, %v1372_v51  ;;  %v1342_v58 = vld [vmem:[#allocation7 + $0x80] sm:$0xff] }
  0x6b   : > { %354 = vst [vmem:[#allocation2 + $0x1a0] sm:$0x1] %v3875_v1  ;;  %355 = vst [vmem:[#allocation2 + $0x1b0] sm:$0x1] %v3875_v1  ;;  %3263 = vmatpush1.bf16.msra.mxu0 %v3262_v31  ;;  %3216 = vmatprep.subr.bf16.mxu1 %v5302_v0  ;;  %v1343_v59 = vld [vmem:[#allocation7 + $0x88] sm:$0xff]  ;;  %v404_v60 = vld [vmem:[%s4071_s15 + $0x38] sm:$0xff] }
  0x6c   : > { %356 = vst [vmem:[#allocation2 + $0x1c0] sm:$0x1] %v3875_v1  ;;  %357 = vst [vmem:[#allocation2 + $0x1f0] sm:$0x1] %v3875_v1  ;;  %3264 = vmatprep.subr.bf16.mxu0 %v5302_v0  ;;  %v1374_v61 = vld [vmem:[#allocation7 + $0x180] sm:$0xff]  ;;  %v1375_v62 = vld [vmem:[#allocation7 + $0x188] sm:$0xff]  ;;  %v3226_v3 = vpack.c.bf16 %v1343_v59, %v1342_v58 }
  0x6d   : > { %358 = vst [vmem:[#allocation2 + $0x200] sm:$0x1] %v3875_v1  ;;  %359 = vst [vmem:[#allocation2 + $0x210] sm:$0x1] %v3875_v1  ;;  %v4210_v2 = vld [vmem:[%s4071_s15 + $0x40] sm:$0xff]  ;;  %v3274_v4 = vpack.c.bf16 %v1375_v62, %v1374_v61  ;;  %v1344_v5 = vld [vmem:[#allocation7 + $0x90] sm:$0xff] }
  0x6e   : > { %360 = vst [vmem:[#allocation2 + $0x220] sm:$0x1] %v3875_v1  ;;  %361 = vst [vmem:[#allocation2 + $0x230] sm:$0x1] %v3875_v1  ;;  %3218 = vmatpush1.bf16.msra.mxu1 %v3217_v36  ;;  %v1345_v6 = vld [vmem:[#allocation7 + $0x98] sm:$0xff]  ;;  %v1376_v7 = vld [vmem:[#allocation7 + $0x190] sm:$0xff] }
  0x6f   : > { %362 = vst [vmem:[#allocation2 + $0x240] sm:$0x1] %v3875_v1  ;;  %363 = vst [vmem:[#allocation2 + $0x250] sm:$0x1] %v3875_v1  ;;  %3266 = vmatpush1.bf16.msra.mxu0 %v3265_v37  ;;  %3219 = vmatprep.subr.bf16.mxu1 %v5302_v0  ;;  %v1377_v8 = vld [vmem:[#allocation7 + $0x198] sm:$0xff]  ;;  %v3229_v9 = vpack.c.bf16 %v1345_v6, %v1344_v5  ;;  %v4216_v10 = vld [vmem:[%s4071_s15 + $0x48] sm:$0xff] }
  0x70   : > { %364 = vst [vmem:[#allocation2 + $0x260] sm:$0x1] %v3875_v1  ;;  %365 = vst [vmem:[#allocation2 + $0x19] sm:$0x1] %v3875_v1  ;;  %3267 = vmatprep.subr.bf16.mxu0 %v5302_v0  ;;  %v3277_v11 = vpack.c.bf16 %v1377_v8, %v1376_v7  ;;  %v1346_v12 = vld [vmem:[#allocation7 + $0xa0] sm:$0xff]  ;;  %v1347_v13 = vld [vmem:[#allocation7 + $0xa8] sm:$0xff] }
  0x71   : > { %366 = vst [vmem:[#allocation2 + $0x29] sm:$0x1] %v3875_v1  ;;  %367 = vst [vmem:[#allocation2 + $0x39] sm:$0x1] %v3875_v1  ;;  %v1378_v14 = vld [vmem:[#allocation7 + $0x1a0] sm:$0xff]  ;;  %v1379_v15 = vld [vmem:[#allocation7 + $0x1a8] sm:$0xff]  ;;  %v3232_v18 = vpack.c.bf16 %v1347_v13, %v1346_v12 }
  0x72   : > { %368 = vst [vmem:[#allocation2 + $0x49] sm:$0x1] %v3875_v1  ;;  %369 = vst [vmem:[#allocation2 + $0x59] sm:$0x1] %v3875_v1  ;;  %3221 = vmatpush1.bf16.msra.mxu1 %v3220_v44  ;;  %v4222_v16 = vld [vmem:[%s4071_s15 + $0x50] sm:$0xff]  ;;  %v4226_v17 = vld [vmem:[%s4071_s15 + $0x58] sm:$0xff]  ;;  %v3280_v20 = vpack.c.bf16 %v1379_v15, %v1378_v14 }
  0x73   : > { %370 = vst [vmem:[#allocation2 + $0x69] sm:$0x1] %v3875_v1  ;;  %371 = vst [vmem:[#allocation2 + $0x79] sm:$0x1] %v3875_v1  ;;  %3269 = vmatpush1.bf16.msra.mxu0 %v3268_v47  ;;  %3222 = vmatprep.subr.bf16.mxu1 %v5302_v0  ;;  %v4230_v19 = vld [vmem:[%s4071_s15 + $0x60] sm:$0xff]  ;;  %v1348_v21 = vld [vmem:[#allocation7 + $0xb0] sm:$0xff] }
  0x74   : > { %372 = vst [vmem:[#allocation2 + $0x89] sm:$0x1] %v3875_v1  ;;  %373 = vst [vmem:[#allocation2 + $0xb9] sm:$0x1] %v3875_v1  ;;  %3270 = vmatprep.subr.bf16.mxu0 %v5302_v0  ;;  %v1349_v22 = vld [vmem:[#allocation7 + $0xb8] sm:$0xff]  ;;  %v4235_v23 = vld [vmem:[%s4071_s15 + $0x68] sm:$0xff] }
  0x75   : > { %374 = vst [vmem:[#allocation2 + $0xc9] sm:$0x1] %v3875_v1  ;;  %375 = vst [vmem:[#allocation2 + $0xd9] sm:$0x1] %v3875_v1  ;;  %v1380_v24 = vld [vmem:[#allocation7 + $0x1b0] sm:$0xff]  ;;  %v1381_v25 = vld [vmem:[#allocation7 + $0x1b8] sm:$0xff]  ;;  %v3235_v28 = vpack.c.bf16 %v1349_v22, %v1348_v21 }
  0x76   : > { %376 = vst [vmem:[#allocation2 + $0xe9] sm:$0x1] %v3875_v1  ;;  %377 = vst [vmem:[#allocation2 + $0xf9] sm:$0x1] %v3875_v1  ;;  %3224 = vmatpush1.bf16.msra.mxu1 %v3223_v55  ;;  %v4240_v26 = vld [vmem:[%s4071_s15 + $0x70] sm:$0xff]  ;;  %v4244_v27 = vld [vmem:[%s4071_s15 + $0x78] sm:$0xff]  ;;  %v3283_v29 = vpack.c.bf16 %v1381_v25, %v1380_v24 }
  0x77   : > { %378 = vst [vmem:[#allocation2 + $0x109] sm:$0x1] %v3875_v1  ;;  %379 = vst [vmem:[#allocation2 + $0x119] sm:$0x1] %v3875_v1  ;;  %3272 = vmatpush1.bf16.msra.mxu0 %v3271_v57  ;;  %3225 = vmatprep.subr.bf16.mxu1 %v5302_v0  ;;  %v1350_v30 = vld [vmem:[#allocation7 + $0xc0] sm:$0xff]  ;;  %v1351_v31 = vld [vmem:[#allocation7 + $0xc8] sm:$0xff] }
  0x78   : > { %380 = vst [vmem:[#allocation2 + $0x129] sm:$0x1] %v3875_v1  ;;  %381 = vst [vmem:[#allocation2 + $0x159] sm:$0x1] %v3875_v1  ;;  %3273 = vmatprep.subr.bf16.mxu0 %v5302_v0  ;;  %v4249_v32 = vld [vmem:[%s4071_s15 + $0x80] sm:$0xff]  ;;  %v1383_v34 = vld [vmem:[#allocation7 + $0x1c8] sm:$0xff]  ;;  %v3238_v35 = vpack.c.bf16 %v1351_v31, %v1350_v30 }
  0x79   : > { %382 = vst [vmem:[#allocation2 + $0x169] sm:$0x1] %v3875_v1  ;;  %383 = vst [vmem:[#allocation2 + $0x179] sm:$0x1] %v3875_v1  ;;  %v1382_v33 = vld [vmem:[#allocation7 + $0x1c0] sm:$0xff]  ;;  %v1352_v37 = vld [vmem:[#allocation7 + $0xd0] sm:$0xff] }
  0x7a   : > { %384 = vst [vmem:[#allocation2 + $0x189] sm:$0x1] %v3875_v1  ;;  %385 = vst [vmem:[#allocation2 + $0x199] sm:$0x1] %v3875_v1  ;;  %3227 = vmatpush1.bf16.msra.mxu1 %v3226_v3  ;;  %v3286_v36 = vpack.c.bf16 %v1383_v34, %v1382_v33  ;;  %v1353_v38 = vld [vmem:[#allocation7 + $0xd8] sm:$0xff]  ;;  %v4255_v39 = vld [vmem:[%s4071_s15 + $0x88] sm:$0xff] }
  0x7b   : > { %386 = vst [vmem:[#allocation2 + $0x1a9] sm:$0x1] %v3875_v1  ;;  %387 = vst [vmem:[#allocation2 + $0x1b9] sm:$0x1] %v3875_v1  ;;  %3275 = vmatpush1.bf16.msra.mxu0 %v3274_v4  ;;  %3228 = vmatprep.subr.bf16.mxu1 %v5302_v0  ;;  %v1384_v40 = vld [vmem:[#allocation7 + $0x1d0] sm:$0xff]  ;;  %v1385_v41 = vld [vmem:[#allocation7 + $0x1d8] sm:$0xff]  ;;  %v3241_v44 = vpack.c.bf16 %v1353_v38, %v1352_v37 }
  0x7c   : > { %388 = vst [vmem:[#allocation2 + $0x1c9] sm:$0x1] %v3875_v1  ;;  %389 = vst [vmem:[#allocation2 + $0x1f9] sm:$0x1] %v3875_v1  ;;  %3276 = vmatprep.subr.bf16.mxu0 %v5302_v0  ;;  %v4260_v42 = vld [vmem:[%s4071_s15 + $0x90] sm:$0xff]  ;;  %v4264_v47 = vld [vmem:[%s4071_s15 + $0x98] sm:$0xff]  ;;  %v3289_v48 = vpack.c.bf16 %v1385_v41, %v1384_v40 }
  0x7d   : > { %390 = vst [vmem:[#allocation2 + $0x209] sm:$0x1] %v3875_v1  ;;  %391 = vst [vmem:[#allocation2 + $0x219] sm:$0x1] %v3875_v1  ;;  %v1354_v49 = vld [vmem:[#allocation7 + $0xe0] sm:$0xff]  ;;  %v1355_v51 = vld [vmem:[#allocation7 + $0xe8] sm:$0xff] }
  0x7e   : > { %392 = vst [vmem:[#allocation2 + $0x229] sm:$0x1] %v3875_v1  ;;  %393 = vst [vmem:[#allocation2 + $0x239] sm:$0x1] %v3875_v1  ;;  %3230 = vmatpush1.bf16.msra.mxu1 %v3229_v9  ;;  %v1386_v52 = vld [vmem:[#allocation7 + $0x1e0] sm:$0xff]  ;;  %v1387_v55 = vld [vmem:[#allocation7 + $0x1e8] sm:$0xff]  ;;  %v3244_v59 = vpack.c.bf16 %v1355_v51, %v1354_v49 }
  0x7f   : > { %394 = vst [vmem:[#allocation2 + $0x249] sm:$0x1] %v3875_v1  ;;  %395 = vst [vmem:[#allocation2 + $0x259] sm:$0x1] %v3875_v1  ;;  %3278 = vmatpush1.bf16.msra.mxu0 %v3277_v11  ;;  %3231 = vmatprep.subr.bf16.mxu1 %v5302_v0  ;;  %v4270_v57 = vld [vmem:[%s4071_s15 + $0xa0] sm:$0xff]  ;;  %v4274_v58 = vld [vmem:[%s4071_s15 + $0xa8] sm:$0xff]  ;;  %v3292_v61 = vpack.c.bf16 %v1387_v55, %v1386_v52 }
  0x80   : > { %396 = vst [vmem:[#allocation2 + $0x269] sm:$0x1] %v3875_v1  ;;  %429 = vst [vmem:[#allocation2 + $0x11] sm:$0xff] %v4174_v43  ;;  %3279 = vmatprep.subr.bf16.mxu0 %v5302_v0  ;;  %v1356_v62 = vld [vmem:[#allocation7 + $0xf0] sm:$0xff]  ;;  %v1357_v3 = vld [vmem:[#allocation7 + $0xf8] sm:$0xff] }
  0x81   : > { %430 = vst [vmem:[#allocation2 + $0x21] sm:$0xff] %v4178_v45  ;;  %431 = vst [vmem:[#allocation2 + $0x31] sm:$0xff] %v4181_v46  ;;  %v1388_v4 = vld [vmem:[#allocation7 + $0x1f0] sm:$0xff]  ;;  %v1389_v5 = vld [vmem:[#allocation7 + $0x1f8] sm:$0xff]  ;;  %v3247_v7 = vpack.c.bf16 %v1357_v3, %v1356_v62 }
  0x82   : > { %432 = vst [vmem:[#allocation2 + $0x41] sm:$0xff] %v4187_v50  ;;  %433 = vst [vmem:[#allocation2 + $0x51] sm:$0xff] %v4192_v53  ;;  %3233 = vmatpush1.bf16.msra.mxu1 %v3232_v18  ;;  %v4284_v6 = vld [vmem:[%s4071_s15 + $0xb8] sm:$0xff]  ;;  %v4288_v8 = vld [vmem:[%s4071_s15 + $0xc0] sm:$0xff]  ;;  %v3295_v9 = vpack.c.bf16 %v1389_v5, %v1388_v4 }
  0x83   : > { %434 = vst [vmem:[#allocation2 + $0x61] sm:$0xff] %v4196_v54  ;;  %435 = vst [vmem:[#allocation2 + $0x71] sm:$0xff] %v4200_v56  ;;  %3281 = vmatpush1.bf16.msra.mxu0 %v3280_v20  ;;  %3234 = vmatprep.subr.bf16.mxu1 %v5302_v0  ;;  %v1390_v11 = vld [vmem:[#allocation7 + $0x200] sm:$0xff]  ;;  %v1391_v12 = vld [vmem:[#allocation7 + $0x208] sm:$0xff] }
  0x84   : > { %436 = vst [vmem:[#allocation2 + $0x81] sm:$0xff] %v404_v60  ;;  %437 = vst [vmem:[#allocation2 + $0xb1] sm:$0xff] %v4210_v2  ;;  %3282 = vmatprep.subr.bf16.mxu0 %v5302_v0  ;;  %v4278_v60 = vld [vmem:[%s4071_s15 + $0xb0] sm:$0xff]  ;;  %v4294_v13 = vld [vmem:[%s4071_s15 + $0xc8] sm:$0xff]  ;;  %v3298_v20 = vpack.c.bf16 %v1391_v12, %v1390_v11 }
  0x85   : > { %438 = vst [vmem:[#allocation2 + $0xc1] sm:$0xff] %v4216_v10  ;;  %439 = vst [vmem:[#allocation2 + $0xd1] sm:$0xff] %v4222_v16  ;;  %v1422_v14 = vld [vmem:[#allocation7 + $0x300] sm:$0xff]  ;;  %v1423_v15 = vld [vmem:[#allocation7 + $0x308] sm:$0xff] }
  0x86   : > { %440 = vst [vmem:[#allocation2 + $0xe1] sm:$0xff] %v4226_v17  ;;  %441 = vst [vmem:[#allocation2 + $0xf1] sm:$0xff] %v4230_v19  ;;  %3236 = vmatpush1.bf16.msra.mxu1 %v3235_v28  ;;  %v589_v18 = vld [vmem:[#allocation2 + $0x2] sm:$0xff]  ;;  %v1392_v21 = vld [vmem:[#allocation7 + $0x210] sm:$0xff]  ;;  %v4302_v28 = vpack.c.bf16 %v1423_v15, %v1422_v14 }
  0x87   : > { %v4206_v63 = vld [vmem:[#allocation2 + $0x10] sm:$0xff]  ;;  %442 = vst [vmem:[#allocation2 + $0x101] sm:$0xff] %v4235_v23  ;;  %443 = vst [vmem:[#allocation2 + $0x111] sm:$0xff] %v4240_v26  ;;  %3284 = vmatpush1.bf16.msra.mxu0 %v3283_v29  ;;  %3237 = vmatprep.subr.bf16.mxu1 %v5302_v0  ;;  %v1393_v25 = vld [vmem:[#allocation7 + $0x218] sm:$0xff] }
  0x88   : > { %1766 = vmatprep.mubr.f32.mxu0 %v4206_v63  ;;  %444 = vst [vmem:[#allocation2 + $0x121] sm:$0xff] %v4244_v27  ;;  %445 = vst [vmem:[#allocation2 + $0x151] sm:$0xff] %v4249_v32  ;;  %3285 = vmatprep.subr.bf16.mxu0 %v5302_v0  ;;  %v4299_v22 = vld [vmem:[%s4071_s15 + $0xd0] sm:$0xff]  ;;  %v654_v24 = vld [vmem:[#allocation2 + $0x20] sm:$0xff] }
  0x89   : > { %446 = vst [vmem:[#allocation2 + $0x161] sm:$0xff] %v4255_v39  ;;  %447 = vst [vmem:[#allocation2 + $0x171] sm:$0xff] %v4260_v42  ;;  %v4306_v29 = vld [vmem:[%s4071_s15 + $0xd8] sm:$0xff]  ;;  %v1424_v30 = vld [vmem:[#allocation7 + $0x310] sm:$0xff] }
  0x8a   : > { %3239 = vmatpush1.bf16.msra.mxu1 %v3238_v35  ;;  %448 = vst [vmem:[#allocation2 + $0x181] sm:$0xff] %v4264_v47  ;;  %449 = vst [vmem:[#allocation2 + $0x191] sm:$0xff] %v4270_v57  ;;  %v1425_v31 = vld [vmem:[#allocation7 + $0x318] sm:$0xff]  ;;  %v4311_v33 = vld [vmem:[%s4071_s15 + $0xe0] sm:$0xff]  ;;  %v3301_v35 = vpack.c.bf16 %v1393_v25, %v1392_v21 }
  0x8b   : > { %3287 = vmatpush1.bf16.msra.mxu0 %v3286_v36  ;;  %3240 = vmatprep.subr.bf16.mxu1 %v5302_v0  ;;  %450 = vst [vmem:[#allocation2 + $0x1a1] sm:$0xff] %v4274_v58  ;;  %451 = vst [vmem:[#allocation2 + $0x1b1] sm:$0xff] %v4278_v60  ;;  %v4315_v34 = vld [vmem:[#allocation2 + $0x12] sm:$0xff]  ;;  %v1394_v36 = vld [vmem:[#allocation7 + $0x220] sm:$0xff]  ;;  %v4322_v41 = vpack.c.bf16 %v1425_v31, %v1424_v30 }
  0x8c   : > { %3288 = vmatprep.subr.bf16.mxu0 %v5302_v0  ;;  %5344 = vst [vmem:[#allocation13_spill] sm:$0xff] %v4284_v6  ;;  %452 = vst [vmem:[#allocation2 + $0x1c1] sm:$0xff] %v4284_v6  ;;  %v4318_v37 = vld [vmem:[%s4071_s15 + $0xe8] sm:$0xff]  ;;  %v655_v38 = vld [vmem:[#allocation2 + $0x30] sm:$0xff] }
  0x8d   : > { %453 = vst [vmem:[#allocation2 + $0x1f1] sm:$0xff] %v4288_v8  ;;  %454 = vst [vmem:[#allocation2 + $0x201] sm:$0xff] %v4294_v13  ;;  %v1395_v40 = vld [vmem:[#allocation7 + $0x228] sm:$0xff]  ;;  %v4334_v49 = vld [vmem:[%s4071_s15 + $0xf8] sm:$0xff] }
  0x8e   : > { %3242 = vmatpush1.bf16.msra.mxu1 %v3241_v44  ;;  %455 = vst [vmem:[#allocation2 + $0x211] sm:$0xff] %v4299_v22  ;;  %456 = vst [vmem:[#allocation2 + $0x221] sm:$0xff] %v4306_v29  ;;  %v1426_v44 = vld [vmem:[#allocation7 + $0x320] sm:$0xff]  ;;  %v3304_v52 = vpack.c.bf16 %v1395_v40, %v1394_v36  ;;  %v1396_v55 = vld [vmem:[#allocation7 + $0x230] sm:$0xff] }
  0x8f   : > { %3290 = vmatpush1.bf16.msra.mxu0 %v3289_v48  ;;  %3243 = vmatprep.subr.bf16.mxu1 %v5302_v0  ;;  %457 = vst [vmem:[#allocation2 + $0x231] sm:$0xff] %v4311_v33  ;;  %5345 = vst [vmem:[#allocation14_spill] sm:$0xff] %v4318_v37  ;;  %v1427_v48 = vld [vmem:[#allocation7 + $0x328] sm:$0xff]  ;;  %v1429_v62 = vld [vmem:[#allocation7 + $0x338] sm:$0xff] }
  0x90   : > { %3291 = vmatprep.subr.bf16.mxu0 %v5302_v0  ;;  %458 = vst [vmem:[#allocation2 + $0x241] sm:$0xff] %v4318_v37  ;;  %5347 = vst [vmem:[#allocation16_spill] sm:$0xff] %v4334_v49  ;;  %v4336_v51 = vld [vmem:[#allocation2 + $0x22] sm:$0xff]  ;;  %v4346_v3 = vld [vmem:[#allocation2 + $0x32] sm:$0xff] }
  0x91   : > { %460 = vst [vmem:[#allocation2 + $0x261] sm:$0xff] %v4334_v49  ;;  %v657_v5 = vld [vmem:[#allocation2 + $0x50] sm:$0xff]  ;;  %v1430_v12 = vld [vmem:[#allocation7 + $0x340] sm:$0xff]  ;;  %v1431_v14 = vld [vmem:[#allocation7 + $0x348] sm:$0xff] }
  0x92   : > { %3245 = vmatpush1.bf16.msra.mxu1 %v3244_v59  ;;  %v1397_v59 = vld [vmem:[#allocation7 + $0x238] sm:$0xff]  ;;  %v1432_v25 = vld [vmem:[#allocation7 + $0x350] sm:$0xff]  ;;  %v1402_v36 = vld [vmem:[#allocation7 + $0x260] sm:$0xff] }
  0x93   : > { %3293 = vmatpush1.bf16.msra.mxu0 %v3292_v61  ;;  %3246 = vmatprep.subr.bf16.mxu1 %v5302_v0  ;;  %v4341_v61 = vpack.c.bf16 %v1427_v48, %v1426_v44  ;;  %v3307_v4 = vpack.c.bf16 %v1397_v59, %v1396_v55  ;;  %v1401_v21 = vld [vmem:[#allocation7 + $0x258] sm:$0xff]  ;;  %v1434_v44 = vld [vmem:[#allocation7 + $0x360] sm:$0xff]  ;;  %v1435_v48 = vld [vmem:[#allocation7 + $0x368] sm:$0xff] }
  0x94   : > { %3294 = vmatprep.subr.bf16.mxu0 %v5302_v0  ;;  %v1433_v30 = vld [vmem:[#allocation7 + $0x358] sm:$0xff]  ;;  %v1404_v55 = vld [vmem:[#allocation7 + $0x270] sm:$0xff]  ;;  %v1450_v49 = vld [vmem:[#allocation7 + $0x3e0] sm:$0xff] }
  0x95   : > { %v4368_v40 = vpack.c.bf16 %v1433_v30, %v1432_v25  ;;  %v1405_v59 = vld [vmem:[#allocation7 + $0x278] sm:$0xff]  ;;  %v4390_v25 = vld [vmem:[#allocation2 + $0xc0] sm:$0xff]  ;;  %v1408_v30 = vld [vmem:[#allocation7 + $0x290] sm:$0xff] }
  0x96   : > { %3248 = vmatpush1.bf16.msra.mxu1 %v3247_v7  ;;  %v1398_v7 = vld [vmem:[#allocation7 + $0x240] sm:$0xff]  ;;  %v1451_v6 = vld [vmem:[#allocation7 + $0x3e8] sm:$0xff] }
  0x97   : > { %3296 = vmatpush1.bf16.msra.mxu0 %v3295_v9  ;;  %3425 = vmatprep.subr.bf16.mxu1 %v5302_v0  ;;  %v1399_v9 = vld [vmem:[#allocation7 + $0x248] sm:$0xff] }
  0x98   : > { %3297 = vmatprep.subr.bf16.mxu0 %v5302_v0  ;;  %v3310_v15 = vpack.c.bf16 %v1399_v9, %v1398_v7  ;;  %v3319_v7 = vpack.c.bf16 %v1405_v59, %v1404_v55  ;;  %v661_v9 = vld [vmem:[#allocation2 + $0xb0] sm:$0xff]  ;;  %v1443_v59 = vld [vmem:[#allocation7 + $0x3a8] sm:$0xff] }
  0x99   : > { %1542 = vmatmul.mubr.f32.vlgmr.msra.gmra.mrb[0].mxu1 %v3875_v1 }
  0x9a   : > { %1767 = vmatmul.mubr.f32.vlgmr.msra.gmra.mrb[0].mxu0 %v589_v18  ;;  %1546 = vmatprep.mubr.f32.mxu1 %v4174_v43  ;;  %v4326_v43 = vld [vmem:[%s4071_s15 + $0xf0] sm:$0xff]  ;;  %v658_v18 = vld [vmem:[#allocation2 + $0x60] sm:$0xff] }
  0x9b   : > { %3299 = vmatpush1.bf16.msra.mxu0 %v3298_v20  ;;  %1771 = vmatprep.mubr.f32.mxu0 %v654_v24  ;;  %5346 = vst [vmem:[#allocation15_spill] sm:$0xff] %v4326_v43  ;;  %459 = vst [vmem:[#allocation2 + $0x251] sm:$0xff] %v4326_v43  ;;  %v1400_v20 = vld [vmem:[#allocation7 + $0x250] sm:$0xff] }
  0x9c   : > { %3300 = vmatprep.subr.bf16.mxu0 %v5302_v0  ;;  %3441 = vmatpush1.bf16.msra.mxu1 %v4302_v28  ;;  %v3313_v31 = vpack.c.bf16 %v1401_v21, %v1400_v20  ;;  %v597_v20 = vld [vmem:[#allocation2 + $0xa2] sm:$0xff] }
  0x9d   : > { %1547 = vmatmul.mubr.f32.gmra.mrb[2].mxu1 %v4206_v63  ;;  %3426 = vmatprep.subr.bf16.mxu1 %v5302_v0  ;;  %v656_v63 = vld [vmem:[#allocation2 + $0x40] sm:$0xff] }
  0x9e   : > { %1772 = vmatmul.mubr.f32.gmra.mrb[2].mxu0 %v4315_v34  ;;  %1551 = vmatprep.mubr.f32.mxu1 %v4178_v45  ;;  %v1428_v45 = vld [vmem:[#allocation7 + $0x330] sm:$0xff] }
  0x9f   : > { %1776 = vmatprep.mubr.f32.mxu0 %v655_v38  ;;  %3302 = vmatpush1.bf16.msra.mxu0 %v3301_v35  ;;  %v4350_v11 = vpack.c.bf16 %v1429_v62, %v1428_v45  ;;  %v659_v35 = vld [vmem:[#allocation2 + $0x70] sm:$0xff]  ;;  %v4377_v45 = vpack.c.bf16 %v1435_v48, %v1434_v44 }
  0xa0   : > { %3303 = vmatprep.subr.bf16.mxu0 %v5302_v0  ;;  %3442 = vmatpush1.bf16.msra.mxu1 %v4322_v41  ;;  %v1436_v62 = vld [vmem:[#allocation7 + $0x370] sm:$0xff] }
  0xa1   : > { %1552 = vmatmul.mubr.f32.gmra.mrb[4].mxu1 %v654_v24  ;;  %3427 = vmatprep.subr.bf16.mxu1 %v5302_v0  ;;  %v4359_v24 = vpack.c.bf16 %v1431_v14, %v1430_v12  ;;  %v1406_v12 = vld [vmem:[#allocation7 + $0x280] sm:$0xff]  ;;  %v1407_v14 = vld [vmem:[#allocation7 + $0x288] sm:$0xff]  ;;  %v4400_v44 = vld [vmem:[#allocation2 + $0xb2] sm:$0xff] }
  0xa2   : > { %1777 = vmatmul.mubr.f32.gmra.mrb[4].mxu0 %v4336_v51  ;;  %1556 = vmatprep.mubr.f32.mxu1 %v4181_v46  ;;  %v4355_v46 = vld [vmem:[#allocation2 + $0x42] sm:$0xff]  ;;  %v3322_v21 = vpack.c.bf16 %v1407_v14, %v1406_v12  ;;  %v1444_v14 = vld [vmem:[#allocation7 + $0x3b0] sm:$0xff] }
  0xa3   : > { %1781 = vmatprep.mubr.f32.mxu0 %v656_v63  ;;  %3305 = vmatpush1.bf16.msra.mxu0 %v3304_v52 }
  0xa4   : > { %3306 = vmatprep.subr.bf16.mxu0 %v5302_v0  ;;  %3443 = vmatpush1.bf16.msra.mxu1 %v4341_v61 }
  0xa5   : > { %1557 = vmatmul.mubr.f32.gmra.mrb[6].mxu1 %v655_v38  ;;  %3428 = vmatprep.subr.bf16.mxu1 %v5302_v0  ;;  %v1403_v38 = vld [vmem:[#allocation7 + $0x268] sm:$0xff] }
  0xa6   : > { %1782 = vmatmul.mubr.f32.gmra.mrb[6].mxu0 %v4346_v3  ;;  %1561 = vmatprep.mubr.f32.mxu1 %v4187_v50  ;;  %v4364_v50 = vld [vmem:[#allocation2 + $0x52] sm:$0xff]  ;;  %v3316_v52 = vpack.c.bf16 %v1403_v38, %v1402_v36 }
  0xa7   : > { %1786 = vmatprep.mubr.f32.mxu0 %v657_v5  ;;  %3308 = vmatpush1.bf16.msra.mxu0 %v3307_v4  ;;  %v1437_v4 = vld [vmem:[#allocation7 + $0x378] sm:$0xff]  ;;  %v1440_v36 = vld [vmem:[#allocation7 + $0x390] sm:$0xff] }
  0xa8   : > { %3309 = vmatprep.subr.bf16.mxu0 %v5302_v0  ;;  %3444 = vmatpush1.bf16.msra.mxu1 %v4350_v11  ;;  %v1441_v38 = vld [vmem:[#allocation7 + $0x398] sm:$0xff] }
  0xa9   : > { %1562 = vmatmul.mubr.f32.gmra.mrb[8].mxu1 %v656_v63  ;;  %3429 = vmatprep.subr.bf16.mxu1 %v5302_v0  ;;  %v660_v63 = vld [vmem:[#allocation2 + $0x80] sm:$0xff]  ;;  %v4406_v55 = vpack.c.bf16 %v1441_v38, %v1440_v36 }
  0xaa   : > { %1787 = vmatmul.mubr.f32.gmra.mrb[8].mxu0 %v4355_v46  ;;  %1566 = vmatprep.mubr.f32.mxu1 %v4192_v53  ;;  %v4373_v53 = vld [vmem:[#allocation2 + $0x62] sm:$0xff] }
  0xab   : > { %1791 = vmatprep.mubr.f32.mxu0 %v658_v18  ;;  %3311 = vmatpush1.bf16.msra.mxu0 %v3310_v15  ;;  %v4386_v15 = vpack.c.bf16 %v1437_v4, %v1436_v62  ;;  %v4412_v62 = vld [vmem:[#allocation2 + $0xc2] sm:$0xff] }
  0xac   : > { %3312 = vmatprep.subr.bf16.mxu0 %v5302_v0  ;;  %3445 = vmatpush1.bf16.msra.mxu1 %v4359_v24  ;;  %v1446_v38 = vld [vmem:[#allocation7 + $0x3c0] sm:$0xff] }
  0xad   : > { %1567 = vmatmul.mubr.f32.gmra.mrb[10].mxu1 %v657_v5  ;;  %3430 = vmatprep.subr.bf16.mxu1 %v5302_v0  ;;  %v533_v5 = vld [vmem:[#allocation2 + $0xa1] sm:$0xff] }
  0xae   : > { %1792 = vmatmul.mubr.f32.gmra.mrb[10].mxu0 %v4364_v50  ;;  %1571 = vmatprep.mubr.f32.mxu1 %v4196_v54  ;;  %v4382_v54 = vld [vmem:[#allocation2 + $0x72] sm:$0xff] }
  0xaf   : > { %1796 = vmatprep.mubr.f32.mxu0 %v659_v35  ;;  %3314 = vmatpush1.bf16.msra.mxu0 %v3313_v31  ;;  %v1409_v31 = vld [vmem:[#allocation7 + $0x298] sm:$0xff] }
  0xb0   : > { %3315 = vmatprep.subr.bf16.mxu0 %v5302_v0  ;;  %3446 = vmatpush1.bf16.msra.mxu1 %v4368_v40  ;;  %v3325_v48 = vpack.c.bf16 %v1409_v31, %v1408_v30  ;;  %v1414_v30 = vld [vmem:[#allocation7 + $0x2c0] sm:$0xff]  ;;  %v1415_v31 = vld [vmem:[#allocation7 + $0x2c8] sm:$0xff] }
  0xb1   : > { %1572 = vmatmul.mubr.f32.gmra.mrb[12].mxu1 %v658_v18  ;;  %3431 = vmatprep.subr.bf16.mxu1 %v5302_v0  ;;  %v1438_v18 = vld [vmem:[#allocation7 + $0x380] sm:$0xff] }
  0xb2   : > { %1797 = vmatmul.mubr.f32.gmra.mrb[12].mxu0 %v4373_v53  ;;  %1576 = vmatprep.mubr.f32.mxu1 %v4200_v56  ;;  %v1439_v56 = vld [vmem:[#allocation7 + $0x388] sm:$0xff] }
  0xb3   : > { %1801 = vmatprep.mubr.f32.mxu0 %v660_v63  ;;  %3317 = vmatpush1.bf16.msra.mxu0 %v3316_v52  ;;  %v4402_v52 = vld [vmem:[#allocation2 + $0xd0] sm:$0xff]  ;;  %v1411_v63 = vld [vmem:[#allocation7 + $0x2a8] sm:$0xff] }
  0xb4   : > { %3318 = vmatprep.subr.bf16.mxu0 %v5302_v0  ;;  %3447 = vmatpush1.bf16.msra.mxu1 %v4377_v45 }
  0xb5   : > { %1577 = vmatmul.mubr.f32.gmra.mrb[14].mxu1 %v659_v35  ;;  %3432 = vmatprep.subr.bf16.mxu1 %v5302_v0  ;;  %v4394_v35 = vpack.c.bf16 %v1439_v56, %v1438_v18  ;;  %v1445_v18 = vld [vmem:[#allocation7 + $0x3b8] sm:$0xff] }
  0xb6   : > { %1802 = vmatmul.mubr.f32.gmra.mrb[14].mxu0 %v4382_v54  ;;  %1581 = vmatprep.mubr.f32.mxu1 %v533_v5  ;;  %v4414_v5 = vld [vmem:[#allocation2 + $0xe0] sm:$0xff]  ;;  %v4425_v56 = vld [vmem:[#allocation2 + $0xd2] sm:$0xff]  ;;  %v4431_v36 = vpack.c.bf16 %v1445_v18, %v1444_v14 }
  0xb7   : > { %1806 = vmatprep.mubr.f32.mxu0 %v661_v9  ;;  %3320 = vmatpush1.bf16.msra.mxu0 %v3319_v7  ;;  %v1412_v7 = vld [vmem:[#allocation7 + $0x2b0] sm:$0xff]  ;;  %v1449_v14 = vld [vmem:[#allocation7 + $0x3d8] sm:$0xff] }
  0xb8   : > { %3321 = vmatprep.subr.bf16.mxu0 %v5302_v0  ;;  %3448 = vmatpush1.bf16.msra.mxu1 %v4386_v15  ;;  %5349 = vst [vmem:[#allocation18_spill] sm:$0xff] %v4431_v36  ;;  %v4451_v18 = vld [vmem:[#allocation2 + $0xf2] sm:$0xff] }
  0xb9   : > { %1582 = vmatmul.mubr.f32.gmra.mrb[16].mxu1 %v3875_v1  ;;  %3433 = vmatprep.subr.bf16.mxu1 %v5302_v0  ;;  %v1410_v1 = vld [vmem:[#allocation7 + $0x2a0] sm:$0xff]  ;;  %5352 = vst [vmem:[#allocation21_spill] sm:$0xff] %v4451_v18 }
  0xba   : > { %1807 = vmatmul.mubr.f32.gmra.mrb[16].mxu0 %v597_v20  ;;  %1586 = vmatprep.mubr.f32.mxu1 %v4210_v2  ;;  %v1442_v2 = vld [vmem:[#allocation7 + $0x3a0] sm:$0xff]  ;;  %v3328_v4 = vpack.c.bf16 %v1411_v63, %v1410_v1  ;;  %v3334_v63 = vpack.c.bf16 %v1415_v31, %v1414_v30  ;;  %v4453_v30 = vld [vmem:[#allocation2 + $0x110] sm:$0xff] }
  0xbb   : > { %1811 = vmatprep.mubr.f32.mxu0 %v4390_v25  ;;  %3323 = vmatpush1.bf16.msra.mxu0 %v3322_v21  ;;  %v4418_v12 = vpack.c.bf16 %v1443_v59, %v1442_v2  ;;  %v4427_v21 = vld [vmem:[#allocation2 + $0xf0] sm:$0xff]  ;;  %v4438_v1 = vld [vmem:[#allocation2 + $0xe2] sm:$0xff] }
  0xbc   : > { %3324 = vmatprep.subr.bf16.mxu0 %v5302_v0  ;;  %3449 = vmatpush1.bf16.msra.mxu1 %v4394_v35  ;;  %5350 = vst [vmem:[#allocation19_spill] sm:$0xff] %v4438_v1  ;;  %v4440_v2 = vld [vmem:[#allocation2 + $0x100] sm:$0xff]  ;;  %v1416_v59 = vld [vmem:[#allocation7 + $0x2d0] sm:$0xff] }
  0xbd   : > { %1587 = vmatmul.mubr.f32.gmra.mrb[18].mxu1 %v661_v9  ;;  %3434 = vmatprep.subr.bf16.mxu1 %v5302_v0  ;;  %v1413_v9 = vld [vmem:[#allocation7 + $0x2b8] sm:$0xff]  ;;  %5348 = vst [vmem:[#allocation17_spill] sm:$0xff] %v4418_v12  ;;  %v1418_v31 = vld [vmem:[#allocation7 + $0x2e0] sm:$0xff] }
  0xbe   : > { %1812 = vmatmul.mubr.f32.gmra.mrb[18].mxu0 %v4400_v44  ;;  %1591 = vmatprep.mubr.f32.mxu1 %v4216_v10  ;;  %v3331_v20 = vpack.c.bf16 %v1413_v9, %v1412_v7  ;;  %v1448_v9 = vld [vmem:[#allocation7 + $0x3d0] sm:$0xff] }
  0xbf   : > { %1816 = vmatprep.mubr.f32.mxu0 %v4402_v52  ;;  %3326 = vmatpush1.bf16.msra.mxu0 %v3325_v48  ;;  %v1447_v48 = vld [vmem:[#allocation7 + $0x3c8] sm:$0xff] }
  0xc0   : > { %3327 = vmatprep.subr.bf16.mxu0 %v5302_v0  ;;  %3450 = vmatpush1.bf16.msra.mxu1 %v4406_v55  ;;  %v4444_v7 = vpack.c.bf16 %v1447_v48, %v1446_v38  ;;  %v1419_v38 = vld [vmem:[#allocation7 + $0x2e8] sm:$0xff]  ;;  %v4457_v48 = vpack.c.bf16 %v1449_v14, %v1448_v9  ;;  %v1420_v9 = vld [vmem:[#allocation7 + $0x2f0] sm:$0xff]  ;;  %v1421_v14 = vld [vmem:[#allocation7 + $0x2f8] sm:$0xff] }
  0xc1   : > { %1592 = vmatmul.mubr.f32.gmra.mrb[20].mxu1 %v4390_v25  ;;  %3435 = vmatprep.subr.bf16.mxu1 %v5302_v0 }
  0xc2   : > { %1817 = vmatmul.mubr.f32.gmra.mrb[20].mxu0 %v4412_v62  ;;  %1596 = vmatprep.mubr.f32.mxu1 %v4222_v16  ;;  %5351 = vst [vmem:[#allocation20_spill] sm:$0xff] %v4444_v7  ;;  %5353 = vst [vmem:[#allocation22_spill] sm:$0xff] %v4457_v48 }
  0xc3   : > { %1821 = vmatprep.mubr.f32.mxu0 %v4414_v5  ;;  %3329 = vmatpush1.bf16.msra.mxu0 %v3328_v4  ;;  %v1417_v4 = vld [vmem:[#allocation7 + $0x2d8] sm:$0xff] }
  0xc4   : > { %3330 = vmatprep.subr.bf16.mxu0 %v5302_v0  ;;  %3451 = vmatpush1.bf16.msra.mxu1 %v4418_v12 }
  0xc5   : > { %1597 = vmatmul.mubr.f32.gmra.mrb[22].mxu1 %v4402_v52  ;;  %3436 = vmatprep.subr.bf16.mxu1 %v5302_v0 }
  0xc6   : > { %1822 = vmatmul.mubr.f32.gmra.mrb[22].mxu0 %v4425_v56  ;;  %1601 = vmatprep.mubr.f32.mxu1 %v4226_v17 }
  0xc7   : > { %1826 = vmatprep.mubr.f32.mxu0 %v4427_v21  ;;  %3332 = vmatpush1.bf16.msra.mxu0 %v3331_v20  ;;  %v3337_v20 = vpack.c.bf16 %v1417_v4, %v1416_v59  ;;  %v3340_v59 = vpack.c.bf16 %v1419_v38, %v1418_v31  ;;  %v4466_v4 = vld [vmem:[#allocation2 + $0x120] sm:$0xff]  ;;  %v1455_v31 = vld [vmem:[#allocation7 + $0x408] sm:$0xff]  ;;  %v4477_v38 = vld [vmem:[#allocation2 + $0x112] sm:$0xff] }
  0xc8   : > { %3333 = vmatprep.subr.bf16.mxu0 %v5302_v0  ;;  %3452 = vmatpush1.bf16.msra.mxu1 %v4431_v36  ;;  %v1452_v36 = vld [vmem:[#allocation7 + $0x3f0] sm:$0xff] }
  0xc9   : > { %1602 = vmatmul.mubr.f32.gmra.mrb[24].mxu1 %v4414_v5  ;;  %3437 = vmatprep.subr.bf16.mxu1 %v5302_v0 }
  0xca   : > { %1827 = vmatmul.mubr.f32.gmra.mrb[24].mxu0 %v4438_v1  ;;  %1606 = vmatprep.mubr.f32.mxu1 %v4230_v19  ;;  %v605_v1 = vld [vmem:[#allocation2 + $0x142] sm:$0xff] }
  0xcb   : > { %1831 = vmatprep.mubr.f32.mxu0 %v4440_v2  ;;  %3335 = vmatpush1.bf16.msra.mxu0 %v3334_v63  ;;  %v4464_v63 = vld [vmem:[#allocation2 + $0x102] sm:$0xff] }
  0xcc   : > { %3336 = vmatprep.subr.bf16.mxu0 %v5302_v0  ;;  %3453 = vmatpush1.bf16.msra.mxu1 %v4444_v7  ;;  %5354 = vst [vmem:[#allocation23_spill] sm:$0xff] %v4464_v63  ;;  %v4470_v7 = vpack.c.bf16 %v1451_v6, %v1450_v49  ;;  %v3343_v6 = vpack.c.bf16 %v1421_v14, %v1420_v9  ;;  %v669_v49 = vld [vmem:[#allocation2 + $0x150] sm:$0xff]  ;;  %v4505_v9 = vld [vmem:[#allocation2 + $0x162] sm:$0xff] }
  0xcd   : > { %1607 = vmatmul.mubr.f32.gmra.mrb[26].mxu1 %v4427_v21  ;;  %3438 = vmatprep.subr.bf16.mxu1 %v5302_v0  ;;  %5358 = vst [vmem:[#allocation27_spill] sm:$0xff] %v4505_v9  ;;  %v4507_v14 = vld [vmem:[#allocation2 + $0x180] sm:$0xff] }
  0xce   : > { %1832 = vmatmul.mubr.f32.gmra.mrb[26].mxu0 %v4451_v18  ;;  %1611 = vmatprep.mubr.f32.mxu1 %v4235_v23  ;;  %5355 = vst [vmem:[#allocation24_spill] sm:$0xff] %v4470_v7  ;;  %v1453_v18 = vld [vmem:[#allocation7 + $0x3f8] sm:$0xff] }
  0xcf   : > { %1836 = vmatprep.mubr.f32.mxu0 %v4453_v30  ;;  %3338 = vmatpush1.bf16.msra.mxu0 %v3337_v20  ;;  %v1454_v20 = vld [vmem:[#allocation7 + $0x400] sm:$0xff]  ;;  %v4481_v12 = vpack.c.bf16 %v1453_v18, %v1452_v36  ;;  %v4498_v18 = vld [vmem:[#allocation2 + $0x152] sm:$0xff] }
  0xd0   : > { %3339 = vmatprep.subr.bf16.mxu0 %v5302_v0  ;;  %3454 = vmatpush1.bf16.msra.mxu1 %v4457_v48  ;;  %v541_v48 = vld [vmem:[#allocation2 + $0x141] sm:$0xff]  ;;  %5357 = vst [vmem:[#allocation26_spill] sm:$0xff] %v4498_v18 }
  0xd1   : > { %1612 = vmatmul.mubr.f32.gmra.mrb[28].mxu1 %v4440_v2  ;;  %3439 = vmatprep.subr.bf16.mxu1 %v5302_v0  ;;  %5356 = vst [vmem:[#allocation25_spill] sm:$0xff] %v4481_v12  ;;  %v4492_v36 = vld [vmem:[#allocation2] sm:$0xff] }
  0xd2   : > { %1837 = vmatmul.mubr.f32.gmra.mrb[28].mxu0 %v4464_v63  ;;  %1616 = vmatprep.mubr.f32.mxu1 %v4240_v26  ;;  %v4485_v63 = vpack.c.bf16 %v1455_v31, %v1454_v20  ;;  %v4521_v20 = vld [vmem:[#allocation2 + $0x182] sm:$0xff] }
  0xd3   : > { %1841 = vmatprep.mubr.f32.mxu0 %v4466_v4  ;;  %3341 = vmatpush1.bf16.msra.mxu0 %v3340_v59  ;;  %v4488_v59 = vld [vmem:[#allocation2 + $0x160] sm:$0xff]  ;;  %5360 = vst [vmem:[#allocation29_spill] sm:$0xff] %v4521_v20 }
  0xd4   : > { %3342 = vmatprep.subr.bf16.mxu0 %v5302_v0  ;;  %3455 = vmatpush1.bf16.msra.mxu1 %v4470_v7  ;;  %v4523_v31 = vld [vmem:[#allocation2 + $0x1a0] sm:$0xff]  ;;  %v4556_v7 = vld [vmem:[#allocation2 + $0x210] sm:$0xff] }
  0xd5   : > { %1617 = vmatmul.mubr.f32.gmra.mrb[30].mxu1 %v4453_v30  ;;  %3440 = vmatprep.subr.bf16.mxu1 %v5302_v0  ;;  %5365 = vst [vmem:[#allocation34_spill] sm:$0xff] %v4556_v7 }
  0xd6   : > { %1842 = vmatmul.mubr.f32.gmra.mrb[30].mxu0 %v4477_v38  ;;  %1621 = vmatprep.mubr.f32.mxu1 %v541_v48  ;;  %v4500_v48 = vld [vmem:[#allocation2 + $0x170] sm:$0xff] }
  0xd7   : > { %1846 = vmatprep.mubr.f32.mxu0 %v669_v49  ;;  %3344 = vmatpush1.bf16.msra.mxu0 %v3343_v6  ;;  %v4529_v6 = vld [vmem:[#allocation2 + $0x192] sm:$0xff] }
  0xd8   : > { %3456 = vmatpush1.bf16.msra.mxu1 %v4481_v12  ;;  %3345 = vmatprep.subr.bf16.mxu0 %v5302_v0  ;;  %5361 = vst [vmem:[#allocation30_spill] sm:$0xff] %v4529_v6  ;;  %v4537_v0 = vld [vmem:[#allocation2 + $0x1a2] sm:$0xff] }
  0xd9   : > { %1622 = vmatmul.mubr.f32.gmra.mrb[32].mxu1 %v4492_v36  ;;  %3394 = vmatprep.subr.bf16.mxu1 %v4485_v63  ;;  %5362 = vst [vmem:[#allocation31_spill] sm:$0xff] %v4537_v0  ;;  %v613_v12 = vld [vmem:[#allocation2 + $0x1e2] sm:$0xff] }
  0xda   : > { %1847 = vmatmul.mubr.f32.gmra.mrb[32].mxu0 %v605_v1  ;;  %1626 = vmatprep.mubr.f32.mxu1 %v4249_v32  ;;  %v4513_v32 = vld [vmem:[#allocation2 + $0x172] sm:$0xff] }
  0xdb   : > { %1851 = vmatprep.mubr.f32.mxu0 %v4488_v59  ;;  %5359 = vst [vmem:[#allocation28_spill] sm:$0xff] %v4513_v32  ;;  %v4515_v1 = vld [vmem:[#allocation2 + $0x190] sm:$0xff] }
  0xdd   : > { %1627 = vmatmul.mubr.f32.gmra.mrb[34].mxu1 %v669_v49  ;;  %v4531_v49 = vld [vmem:[#allocation2 + $0x1b0] sm:$0xff] }
  0xde   : > { %1852 = vmatmul.mubr.f32.gmra.mrb[34].mxu0 %v4498_v18  ;;  %1631 = vmatprep.mubr.f32.mxu1 %v4255_v39  ;;  %v4549_v18 = vld [vmem:[#allocation2 + $0x200] sm:$0xff] }
  0xdf   : > { %1856 = vmatprep.mubr.f32.mxu0 %v4500_v48 }
  0xe1   : > { %1632 = vmatmul.mubr.f32.gmra.mrb[36].mxu1 %v4488_v59 }
  0xe2   : > { %1857 = vmatmul.mubr.f32.gmra.mrb[36].mxu0 %v4505_v9  ;;  %1636 = vmatprep.mubr.f32.mxu1 %v4260_v42  ;;  %v549_v9 = vld [vmem:[#allocation2 + $0x1e1] sm:$0xff] }
  0xe3   : > { %1861 = vmatprep.mubr.f32.mxu0 %v4507_v14 }
  0xe5   : > { %1637 = vmatmul.mubr.f32.gmra.mrb[38].mxu1 %v4500_v48 }
  0xe6   : > { %1862 = vmatmul.mubr.f32.gmra.mrb[38].mxu0 %v4513_v32  ;;  %1641 = vmatprep.mubr.f32.mxu1 %v4264_v47  ;;  %v4539_v32 = vld [vmem:[#allocation2 + $0x1c0] sm:$0xff] }
  0xe7   : > { %1866 = vmatprep.mubr.f32.mxu0 %v4515_v1 }
  0xe9   : > { %1642 = vmatmul.mubr.f32.gmra.mrb[40].mxu1 %v4507_v14 }
  0xea   : > { %1867 = vmatmul.mubr.f32.gmra.mrb[40].mxu0 %v4521_v20  ;;  %1646 = vmatprep.mubr.f32.mxu1 %v4270_v57  ;;  %v4545_v20 = vld [vmem:[#allocation2 + $0x1b2] sm:$0xff] }
  0xeb   : > { %1871 = vmatprep.mubr.f32.mxu0 %v4523_v31  ;;  %5363 = vst [vmem:[#allocation32_spill] sm:$0xff] %v4545_v20 }
  0xed   : > { %1647 = vmatmul.mubr.f32.gmra.mrb[42].mxu1 %v4515_v1 }
  0xee   : > { %1872 = vmatmul.mubr.f32.gmra.mrb[42].mxu0 %v4529_v6  ;;  %1651 = vmatprep.mubr.f32.mxu1 %v4274_v58  ;;  %v677_v6 = vld [vmem:[#allocation2 + $0x1f0] sm:$0xff] }
  0xef   : > { %1876 = vmatprep.mubr.f32.mxu0 %v4531_v49 }
  0xf1   : > { %1652 = vmatmul.mubr.f32.gmra.mrb[44].mxu1 %v4523_v31 }
  0xf2   : > { %1877 = vmatmul.mubr.f32.gmra.mrb[44].mxu0 %v4537_v0  ;;  %1656 = vmatprep.mubr.f32.mxu1 %v4278_v60  ;;  %v4554_v0 = vld [vmem:[#allocation2 + $0x1f2] sm:$0xff] }
  0xf3   : > { %1881 = vmatprep.mubr.f32.mxu0 %v4539_v32  ;;  %5364 = vst [vmem:[#allocation33_spill] sm:$0xff] %v4554_v0 }
  0xf5   : > { %1657 = vmatmul.mubr.f32.gmra.mrb[46].mxu1 %v4531_v49 }
  0xf6   : > { %1882 = vmatmul.mubr.f32.gmra.mrb[46].mxu0 %v4545_v20  ;;  %1661 = vmatprep.mubr.f32.mxu1 %v549_v9  ;;  %v4561_v9 = vld [vmem:[#allocation2 + $0x202] sm:$0xff] }
  0xf7   : > { %1886 = vmatprep.mubr.f32.mxu0 %v677_v6  ;;  %5366 = vst [vmem:[#allocation35_spill] sm:$0xff] %v4561_v9  ;;  %v4563_v20 = vld [vmem:[#allocation2 + $0x220] sm:$0xff] }
  0xf8   : > { %5367 = vst [vmem:[#allocation36_spill] sm:$0xff] %v4563_v20 }
  0xf9   : > { %1662 = vmatmul.mubr.f32.gmra.mrb[48].mxu1 %v4492_v36 }
  0xfa   : > { %1887 = vmatmul.mubr.f32.gmra.mrb[48].mxu0 %v613_v12  ;;  %1666 = vmatprep.mubr.f32.mxu1 %v4288_v8  ;;  %v4569_v8 = vld [vmem:[#allocation2 + $0x212] sm:$0xff] }
  0xfb   : > { %1891 = vmatprep.mubr.f32.mxu0 %v4549_v18  ;;  %5368 = vst [vmem:[#allocation37_spill] sm:$0xff] %v4569_v8  ;;  %v4571_v12 = vld [vmem:[#allocation2 + $0x230] sm:$0xff] }
  0xfd   : > { %1667 = vmatmul.mubr.f32.gmra.mrb[50].mxu1 %v677_v6  ;;  %v4577_v6 = vld [vmem:[#allocation2 + $0x222] sm:$0xff] }
  0xfe   : > { %1892 = vmatmul.mubr.f32.gmra.mrb[50].mxu0 %v4554_v0  ;;  %1671 = vmatprep.mubr.f32.mxu1 %v4294_v13  ;;  %5369 = vst [vmem:[#allocation38_spill] sm:$0xff] %v4577_v6  ;;  %v4579_v0 = vld [vmem:[#allocation2 + $0x240] sm:$0xff] }
  0xff   : > { %1896 = vmatprep.mubr.f32.mxu0 %v4556_v7  ;;  %5370 = vst [vmem:[#allocation39_spill] sm:$0xff] %v4579_v0 }
 0x101   : > { %1672 = vmatmul.mubr.f32.gmra.mrb[52].mxu1 %v4549_v18 }
 0x102   : > { %1897 = vmatmul.mubr.f32.gmra.mrb[52].mxu0 %v4561_v9  ;;  %1676 = vmatprep.mubr.f32.mxu1 %v4299_v22  ;;  %v4585_v9 = vld [vmem:[#allocation2 + $0x232] sm:$0xff] }
 0x103   : > { %1901 = vmatprep.mubr.f32.mxu0 %v4563_v20  ;;  %5371 = vst [vmem:[#allocation40_spill] sm:$0xff] %v4585_v9 }
 0x105   : > { %1677 = vmatmul.mubr.f32.gmra.mrb[54].mxu1 %v4556_v7  ;;  %v4587_v7 = vld [vmem:[#allocation2 + $0x250] sm:$0xff] }
 0x106   : > { %1902 = vmatmul.mubr.f32.gmra.mrb[54].mxu0 %v4569_v8  ;;  %1681 = vmatprep.mubr.f32.mxu1 %v4306_v29  ;;  %v4593_v8 = vld [vmem:[#allocation2 + $0x242] sm:$0xff] }
 0x107   : > { %1906 = vmatprep.mubr.f32.mxu0 %v4571_v12  ;;  %5372 = vst [vmem:[#allocation41_spill] sm:$0xff] %v4593_v8 }
 0x109   : > { %1682 = vmatmul.mubr.f32.gmra.mrb[56].mxu1 %v4563_v20  ;;  %v4595_v20 = vld [vmem:[#allocation2 + $0x260] sm:$0xff] }
 0x10a   : > { %1907 = vmatmul.mubr.f32.gmra.mrb[56].mxu0 %v4577_v6  ;;  %1686 = vmatprep.mubr.f32.mxu1 %v4311_v33  ;;  %5373 = vst [vmem:[#allocation42_spill] sm:$0xff] %v4595_v20  ;;  %v4601_v6 = vld [vmem:[#allocation2 + $0x252] sm:$0xff] }
 0x10b   : > { %1911 = vmatprep.mubr.f32.mxu0 %v4579_v0  ;;  %5374 = vst [vmem:[#allocation43_spill] sm:$0xff] %v4601_v6 }
 0x10d   : > { %1687 = vmatmul.mubr.f32.gmra.mrb[58].mxu1 %v4571_v12 }
 0x10e   : > { %1912 = vmatmul.mubr.f32.gmra.mrb[58].mxu0 %v4585_v9  ;;  %1691 = vmatprep.mubr.f32.mxu1 %v4318_v37  ;;  %v1456_v9 = vld [vmem:[#allocation7 + $0x410] sm:$0xff]  ;;  %v1457_v37 = vld [vmem:[#allocation7 + $0x418] sm:$0xff] }
 0x10f   : > { %1916 = vmatprep.mubr.f32.mxu0 %v4587_v7 }
 0x111   : > { %1692 = vmatmul.mubr.f32.gmra.mrb[60].mxu1 %v4579_v0  ;;  %v3397_v0 = vpack.c.bf16 %v1457_v37, %v1456_v9  ;;  %v1460_v37 = vld [vmem:[#allocation7 + $0x430] sm:$0xff]  ;;  %v5393_v9 = vld [vmem:[#allocation30_spill] sm:$0xff] }
 0x112   : > { %1917 = vmatmul.mubr.f32.gmra.mrb[60].mxu0 %v4593_v8  ;;  %1696 = vmatprep.mubr.f32.mxu1 %v4326_v43  ;;  %v3708_v8 = vld [vmem:[#allocation2 + $0x11] sm:$0xff]  ;;  %v1459_v43 = vld [vmem:[#allocation7 + $0x428] sm:$0xff] }
 0x113   : > { %1921 = vmatprep.mubr.f32.mxu0 %v4595_v20  ;;  %v1458_v20 = vld [vmem:[#allocation7 + $0x420] sm:$0xff] }
 0x115   : > { %1697 = vmatmul.mubr.f32.gmra.mrb[62].mxu1 %v4587_v7 }
 0x116   : > { %1922 = vmatmul.mubr.f32.gmra.mrb[62].mxu0 %v4601_v6  ;;  %2256 = vmatprep.mubr.f32.mxu1 %v4216_v10  ;;  %v5375_v6 = vmov 0.0|0.0   ;;  %v3401_v10 = vpack.c.bf16 %v1459_v43, %v1458_v20  ;;  %v1462_v43 = vld [vmem:[#allocation7 + $0x440] sm:$0xff]  ;;  %v5389_v20 = vld [vmem:[#allocation28_spill] sm:$0xff] }
 0x117   : > { %1991 = vmatprep.mubr.f32.mxu0 %v4315_v34  ;;  %v3709_v34 = vld [vmem:[#allocation2 + $0x21] sm:$0xff] }
 0x119   : > { %2257 = vmatmul.mubr.f32.vlgmr.msra.gmra.mrb[64].mxu1 %v4390_v25  ;;  %v1463_v25 = vld [vmem:[#allocation7 + $0x448] sm:$0xff] }
 0x11a   : > { %1992 = vmatmul.mubr.f32.vlgmr.msra.gmra.mrb[0].mxu0 %v3708_v8  ;;  %2261 = vmatprep.mubr.f32.mxu1 %v4222_v16  ;;  %v1461_v16 = vld [vmem:[#allocation7 + $0x438] sm:$0xff]  ;;  %v5394_v8 = vld [vmem:[#allocation39_spill] sm:$0xff] }
 0x11b   : > { %3347 = vmatpush1.bf16.msra.mxu0 %v4302_v28  ;;  %1996 = vmatprep.mubr.f32.mxu0 %v4336_v51  ;;  %v3405_v28 = vpack.c.bf16 %v1461_v16, %v1460_v37  ;;  %v3710_v51 = vld [vmem:[#allocation2 + $0x31] sm:$0xff] }
 0x11c   : > { %3348 = vmatprep.subr.bf16.mxu0 %v5375_v6  ;;  %3396 = vmatpush3.bf16.msra.mxu1 %v4485_v63  ;;  %v5384_v63 = vld [vmem:[#allocation24_spill] sm:$0xff] }
 0x11d   : > { %2262 = vmatmul.mubr.f32.gmra.mrb[66].mxu1 %v4402_v52  ;;  %3398 = vmatprep.subr.bf16.mxu1 %v3397_v0  ;;  %v1467_v52 = vld [vmem:[#allocation7 + $0x468] sm:$0xff]  ;;  %v5397_v37 = vld [vmem:[#allocation16_spill] sm:$0xff] }
 0x11e   : > { %1997 = vmatmul.mubr.f32.gmra.mrb[2].mxu0 %v3709_v34  ;;  %2266 = vmatprep.mubr.f32.mxu1 %v4226_v17  ;;  %v3711_v17 = vld [vmem:[#allocation2 + $0x41] sm:$0xff]  ;;  %v5398_v16 = vld [vmem:[#allocation32_spill] sm:$0xff] }
 0x11f   : > { %2001 = vmatprep.mubr.f32.mxu0 %v4346_v3  ;;  %3350 = vmatpush1.bf16.msra.mxu0 %v4322_v41  ;;  %v1464_v41 = vld [vmem:[#allocation7 + $0x450] sm:$0xff]  ;;  %v1465_v3 = vld [vmem:[#allocation7 + $0x458] sm:$0xff] }
 0x120   : > { %3351 = vmatprep.subr.bf16.mxu0 %v5375_v6  ;;  %3400 = vmatpush3.bf16.msra.mxu1 %v3397_v0  ;;  %v3409_v0 = vpack.c.bf16 %v1463_v25, %v1462_v43  ;;  %v5399_v25 = vld [vmem:[#allocation42_spill] sm:$0xff] }
 0x121   : > { %2267 = vmatmul.mubr.f32.gmra.mrb[68].mxu1 %v4414_v5  ;;  %3402 = vmatprep.subr.bf16.mxu1 %v3401_v10  ;;  %v1469_v5 = vld [vmem:[#allocation7 + $0x478] sm:$0xff] }
 0x122   : > { %2002 = vmatmul.mubr.f32.gmra.mrb[4].mxu0 %v3710_v51  ;;  %2271 = vmatprep.mubr.f32.mxu1 %v4230_v19  ;;  %v3413_v19 = vpack.c.bf16 %v1465_v3, %v1464_v41  ;;  %v4709_v51 = vld [vmem:[#allocation2 + $0x1c2] sm:$0xff] }
 0x123   : > { %2006 = vmatprep.mubr.f32.mxu0 %v4355_v46  ;;  %3353 = vmatpush1.bf16.msra.mxu0 %v4341_v61  ;;  %v3712_v61 = vld [vmem:[#allocation2 + $0x51] sm:$0xff]  ;;  %v1466_v46 = vld [vmem:[#allocation7 + $0x460] sm:$0xff] }
 0x124   : > { %3354 = vmatprep.subr.bf16.mxu0 %v5375_v6  ;;  %3404 = vmatpush3.bf16.msra.mxu1 %v3401_v10  ;;  %v5396_v10 = vld [vmem:[#allocation31_spill] sm:$0xff] }
 0x125   : > { %2272 = vmatmul.mubr.f32.gmra.mrb[70].mxu1 %v4427_v21  ;;  %3406 = vmatprep.subr.bf16.mxu1 %v3405_v28  ;;  %v3714_v21 = vld [vmem:[#allocation2 + $0x71] sm:$0xff] }
 0x126   : > { %2007 = vmatmul.mubr.f32.gmra.mrb[6].mxu0 %v3711_v17  ;;  %2276 = vmatprep.mubr.f32.mxu1 %v4235_v23  ;;  %v3417_v23 = vpack.c.bf16 %v1467_v52, %v1466_v46  ;;  %v3730_v17 = vld [vmem:[#allocation2 + $0x1b1] sm:$0xff]  ;;  %v5400_v46 = vld [vmem:[#allocation33_spill] sm:$0xff] }
 0x127   : > { %2011 = vmatprep.mubr.f32.mxu0 %v4364_v50  ;;  %3356 = vmatpush1.bf16.msra.mxu0 %v4350_v11  ;;  %v3713_v11 = vld [vmem:[#allocation2 + $0x61] sm:$0xff]  ;;  %v1468_v50 = vld [vmem:[#allocation7 + $0x470] sm:$0xff] }
 0x128   : > { %3357 = vmatprep.subr.bf16.mxu0 %v5375_v6  ;;  %3408 = vmatpush3.bf16.msra.mxu1 %v3405_v28  ;;  %v941_v28 = vld [vmem:[#allocation2 + $0x271] sm:$0xff]  ;;  %v976_v52 = vld [vmem:[#allocation2 + $0x42] sm:$0xff] }
 0x129   : > { %2277 = vmatmul.mubr.f32.gmra.mrb[72].mxu1 %v4440_v2  ;;  %3410 = vmatprep.subr.bf16.mxu1 %v3409_v0  ;;  %v5383_v2 = vld [vmem:[#allocation22_spill] sm:$0xff] }
 0x12a   : > { %2012 = vmatmul.mubr.f32.gmra.mrb[8].mxu0 %v3712_v61  ;;  %2281 = vmatprep.mubr.f32.mxu1 %v4240_v26  ;;  %v925_v26 = vld [vmem:[#allocation2 + $0x131] sm:$0xff] }
 0x12b   : > { %2016 = vmatprep.mubr.f32.mxu0 %v4373_v53  ;;  %3359 = vmatpush1.bf16.msra.mxu0 %v4359_v24  ;;  %v4637_v53 = vld [vmem:[#allocation2 + $0x82] sm:$0xff]  ;;  %v3421_v24 = vpack.c.bf16 %v1469_v5, %v1468_v50  ;;  %v975_v61 = vld [vmem:[#allocation2 + $0x32] sm:$0xff] }
 0x12c   : > { %3360 = vmatprep.subr.bf16.mxu0 %v5375_v6  ;;  %3412 = vmatpush3.bf16.msra.mxu1 %v3409_v0  ;;  %v3732_v50 = vld [vmem:[#allocation2 + $0x1f1] sm:$0xff] }
 0x12d   : > { %2282 = vmatmul.mubr.f32.gmra.mrb[74].mxu1 %v4453_v30  ;;  %3414 = vmatprep.subr.bf16.mxu1 %v3413_v19  ;;  %v4678_v30 = vld [vmem:[#allocation2 + $0x122] sm:$0xff]  ;;  %v977_v5 = vld [vmem:[#allocation2 + $0x52] sm:$0xff] }
 0x12e   : > { %2017 = vmatmul.mubr.f32.gmra.mrb[10].mxu0 %v3713_v11  ;;  %2286 = vmatprep.mubr.f32.mxu1 %v4244_v27  ;;  %v3715_v27 = vld [vmem:[#allocation2 + $0x81] sm:$0xff] }
 0x12f   : > { %2021 = vmatprep.mubr.f32.mxu0 %v4382_v54  ;;  %3362 = vmatpush1.bf16.msra.mxu0 %v4368_v40  ;;  %v3716_v40 = vld [vmem:[#allocation2 + $0xb1] sm:$0xff]  ;;  %v5377_v54 = vld [vmem:[#allocation17_spill] sm:$0xff] }
 0x130   : > { %3363 = vmatprep.subr.bf16.mxu0 %v5375_v6  ;;  %3416 = vmatpush3.bf16.msra.mxu1 %v3413_v19  ;;  %v3731_v19 = vld [vmem:[#allocation2 + $0x1c1] sm:$0xff] }
 0x131   : > { %2287 = vmatmul.mubr.f32.gmra.mrb[76].mxu1 %v4466_v4  ;;  %3418 = vmatprep.subr.bf16.mxu1 %v3417_v23  ;;  %v3723_v4 = vld [vmem:[#allocation2 + $0x121] sm:$0xff] }
 0x132   : > { %2022 = vmatmul.mubr.f32.gmra.mrb[12].mxu0 %v3714_v21  ;;  %2291 = vmatprep.mubr.f32.mxu1 %v925_v26  ;;  %v5401_v26 = vld [vmem:[#allocation35_spill] sm:$0xff] }
 0x133   : > { %2026 = vmatprep.mubr.f32.mxu0 %v4637_v53  ;;  %3365 = vmatpush1.bf16.msra.mxu0 %v4377_v45  ;;  %v5376_v45 = vld [vmem:[#allocation19_spill] sm:$0xff] }
 0x134   : > { %3366 = vmatprep.subr.bf16.mxu0 %v5375_v6  ;;  %3420 = vmatpush3.bf16.msra.mxu1 %v3417_v23 }
 0x135   : > { %2292 = vmatmul.mubr.f32.gmra.mrb[78].mxu1 %v4492_v36  ;;  %3422 = vmatprep.subr.bf16.mxu1 %v3421_v24 }
 0x136   : > { %2027 = vmatmul.mubr.f32.gmra.mrb[14].mxu0 %v3715_v27  ;;  %2296 = vmatprep.mubr.f32.mxu1 %v4255_v39  ;;  %v3717_v39 = vld [vmem:[#allocation2 + $0xc1] sm:$0xff] }
 0x137   : > { %2031 = vmatprep.mubr.f32.mxu0 %v4400_v44  ;;  %3368 = vmatpush1.bf16.msra.mxu0 %v4386_v15  ;;  %v5378_v15 = vld [vmem:[#allocation21_spill] sm:$0xff]  ;;  %v5380_v44 = vld [vmem:[#allocation23_spill] sm:$0xff] }
 0x138   : > { %3369 = vmatprep.subr.bf16.mxu0 %v5375_v6  ;;  %3424 = vmatpush3.bf16.msra.mxu1 %v3421_v24  ;;  %v978_v24 = vld [vmem:[#allocation2 + $0x62] sm:$0xff] }
 0x139   : > { %2297 = vmatmul.mubr.f32.gmra.mrb[80].mxu1 %v4488_v59  ;;  %v5386_v59 = vld [vmem:[#allocation25_spill] sm:$0xff] }
 0x13a   : > { %2032 = vmatmul.mubr.f32.gmra.mrb[16].mxu0 %v3716_v40  ;;  %2301 = vmatprep.mubr.f32.mxu1 %v4260_v42  ;;  %v3718_v42 = vld [vmem:[#allocation2 + $0xd1] sm:$0xff]  ;;  %v3733_v40 = vld [vmem:[#allocation2 + $0x201] sm:$0xff] }
 0x13b   : > { %2036 = vmatprep.mubr.f32.mxu0 %v4412_v62  ;;  %3371 = vmatpush1.bf16.msra.mxu0 %v4394_v35  ;;  %v5379_v35 = vld [vmem:[#allocation18_spill] sm:$0xff]  ;;  %v5382_v62 = vld [vmem:[#allocation13_spill] sm:$0xff] }
 0x13c   : > { %3372 = vmatprep.subr.bf16.mxu0 %v5375_v6 }
 0x13d   : > { %2302 = vmatmul.mubr.f32.gmra.mrb[82].mxu1 %v4500_v48  ;;  %v3724_v48 = vld [vmem:[#allocation2 + $0x151] sm:$0xff] }
 0x13e   : > { %2037 = vmatmul.mubr.f32.gmra.mrb[18].mxu0 %v3717_v39  ;;  %2306 = vmatprep.mubr.f32.mxu1 %v4264_v47  ;;  %v3719_v47 = vld [vmem:[#allocation2 + $0xe1] sm:$0xff]  ;;  %v979_v39 = vld [vmem:[#allocation2 + $0x72] sm:$0xff] }
 0x13f   : > { %2041 = vmatprep.mubr.f32.mxu0 %v4425_v56  ;;  %3374 = vmatpush1.bf16.msra.mxu0 %v4406_v55  ;;  %v5381_v55 = vld [vmem:[#allocation20_spill] sm:$0xff] }
 0x140   : > { %3375 = vmatprep.subr.bf16.mxu0 %v5375_v6  ;;  %v933_v56 = vld [vmem:[#allocation2 + $0x1d1] sm:$0xff] }
 0x141   : > { %2307 = vmatmul.mubr.f32.gmra.mrb[84].mxu1 %v4507_v14  ;;  %v5387_v14 = vld [vmem:[#allocation27_spill] sm:$0xff] }
 0x142   : > { %2042 = vmatmul.mubr.f32.gmra.mrb[20].mxu0 %v3718_v42  ;;  %2311 = vmatprep.mubr.f32.mxu1 %v4270_v57  ;;  %v3720_v57 = vld [vmem:[#allocation2 + $0xf1] sm:$0xff]  ;;  %v5402_v42 = vld [vmem:[#allocation37_spill] sm:$0xff] }
 0x143   : > { %2046 = vmatprep.mubr.f32.mxu0 %v5376_v45  ;;  %3377 = vmatpush1.bf16.msra.mxu0 %v5377_v54 }
 0x144   : > { %3378 = vmatprep.subr.bf16.mxu0 %v5375_v6 }
 0x145   : > { %2312 = vmatmul.mubr.f32.gmra.mrb[86].mxu1 %v4515_v1  ;;  %v3725_v1 = vld [vmem:[#allocation2 + $0x161] sm:$0xff] }
 0x146   : > { %2047 = vmatmul.mubr.f32.gmra.mrb[22].mxu0 %v3719_v47  ;;  %2316 = vmatprep.mubr.f32.mxu1 %v4274_v58  ;;  %v3721_v58 = vld [vmem:[#allocation2 + $0x101] sm:$0xff]  ;;  %v3734_v47 = vld [vmem:[#allocation2 + $0x211] sm:$0xff] }
 0x147   : > { %2051 = vmatprep.mubr.f32.mxu0 %v5378_v15  ;;  %3380 = vmatpush1.bf16.msra.mxu0 %v5379_v35  ;;  %v981_v15 = vld [vmem:[#allocation2 + $0x92] sm:$0xff]  ;;  %v5403_v35 = vld [vmem:[#allocation38_spill] sm:$0xff] }
 0x148   : > { %3381 = vmatprep.subr.bf16.mxu0 %v5375_v6 }
 0x149   : > { %2317 = vmatmul.mubr.f32.gmra.mrb[88].mxu1 %v4523_v31  ;;  %v3726_v31 = vld [vmem:[#allocation2 + $0x171] sm:$0xff] }
 0x14a   : > { %2052 = vmatmul.mubr.f32.gmra.mrb[24].mxu0 %v3720_v57  ;;  %2321 = vmatprep.mubr.f32.mxu1 %v4278_v60  ;;  %v3722_v60 = vld [vmem:[#allocation2 + $0x111] sm:$0xff]  ;;  %v982_v57 = vld [vmem:[#allocation2 + $0xc2] sm:$0xff] }
 0x14b   : > { %2056 = vmatprep.mubr.f32.mxu0 %v5380_v44  ;;  %3383 = vmatpush1.bf16.msra.mxu0 %v5381_v55 }
 0x14c   : > { %3384 = vmatprep.subr.bf16.mxu0 %v5375_v6 }
 0x14d   : > { %2322 = vmatmul.mubr.f32.gmra.mrb[90].mxu1 %v4531_v49  ;;  %v5392_v49 = vld [vmem:[#allocation14_spill] sm:$0xff] }
 0x14e   : > { %2057 = vmatmul.mubr.f32.gmra.mrb[26].mxu0 %v3721_v58  ;;  %2326 = vmatprep.mubr.f32.mxu1 %v5382_v62  ;;  %v3735_v58 = vld [vmem:[#allocation2 + $0x221] sm:$0xff]  ;;  %v983_v62 = vld [vmem:[#allocation2 + $0xd2] sm:$0xff] }
 0x14f   : > { %2061 = vmatprep.mubr.f32.mxu0 %v4477_v38  ;;  %3386 = vmatpush1.bf16.msra.mxu0 %v5383_v2  ;;  %v5385_v38 = vld [vmem:[#allocation26_spill] sm:$0xff] }
 0x150   : > { %3387 = vmatprep.subr.bf16.mxu0 %v5375_v6  ;;  %v984_v2 = vld [vmem:[#allocation2 + $0xe2] sm:$0xff] }
 0x151   : > { %2327 = vmatmul.mubr.f32.gmra.mrb[92].mxu1 %v4539_v32  ;;  %v5388_v32 = vld [vmem:[#allocation34_spill] sm:$0xff] }
 0x152   : > { %2062 = vmatmul.mubr.f32.gmra.mrb[28].mxu0 %v3722_v60  ;;  %2331 = vmatprep.mubr.f32.mxu1 %v933_v56  ;;  %v5404_v56 = vld [vmem:[#allocation40_spill] sm:$0xff] }
 0x153   : > { %2066 = vmatprep.mubr.f32.mxu0 %v4678_v30  ;;  %3389 = vmatpush1.bf16.msra.mxu0 %v5384_v63 }
 0x154   : > { %3390 = vmatprep.subr.bf16.mxu0 %v5375_v6  ;;  %v5395_v6 = vld [vmem:[#allocation15_spill] sm:$0xff] }
 0x155   : > { %2332 = vmatmul.mubr.f32.gmra.mrb[94].mxu1 %v4492_v36 }
 0x156   : > { %2067 = vmatmul.mubr.f32.gmra.mrb[30].mxu0 %v3723_v4  ;;  %2336 = vmatprep.mubr.f32.mxu1 %v4294_v13  ;;  %v5390_v13 = vld [vmem:[#allocation36_spill] sm:$0xff] }
 0x157   : > { %2071 = vmatprep.mubr.f32.mxu0 %v5385_v38  ;;  %3392 = vmatpush1.bf16.msra.mxu0 %v5386_v59  ;;  %v985_v4 = vld [vmem:[#allocation2 + $0xf2] sm:$0xff]  ;;  %v5405_v38 = vld [vmem:[#allocation41_spill] sm:$0xff] }
 0x158   : > { %v986_v59 = vld [vmem:[#allocation2 + $0x102] sm:$0xff] }
 0x159   : > { %2337 = vmatmul.mubr.f32.gmra.mrb[96].mxu1 %v4549_v18  ;;  %v5391_v18 = vld [vmem:[#allocation29_spill] sm:$0xff] }
 0x15a   : > { %2072 = vmatmul.mubr.f32.gmra.mrb[32].mxu0 %v3724_v48  ;;  %2341 = vmatprep.mubr.f32.mxu1 %v4299_v22  ;;  %v3727_v22 = vld [vmem:[#allocation2 + $0x181] sm:$0xff] }
 0x15b   : > { %2076 = vmatprep.mubr.f32.mxu0 %v5387_v14 }
 0x15d   : > { %2342 = vmatmul.mubr.f32.gmra.mrb[98].mxu1 %v5388_v32  ;;  %v3737_v32 = vld [vmem:[#allocation2 + $0x241] sm:$0xff] }
 0x15e   : > { %2077 = vmatmul.mubr.f32.gmra.mrb[34].mxu0 %v3725_v1  ;;  %2346 = vmatprep.mubr.f32.mxu1 %v4306_v29  ;;  %v3728_v29 = vld [vmem:[#allocation2 + $0x191] sm:$0xff] }
 0x15f   : > { %2081 = vmatprep.mubr.f32.mxu0 %v5389_v20  ;;  %v987_v1 = vld [vmem:[#allocation2 + $0x112] sm:$0xff] }
 0x160   : > { %v5406_v20 = vld [vmem:[#allocation43_spill] sm:$0xff] }
 0x161   : > { %2347 = vmatmul.mubr.f32.gmra.mrb[100].mxu1 %v5390_v13  ;;  %v4738_v13 = vld [vmem:[#allocation2 + $0x262] sm:$0xff] }
 0x162   : > { %2082 = vmatmul.mubr.f32.gmra.mrb[36].mxu0 %v3726_v31  ;;  %2351 = vmatprep.mubr.f32.mxu1 %v4311_v33 }
 0x163   : > { %2086 = vmatprep.mubr.f32.mxu0 %v5391_v18 }
 0x165   : > { %2352 = vmatmul.mubr.f32.gmra.mrb[102].mxu1 %v4571_v12  ;;  %v3729_v12 = vld [vmem:[#allocation2 + $0x1a1] sm:$0xff] }
 0x166   : > { %2087 = vmatmul.mubr.f32.gmra.mrb[38].mxu0 %v3727_v22  ;;  %2356 = vmatprep.mubr.f32.mxu1 %v5392_v49  ;;  %v3738_v22 = vld [vmem:[#allocation2 + $0x251] sm:$0xff] }
 0x167   : > { %2091 = vmatprep.mubr.f32.mxu0 %v5393_v9  ;;  %v989_v49 = vld [vmem:[#allocation2 + $0x132] sm:$0xff]  ;;  %v990_v9 = vld [vmem:[#allocation2 + $0x162] sm:$0xff] }
 0x169   : > { %2357 = vmatmul.mubr.f32.gmra.mrb[104].mxu1 %v5394_v8  ;;  %v910_v8 = vld [vmem:[#allocation2 + $0x21] sm:$0xff] }
 0x16a   : > { %2092 = vmatmul.mubr.f32.gmra.mrb[40].mxu0 %v3728_v29  ;;  %2361 = vmatprep.mubr.f32.mxu1 %v5395_v6 }
 0x16b   : > { %2096 = vmatprep.mubr.f32.mxu0 %v5396_v10  ;;  %v3739_v10 = vld [vmem:[#allocation2 + $0x261] sm:$0xff] }
 0x16c   : > { %v4704_v34 = vpop.f32.mrb[0].mxu1 }
 0x16d   : > { %2362 = vmatmul.mubr.f32.gmra.mrb[106].mxu1 %v4587_v7  ;;  %v1545_v33 = vpop.f32.mrb[1].mxu1  ;;  %v974_v7 = vld [vmem:[#allocation2 + $0x22] sm:$0xff] }
 0x16e   : > { %2097 = vmatmul.mubr.f32.gmra.mrb[42].mxu0 %v3729_v12  ;;  %2366 = vmatprep.mubr.f32.mxu1 %v5397_v37  ;;  %v991_v33 = vld [vmem:[#allocation2 + $0x172] sm:$0xff]  ;;  %v846_v12 = vld [vmem:[#allocation2 + $0x20] sm:$0xff] }
 0x16f   : > { %2101 = vmatprep.mubr.f32.mxu0 %v5398_v16  ;;  %v992_v37 = vld [vmem:[#allocation2 + $0x182] sm:$0xff]  ;;  %v911_v16 = vld [vmem:[#allocation2 + $0x31] sm:$0xff] }
 0x170   : > { %v4711_v43 = vpop.f32.mrb[2].mxu1 }
 0x171   : > { %2367 = vmatmul.mubr.f32.gmra.mrb[108].mxu1 %v5399_v25  ;;  %v1550_v0 = vpop.f32.mrb[3].mxu1  ;;  %v993_v25 = vld [vmem:[#allocation2 + $0x192] sm:$0xff] }
 0x172   : > { %2102 = vmatmul.mubr.f32.gmra.mrb[44].mxu0 %v3730_v17  ;;  %2371 = vmatprep.mubr.f32.mxu1 %v941_v28  ;;  %v847_v0 = vld [vmem:[#allocation2 + $0x30] sm:$0xff]  ;;  %v994_v17 = vld [vmem:[#allocation2 + $0x1a2] sm:$0xff] }
 0x173   : > { %2106 = vmatprep.mubr.f32.mxu0 %v4709_v51 }
 0x174   : > { %v4715_v41 = vpop.f32.mrb[4].mxu1 }
 0x175   : > { %2372 = vmatmul.mubr.f32.gmra.mrb[110].mxu1 %v4492_v36  ;;  %v1555_v3 = vpop.f32.mrb[5].mxu1 }
 0x176   : > { %2107 = vmatmul.mubr.f32.gmra.mrb[46].mxu0 %v3731_v19  ;;  %3153 = vmatprep.mubr.f32.mxu1 %v974_v7  ;;  %v912_v7 = vld [vmem:[#allocation2 + $0x41] sm:$0xff] }
 0x177   : > { %2111 = vmatprep.mubr.f32.mxu0 %v5400_v46  ;;  %v848_v46 = vld [vmem:[#allocation2 + $0x40] sm:$0xff] }
 0x178   : > { %v4719_v23 = vpop.f32.mrb[6].mxu1 }
 0x179   : > { %3154 = vmatmul.mubr.f32.vlgmr.msra.gmra.mrb[112].mxu1 %v975_v61  ;;  %v1560_v11 = vpop.f32.mrb[7].mxu1  ;;  %v995_v61 = vld [vmem:[#allocation2 + $0x1b2] sm:$0xff] }
 0x17a   : > { %2112 = vmatmul.mubr.f32.gmra.mrb[48].mxu0 %v3732_v50  ;;  %3156 = vmatprep.mubr.f32.mxu1 %v976_v52  ;;  %v913_v52 = vld [vmem:[#allocation2 + $0x51] sm:$0xff] }
 0x17b   : > { %2116 = vmatprep.mubr.f32.mxu0 %v5401_v26 }
 0x17c   : > { %v4722_v21 = vpop.f32.mrb[8].mxu1 }
 0x17d   : > { %3157 = vmatmul.mubr.f32.gmra.mrb[114].mxu1 %v977_v5  ;;  %v1565_v27 = vpop.f32.mrb[9].mxu1  ;;  %v997_v5 = vld [vmem:[#allocation2 + $0x1d2] sm:$0xff] }
 0x17e   : > { %2117 = vmatmul.mubr.f32.gmra.mrb[50].mxu0 %v3733_v40  ;;  %3159 = vmatprep.mubr.f32.mxu1 %v978_v24  ;;  %v849_v24 = vld [vmem:[#allocation2 + $0x50] sm:$0xff]  ;;  %v914_v27 = vld [vmem:[#allocation2 + $0x61] sm:$0xff] }
 0x17f   : > { %2121 = vmatprep.mubr.f32.mxu0 %v5402_v42 }
 0x180   : > { %v4725_v45 = vpop.f32.mrb[10].mxu1 }
 0x181   : > { %3160 = vmatmul.mubr.f32.gmra.mrb[116].mxu1 %v979_v39  ;;  %v1570_v54 = vpop.f32.mrb[11].mxu1 }
 0x182   : > { %2122 = vmatmul.mubr.f32.gmra.mrb[52].mxu0 %v3734_v47  ;;  %3162 = vmatprep.mubr.f32.mxu1 %v4637_v53  ;;  %v3736_v53 = vld [vmem:[#allocation2 + $0x231] sm:$0xff]  ;;  %v850_v54 = vld [vmem:[#allocation2 + $0x60] sm:$0xff] }
 0x183   : > { %2126 = vmatprep.mubr.f32.mxu0 %v5403_v35  ;;  %v915_v47 = vld [vmem:[#allocation2 + $0x71] sm:$0xff] }
 0x184   : > { %v4729_v44 = vpop.f32.mrb[12].mxu1 }
 0x185   : > { %3163 = vmatmul.mubr.f32.gmra.mrb[118].mxu1 %v981_v15  ;;  %v1575_v55 = vpop.f32.mrb[13].mxu1 }
 0x186   : > { %2127 = vmatmul.mubr.f32.gmra.mrb[54].mxu0 %v3735_v58  ;;  %3165 = vmatprep.mubr.f32.mxu1 %v982_v57  ;;  %v916_v55 = vld [vmem:[#allocation2 + $0x81] sm:$0xff] }
 0x187   : > { %2131 = vmatprep.mubr.f32.mxu0 %v5404_v56 }
 0x188   : > { %v4732_v60 = vpop.f32.mrb[14].mxu1 }
 0x189   : > { %3166 = vmatmul.mubr.f32.gmra.mrb[120].mxu1 %v983_v62  ;;  %v1580_v63 = vpop.f32.mrb[15].mxu1 }
 0x18a   : > { %2132 = vmatmul.mubr.f32.gmra.mrb[56].mxu0 %v3736_v53  ;;  %3168 = vmatprep.mubr.f32.mxu1 %v984_v2  ;;  %v917_v2 = vld [vmem:[#allocation2 + $0x91] sm:$0xff] }
 0x18b   : > { %2136 = vmatprep.mubr.f32.mxu0 %v5405_v38 }
 0x18c   : > { %v4735_v48 = vpop.f32.mrb[16].mxu1 }
 0x18d   : > { %3169 = vmatmul.mubr.f32.gmra.mrb[122].mxu1 %v985_v4  ;;  %v1585_v14 = vpop.f32.mrb[17].mxu1 }
 0x18e   : > { %2137 = vmatmul.mubr.f32.gmra.mrb[58].mxu0 %v3737_v32  ;;  %3171 = vmatprep.mubr.f32.mxu1 %v986_v59 }
 0x18f   : > { %2141 = vmatprep.mubr.f32.mxu0 %v5406_v20 }
 0x190   : > { %v4740_v31 = vpop.f32.mrb[18].mxu1 }
 0x191   : > { %3172 = vmatmul.mubr.f32.gmra.mrb[124].mxu1 %v987_v1  ;;  %v1590_v18 = vpop.f32.mrb[19].mxu1 }
 0x192   : > { %2142 = vmatmul.mubr.f32.gmra.mrb[60].mxu0 %v3738_v22  ;;  %3174 = vmatprep.mubr.f32.mxu1 %v4678_v30 }
 0x193   : > { %2146 = vmatprep.mubr.f32.mxu0 %v4738_v13 }
 0x194   : > { %v4744_v29 = vpop.f32.mrb[20].mxu1 }
 0x195   : > { %3175 = vmatmul.mubr.f32.gmra.mrb[126].mxu1 %v989_v49  ;;  %v1595_v6 = vpop.f32.mrb[21].mxu1 }
 0x196   : > { %2147 = vmatmul.mubr.f32.gmra.mrb[62].mxu0 %v3739_v10  ;;  %3177 = vmatprep.mubr.f32.mxu1 %v990_v9 }
 0x197   : > { %2216 = vmatprep.mubr.f32.mxu0 %v910_v8 }
 0x198   : > { %v4746_v28 = vpop.f32.mrb[22].mxu1 }
 0x199   : > { %3178 = vmatmul.mubr.f32.gmra.mrb[128].mxu1 %v991_v33  ;;  %v1600_v30 = vpop.f32.mrb[23].mxu1 }
 0x19a   : > { %2217 = vmatmul.mubr.f32.vlgmr.msra.gmra.mrb[0].mxu0 %v846_v12  ;;  %3180 = vmatprep.mubr.f32.mxu1 %v992_v37 }
 0x19b   : > { %2221 = vmatprep.mubr.f32.mxu0 %v911_v16 }
 0x19c   : > { %v4748_v3 = vpop.f32.mrb[24].mxu1 }
 0x19d   : > { %3181 = vmatmul.mubr.f32.gmra.mrb[130].mxu1 %v993_v25  ;;  %v1605_v19 = vpop.f32.mrb[25].mxu1 }
 0x19e   : > { %2222 = vmatmul.mubr.f32.gmra.mrb[2].mxu0 %v847_v0  ;;  %3183 = vmatprep.mubr.f32.mxu1 %v994_v17 }
 0x19f   : > { %2226 = vmatprep.mubr.f32.mxu0 %v912_v7 }
 0x1a0   : > { %v4750_v11 = vpop.f32.mrb[26].mxu1 }
 0x1a1   : > { %3184 = vmatmul.mubr.f32.gmra.mrb[132].mxu1 %v995_v61  ;;  %v1610_v50 = vpop.f32.mrb[27].mxu1 }
 0x1a2   : > { %2227 = vmatmul.mubr.f32.gmra.mrb[4].mxu0 %v848_v46  ;;  %3186 = vmatprep.mubr.f32.mxu1 %v4709_v51  ;;  %v851_v51 = vld [vmem:[#allocation2 + $0x70] sm:$0xff] }
 0x1a3   : > { %2231 = vmatprep.mubr.f32.mxu0 %v913_v52 }
 0x1a4   : > { %v4753_v40 = vpop.f32.mrb[28].mxu1 }
 0x1a5   : > { %3187 = vmatmul.mubr.f32.gmra.mrb[134].mxu1 %v997_v5  ;;  %v1615_v39 = vpop.f32.mrb[29].mxu1 }
 0x1a6   : > { %2232 = vmatmul.mubr.f32.gmra.mrb[6].mxu0 %v849_v24  ;;  %3189 = vmatprep.mubr.f32.mxu1 %v5401_v26  ;;  %v852_v26 = vld [vmem:[#allocation2 + $0x80] sm:$0xff] }
 0x1a7   : > { %2236 = vmatprep.mubr.f32.mxu0 %v914_v27 }
 0x1a8   : > { %v4756_v15 = vpop.f32.mrb[30].mxu1 }
 0x1a9   : > { %3190 = vmatmul.mubr.f32.gmra.mrb[136].mxu1 %v5402_v42  ;;  %v1620_v57 = vpop.f32.mrb[31].mxu1 }
 0x1aa   : > { %2237 = vmatmul.mubr.f32.gmra.mrb[8].mxu0 %v850_v54  ;;  %3192 = vmatprep.mubr.f32.mxu1 %v5403_v35  ;;  %v1005_v35 = vld [vmem:[#allocation2 + $0x272] sm:$0xff] }
 0x1ab   : > { %2241 = vmatprep.mubr.f32.mxu0 %v915_v47 }
 0x1ac   : > { %v4760_v58 = vpop.f32.mrb[32].mxu1 }
 0x1ad   : > { %3193 = vmatmul.mubr.f32.gmra.mrb[138].mxu1 %v5404_v56  ;;  %v1625_v62 = vpop.f32.mrb[33].mxu1 }
 0x1ae   : > { %2242 = vmatmul.mubr.f32.gmra.mrb[10].mxu0 %v851_v51  ;;  %3195 = vmatprep.mubr.f32.mxu1 %v5405_v38 }
 0x1af   : > { %2246 = vmatprep.mubr.f32.mxu0 %v916_v55 }
 0x1b0   : > { %v4764_v63 = vpop.f32.mrb[34].mxu1 }
 0x1b1   : > { %3196 = vmatmul.mubr.f32.gmra.mrb[140].mxu1 %v5406_v20  ;;  %v1630_v42 = vpop.f32.mrb[35].mxu1 }
 0x1b2   : > { %2247 = vmatmul.mubr.f32.gmra.mrb[12].mxu0 %v852_v26  ;;  %3198 = vmatprep.mubr.f32.mxu1 %v4738_v13  ;;  %v4800_v42 = vld [vmem:[%s5283_s2] ss:$0 sm:$0xff] }
 0x1b3   : > { %2251 = vmatprep.mubr.f32.mxu0 %v917_v2 }
 0x1b4   : > { %v4768_v53 = vpop.f32.mrb[36].mxu1 }
 0x1b5   : > { %3199 = vmatmul.mubr.f32.gmra.mrb[142].mxu1 %v1005_v35  ;;  %v1635_v56 = vpop.f32.mrb[37].mxu1  ;;  %v1584_v35 = vadd.f32 %v4800_v42, %v4735_v48  ;;  %v1594_v48 = vadd.f32 %v4800_v42, %v4744_v29  ;;  %v1604_v29 = vadd.f32 %v4800_v42, %v4748_v3  ;;  %v1614_v3 = vadd.f32 %v4800_v42, %v4753_v40 }
 0x1b6   : > { %2252 = vmatmul.mubr.f32.gmra.mrb[14].mxu0 %v4492_v36  ;;  %v1624_v40 = vadd.f32 %v4800_v42, %v4760_v58 }
 0x1b8   : > { %v4771_v4 = vpop.f32.mrb[38].mxu1 }
 0x1b9   : > { %v1640_v38 = vpop.f32.mrb[39].mxu1 }
 0x1bc   : > { %v4773_v59 = vpop.f32.mrb[40].mxu1 }
 0x1bd   : > { %v1645_v14 = vpop.f32.mrb[41].mxu1 }
 0x1c0   : > { %v4775_v32 = vpop.f32.mrb[42].mxu1 }
 0x1c1   : > { %v1650_v1 = vpop.f32.mrb[43].mxu1 }
 0x1c4   : > { %v4777_v20 = vpop.f32.mrb[44].mxu1 }
 0x1c5   : > { %v1655_v13 = vpop.f32.mrb[45].mxu1 }
 0x1c8   : > { %v4779_v18 = vpop.f32.mrb[46].mxu1 }
 0x1c9   : > { %v1660_v22 = vpop.f32.mrb[47].mxu1 }
 0x1ca   : > { %v1589_v22 = vadd.f32 %v4800_v42, %v4740_v31  ;;  %v1599_v31 = vadd.f32 %v4800_v42, %v4746_v28  ;;  %v1609_v28 = vadd.f32 %v4800_v42, %v4750_v11  ;;  %v1619_v11 = vadd.f32 %v4800_v42, %v4756_v15 }
 0x1cb   : > { %v1629_v15 = vadd.f32 %v4800_v42, %v4764_v63 }
 0x1cc   : > { %v4781_v49 = vpop.f32.mrb[48].mxu1 }
 0x1cd   : > { %v1665_v9 = vpop.f32.mrb[49].mxu1 }
 0x1d0   : > { %v4783_v8 = vpop.f32.mrb[50].mxu1 }
 0x1d1   : > { %v1670_v36 = vpop.f32.mrb[51].mxu1 }
 0x1d4   : > { %v4785_v6 = vpop.f32.mrb[52].mxu1 }
 0x1d5   : > { %v1675_v10 = vpop.f32.mrb[53].mxu1 }
 0x1d8   : > { %v4787_v33 = vpop.f32.mrb[54].mxu1 }
 0x1d9   : > { %v1680_v12 = vpop.f32.mrb[55].mxu1 }
 0x1dc   : > { %v4789_v37 = vpop.f32.mrb[56].mxu1 }
 0x1dd   : > { %v1685_v16 = vpop.f32.mrb[57].mxu1 }
 0x1e0   : > { %v4791_v30 = vpop.f32.mrb[58].mxu1 }
 0x1e1   : > { %v1690_v25 = vpop.f32.mrb[59].mxu1 }
 0x1e4   : > { %v4793_v0 = vpop.f32.mrb[60].mxu1 }
 0x1e5   : > { %v1695_v17 = vpop.f32.mrb[61].mxu1 }
 0x1e8   : > { %v4795_v7 = vpop.f32.mrb[62].mxu1 }
 0x1e9   : > { %v1700_v19 = vpop.f32.mrb[63].mxu1 }
 0x1ec   : > { %v2258_v61 = vpop.f32.mrb[64].mxu1 }
 0x1ed   : > { %v2260_v46 = vpop.f32.mrb[65].mxu1 }
 0x1f0   : > { %v2263_v52 = vpop.f32.mrb[66].mxu1 }
 0x1f1   : > { %v2265_v50 = vpop.f32.mrb[67].mxu1 }
 0x1f4   : > { %v2268_v5 = vpop.f32.mrb[68].mxu1 }
 0x1f5   : > { %v2270_v24 = vpop.f32.mrb[69].mxu1 }
 0x1f8   : > { %v2273_v27 = vpop.f32.mrb[70].mxu1 }
 0x1f9   : > { %v2275_v39 = vpop.f32.mrb[71].mxu1 }
 0x1fc   : > { %v2278_v54 = vpop.f32.mrb[72].mxu1 }
 0x1fd   : > { %v2280_v47 = vpop.f32.mrb[73].mxu1 }
 0x200   : > { %v2283_v57 = vpop.f32.mrb[74].mxu1 }
 0x201   : > { %v2285_v51 = vpop.f32.mrb[75].mxu1 }
 0x204   : > { %v2288_v55 = vpop.f32.mrb[76].mxu1 }
 0x205   : > { %v2290_v62 = vpop.f32.mrb[77].mxu1 }
 0x208   : > { %v2293_v26 = vpop.f32.mrb[78].mxu1 }
 0x209   : > { %v2295_v2 = vpop.f32.mrb[79].mxu1 }
 0x20c   : > { %v4804_v56 = vpop.f32.mrb[80].mxu1 }
 0x20d   : > { %v2033_v38 = vpop.f32.mrb[16].mxu0  ;;  %v2300_v14 = vpop.f32.mrb[81].mxu1 }
 0x20e   : > { %v3474_v1 = vadd.f32 %v2033_v38, %v1584_v35  ;;  %v2035_v13 = vpop.f32.mrb[17].mxu0 }
 0x210   : > { %v4808_v9 = vpop.f32.mrb[82].mxu1  ;;  %v4810_v36 = vadd.f32 %v3474_v1, %v2258_v61 }
 0x211   : > { %v2038_v10 = vpop.f32.mrb[18].mxu0  ;;  %v2305_v12 = vpop.f32.mrb[83].mxu1 }
 0x212   : > { %v3477_v16 = vadd.f32 %v2038_v10, %v1589_v22  ;;  %v2040_v25 = vpop.f32.mrb[19].mxu0 }
 0x214   : > { %v4814_v17 = vpop.f32.mrb[84].mxu1  ;;  %v4816_v19 = vadd.f32 %v3477_v16, %v2263_v52 }
 0x215   : > { %v2043_v46 = vpop.f32.mrb[20].mxu0  ;;  %v2310_v50 = vpop.f32.mrb[85].mxu1 }
 0x216   : > { %v3480_v24 = vadd.f32 %v2043_v46, %v1594_v48  ;;  %v2045_v39 = vpop.f32.mrb[21].mxu0 }
 0x218   : > { %v4820_v61 = vpop.f32.mrb[86].mxu1  ;;  %v4822_v47 = vadd.f32 %v3480_v24, %v2268_v5 }
 0x219   : > { %v2048_v51 = vpop.f32.mrb[22].mxu0  ;;  %v2315_v62 = vpop.f32.mrb[87].mxu1 }
 0x21a   : > { %v3483_v2 = vadd.f32 %v2048_v51, %v1599_v31  ;;  %v2050_v35 = vpop.f32.mrb[23].mxu0 }
 0x21c   : > { %v4826_v52 = vpop.f32.mrb[88].mxu1  ;;  %v4828_v38 = vadd.f32 %v3483_v2, %v2273_v27 }
 0x21d   : > { %v2053_v14 = vpop.f32.mrb[24].mxu0  ;;  %v2320_v1 = vpop.f32.mrb[89].mxu1 }
 0x21e   : > { %v3486_v13 = vadd.f32 %v2053_v14, %v1604_v29  ;;  %v2055_v22 = vpop.f32.mrb[25].mxu0 }
 0x220   : > { %v4832_v5 = vpop.f32.mrb[90].mxu1  ;;  %v4834_v10 = vadd.f32 %v3486_v13, %v2278_v54 }
 0x221   : > { %v2058_v12 = vpop.f32.mrb[26].mxu0  ;;  %v2325_v16 = vpop.f32.mrb[91].mxu1 }
 0x222   : > { %v3489_v25 = vadd.f32 %v2058_v12, %v1609_v28  ;;  %v2060_v48 = vpop.f32.mrb[27].mxu0 }
 0x224   : > { %v4838_v27 = vpop.f32.mrb[92].mxu1  ;;  %v4840_v46 = vadd.f32 %v3489_v25, %v2283_v57 }
 0x225   : > { %v2063_v50 = vpop.f32.mrb[28].mxu0  ;;  %v2330_v24 = vpop.f32.mrb[93].mxu1 }
 0x226   : > { %v3492_v39 = vadd.f32 %v2063_v50, %v1614_v3  ;;  %v2065_v31 = vpop.f32.mrb[29].mxu0 }
 0x228   : > { %v4844_v54 = vpop.f32.mrb[94].mxu1  ;;  %v4846_v51 = vadd.f32 %v3492_v39, %v2288_v55 }
 0x229   : > { %v2068_v62 = vpop.f32.mrb[30].mxu0  ;;  %v2335_v2 = vpop.f32.mrb[95].mxu1 }
 0x22a   : > { %v3495_v35 = vadd.f32 %v2068_v62, %v1619_v11  ;;  %v2070_v29 = vpop.f32.mrb[31].mxu0 }
 0x22c   : > { %v4850_v57 = vpop.f32.mrb[96].mxu1  ;;  %v4852_v14 = vadd.f32 %v3495_v35, %v2293_v26  ;;  %v1634_v26 = vadd.f32 %v4800_v42, %v4768_v53 }
 0x22d   : > { %v2073_v1 = vpop.f32.mrb[32].mxu0  ;;  %v2340_v13 = vpop.f32.mrb[97].mxu1 }
 0x22e   : > { %v3498_v22 = vadd.f32 %v2073_v1, %v1624_v40  ;;  %v2075_v28 = vpop.f32.mrb[33].mxu0 }
 0x230   : > { %v4856_v55 = vpop.f32.mrb[98].mxu1  ;;  %v4859_v12 = vadd.f32 %v3498_v22, %v4804_v56  ;;  %v1639_v56 = vadd.f32 %v4800_v42, %v4771_v4 }
 0x231   : > { %v2078_v16 = vpop.f32.mrb[34].mxu0  ;;  %v2345_v25 = vpop.f32.mrb[99].mxu1 }
 0x232   : > { %v3501_v48 = vadd.f32 %v2078_v16, %v1629_v15  ;;  %v2080_v58 = vpop.f32.mrb[35].mxu0 }
 0x234   : > { %v4863_v3 = vpop.f32.mrb[100].mxu1  ;;  %v4866_v50 = vadd.f32 %v3501_v48, %v4808_v9  ;;  %v1644_v9 = vadd.f32 %v4800_v42, %v4773_v59 }
 0x235   : > { %v2083_v24 = vpop.f32.mrb[36].mxu0  ;;  %v2350_v39 = vpop.f32.mrb[101].mxu1 }
 0x236   : > { %v3504_v63 = vadd.f32 %v2083_v24, %v1634_v26  ;;  %v2085_v31 = vpop.f32.mrb[37].mxu0 }
 0x238   : > { %v4870_v11 = vpop.f32.mrb[102].mxu1  ;;  %v4873_v62 = vadd.f32 %v3504_v63, %v4814_v17  ;;  %v1649_v17 = vadd.f32 %v4800_v42, %v4775_v32 }
 0x239   : > { %v2088_v2 = vpop.f32.mrb[38].mxu0  ;;  %v2355_v35 = vpop.f32.mrb[103].mxu1 }
 0x23a   : > { %v3507_v53 = vadd.f32 %v2088_v2, %v1639_v56  ;;  %v2090_v29 = vpop.f32.mrb[39].mxu0 }
 0x23c   : > { %v4877_v40 = vpop.f32.mrb[104].mxu1  ;;  %v4880_v1 = vadd.f32 %v3507_v53, %v4820_v61  ;;  %v1654_v61 = vadd.f32 %v4800_v42, %v4777_v20 }
 0x23d   : > { %v2093_v13 = vpop.f32.mrb[40].mxu0  ;;  %v2360_v22 = vpop.f32.mrb[105].mxu1 }
 0x23e   : > { %v3510_v4 = vadd.f32 %v2093_v13, %v1644_v9  ;;  %v2095_v28 = vpop.f32.mrb[41].mxu0 }
 0x240   : > { %v4884_v15 = vpop.f32.mrb[106].mxu1  ;;  %v4887_v16 = vadd.f32 %v3510_v4, %v4826_v52  ;;  %v1659_v52 = vadd.f32 %v4800_v42, %v4779_v18 }
 0x241   : > { %v2098_v25 = vpop.f32.mrb[42].mxu0  ;;  %v2365_v48 = vpop.f32.mrb[107].mxu1 }
 0x242   : > { %v3513_v59 = vadd.f32 %v2098_v25, %v1649_v17  ;;  %v2100_v58 = vpop.f32.mrb[43].mxu0 }
 0x244   : > { %v4891_v26 = vpop.f32.mrb[108].mxu1  ;;  %v4894_v24 = vadd.f32 %v3513_v59, %v4832_v5  ;;  %v1664_v5 = vadd.f32 %v4800_v42, %v4781_v49 }
 0x245   : > { %v2103_v39 = vpop.f32.mrb[44].mxu0  ;;  %v2370_v63 = vpop.f32.mrb[109].mxu1 }
 0x246   : > { %v3516_v32 = vadd.f32 %v2103_v39, %v1654_v61  ;;  %v2105_v31 = vpop.f32.mrb[45].mxu0 }
 0x248   : > { %v4898_v56 = vpop.f32.mrb[110].mxu1  ;;  %v4901_v2 = vadd.f32 %v3516_v32, %v4838_v27  ;;  %v1669_v27 = vadd.f32 %v4800_v42, %v4783_v8 }
 0x249   : > { %v2108_v35 = vpop.f32.mrb[46].mxu0  ;;  %v2375_v53 = vpop.f32.mrb[111].mxu1 }
 0x24a   : > { %v3519_v20 = vadd.f32 %v2108_v35, %v1659_v52  ;;  %v2110_v29 = vpop.f32.mrb[47].mxu0 }
 0x24c   : > { %v4905_v9 = vpop.f32.mrb[112].mxu1  ;;  %v4908_v13 = vadd.f32 %v3519_v20, %v4844_v54  ;;  %v1674_v54 = vadd.f32 %v4800_v42, %v4785_v6 }
 0x24d   : > { %v2113_v22 = vpop.f32.mrb[48].mxu0  ;;  %v4910_v4 = vpop.f32.mrb[113].mxu1 }
 0x24e   : > { %v3522_v18 = vadd.f32 %v2113_v22, %v1664_v5  ;;  %v2115_v28 = vpop.f32.mrb[49].mxu0 }
 0x250   : > { %v4914_v17 = vpop.f32.mrb[114].mxu1  ;;  %v4917_v25 = vadd.f32 %v3522_v18, %v4850_v57  ;;  %v1679_v57 = vadd.f32 %v4800_v42, %v4787_v33 }
 0x251   : > { %v2118_v48 = vpop.f32.mrb[50].mxu0  ;;  %v4919_v49 = vpop.f32.mrb[115].mxu1 }
 0x252   : > { %v3525_v59 = vadd.f32 %v2118_v48, %v1669_v27  ;;  %v2120_v58 = vpop.f32.mrb[51].mxu0 }
 0x254   : > { %v4923_v61 = vpop.f32.mrb[116].mxu1  ;;  %v4926_v39 = vadd.f32 %v3525_v59, %v4856_v55  ;;  %v1684_v55 = vadd.f32 %v4800_v42, %v4789_v37  ;;  %v1689_v59 = vadd.f32 %v4800_v42, %v4791_v30  ;;  %v1694_v30 = vadd.f32 %v4800_v42, %v4793_v0 }
 0x255   : > { %v2123_v63 = vpop.f32.mrb[52].mxu0  ;;  %v4928_v8 = vpop.f32.mrb[117].mxu1  ;;  %v1699_v0 = vadd.f32 %v4800_v42, %v4795_v7  ;;  %v1544_v7 = vadd.f32 %v4800_v42, %v4704_v34  ;;  %v1549_v34 = vadd.f32 %v4800_v42, %v4711_v43  ;;  %v1554_v43 = vadd.f32 %v4800_v42, %v4715_v41 }
 0x256   : > { %v3528_v32 = vadd.f32 %v2123_v63, %v1674_v54  ;;  %v2125_v31 = vpop.f32.mrb[53].mxu0 }
 0x258   : > { %v4932_v52 = vpop.f32.mrb[118].mxu1  ;;  %v4935_v35 = vadd.f32 %v3528_v32, %v4863_v3 }
 0x259   : > { %v2128_v53 = vpop.f32.mrb[54].mxu0  ;;  %v4937_v6 = vpop.f32.mrb[119].mxu1 }
 0x25a   : > { %v3531_v20 = vadd.f32 %v2128_v53, %v1679_v57  ;;  %v2130_v29 = vpop.f32.mrb[55].mxu0 }
 0x25c   : > { %v3167_v5 = vpop.f32.mrb[120].mxu1  ;;  %v4942_v22 = vadd.f32 %v3531_v20, %v4870_v11 }
 0x25d   : > { %v2133_v18 = vpop.f32.mrb[56].mxu0  ;;  %v4945_v33 = vadd.f32 %v4816_v19, %v3167_v5  ;;  %v2483_v28 = vpop.f32.mrb[121].mxu1 }
 0x25e   : > { %v3534_v27 = vadd.f32 %v2133_v18, %v1684_v55  ;;  %v2135_v3 = vpop.f32.mrb[57].mxu0  ;;  %v4948_v48 = vadd.f32 %v4810_v36, %v2483_v28 }
 0x260   : > { %v3170_v58 = vpop.f32.mrb[122].mxu1  ;;  %v4953_v37 = vadd.f32 %v3534_v27, %v4877_v40  ;;  %v2615_v19 = vadd.f32 %v4945_v33, %v4948_v48 }
 0x261   : > { %v2138_v54 = vpop.f32.mrb[58].mxu0  ;;  %v4956_v11 = vadd.f32 %v4828_v38, %v3170_v58  ;;  %v2493_v63 = vpop.f32.mrb[123].mxu1 }
 0x262   : > { %v3537_v32 = vadd.f32 %v2138_v54, %v1689_v59  ;;  %v2140_v31 = vpop.f32.mrb[59].mxu0  ;;  %v4961_v36 = vadd.f32 %v4822_v47, %v2493_v63 }
 0x264   : > { %v2616_v57 = vadd.f32 %v2615_v19, %v4961_v36  ;;  %v3173_v40 = vpop.f32.mrb[124].mxu1  ;;  %v4967_v53 = vadd.f32 %v3537_v32, %v4884_v15 }
 0x265   : > { %v2143_v38 = vpop.f32.mrb[60].mxu0  ;;  %v4970_v20 = vadd.f32 %v4840_v46, %v3173_v40  ;;  %v2503_v29 = vpop.f32.mrb[125].mxu1 }
 0x266   : > { %v3540_v55 = vadd.f32 %v2143_v38, %v1694_v30  ;;  %v2145_v5 = vpop.f32.mrb[61].mxu0  ;;  %v4973_v18 = vadd.f32 %v4834_v10, %v2503_v29  ;;  %v2617_v47 = vadd.f32 %v2616_v57, %v4956_v11 }
 0x268   : > { %v2618_v28 = vadd.f32 %v2617_v47, %v4973_v18  ;;  %v3176_v27 = vpop.f32.mrb[126].mxu1  ;;  %v4980_v15 = vadd.f32 %v3540_v55, %v4891_v26 }
 0x269   : > { %v2148_v3 = vpop.f32.mrb[62].mxu0  ;;  %v4983_v46 = vadd.f32 %v4852_v14, %v3176_v27  ;;  %v2513_v59 = vpop.f32.mrb[127].mxu1 }
 0x26a   : > { %v3543_v58 = vadd.f32 %v2148_v3, %v1699_v0  ;;  %v2150_v54 = vpop.f32.mrb[63].mxu0  ;;  %v4986_v10 = vadd.f32 %v4846_v51, %v2513_v59  ;;  %v2619_v63 = vadd.f32 %v2618_v28, %v4970_v20 }
 0x26c   : > { %v2620_v19 = vadd.f32 %v2619_v63, %v4986_v10  ;;  %v3179_v32 = vpop.f32.mrb[128].mxu1  ;;  %v4993_v26 = vadd.f32 %v3543_v58, %v4898_v56 }
 0x26d   : > { %v2218_v31 = vpop.f32.mrb[0].mxu0  ;;  %v4996_v14 = vadd.f32 %v4866_v50, %v3179_v32  ;;  %v2523_v30 = vpop.f32.mrb[129].mxu1 }
 0x26e   : > { %v2621_v57 = vadd.f32 %v2620_v19, %v4983_v46  ;;  %v3458_v51 = vadd.f32 %v2218_v31, %v1544_v7  ;;  %v2220_v40 = vpop.f32.mrb[1].mxu0  ;;  %v5000_v38 = vadd.f32 %v4859_v12, %v2523_v30 }
 0x270   : > { %v2622_v29 = vrot.slane %v2621_v57, 4  ;;  %v5005_v55 = vadd.f32 %v3458_v51, %v4910_v4  ;;  %v3182_v56 = vpop.f32.mrb[130].mxu1  ;;  %v2628_v0 = vadd.f32 %v4996_v14, %v5000_v38 }
 0x271   : > { %v2223_v5 = vpop.f32.mrb[2].mxu0  ;;  %v5008_v50 = vadd.f32 %v4880_v1, %v3182_v56  ;;  %v2533_v47 = vpop.f32.mrb[131].mxu1 }
 0x272   : > { %v3460_v28 = vadd.f32 %v2223_v5, %v1549_v34  ;;  %v2225_v27 = vpop.f32.mrb[3].mxu0  ;;  %v5013_v12 = vadd.f32 %v4873_v62, %v2533_v47  ;;  %v2623_v3 = vadd.f32 %v2622_v29, %v2621_v57 }
 0x273   : > { %v5050_v27 = vld [vmem:[%s5284_s3] sm:$0xff] }
 0x274   : > { %v5018_v4 = vadd.f32 %v3460_v28, %v4905_v9  ;;  %v2629_v59 = vadd.f32 %v2628_v0, %v5013_v12  ;;  %v3185_v1 = vpop.f32.mrb[132].mxu1  ;;  %v2624_v58 = vrot.slane %v2623_v3, 2  ;;  %v1559_v9 = vadd.f32 %v4800_v42, %v4719_v23 }
 0x275   : > { %v2228_v54 = vpop.f32.mrb[4].mxu0  ;;  %v5022_v63 = vadd.f32 %v4894_v24, %v3185_v1  ;;  %v2543_v7 = vpop.f32.mrb[133].mxu1 }
 0x276   : > { %v3462_v19 = vadd.f32 %v2228_v54, %v1554_v43  ;;  %v2230_v32 = vpop.f32.mrb[5].mxu0  ;;  %v5025_v62 = vadd.f32 %v4887_v16, %v2543_v7  ;;  %v2630_v31 = vadd.f32 %v2629_v59, %v5008_v50  ;;  %v2625_v41 = vadd.f32 %v2624_v58, %v2623_v3 }
 0x277   : > { %v1569_v7 = vadd.f32 %v4800_v42, %v4725_v45 }
 0x278   : > { %v5031_v30 = vadd.f32 %v3462_v19, %v4919_v49  ;;  %v2631_v57 = vadd.f32 %v2630_v31, %v5025_v62  ;;  %v3188_v51 = vpop.f32.mrb[134].mxu1  ;;  %v2626_v29 = vrot.slane %v2625_v41, 1  ;;  %v1564_v49 = vadd.f32 %v4800_v42, %v4722_v21 }
 0x279   : > { %v2233_v24 = vpop.f32.mrb[6].mxu0  ;;  %v5035_v40 = vadd.f32 %v4908_v13, %v3188_v51  ;;  %v2553_v34 = vpop.f32.mrb[135].mxu1  ;;  %v2602_v31 = vadd.f32 %v5018_v4, %v5005_v55 }
 0x27a   : > { %v3464_v16 = vadd.f32 %v2233_v24, %v1559_v9  ;;  %v2235_v56 = vpop.f32.mrb[7].mxu0  ;;  %v5038_v5 = vadd.f32 %v4901_v2, %v2553_v34  ;;  %v2632_v47 = vadd.f32 %v2631_v57, %v5022_v63  ;;  %v2627_v23 = vadd.f32 %v2626_v29, %v2625_v41 }
 0x27b   : > { %v1574_v34 = vadd.f32 %v4800_v42, %v4729_v44  ;;  %v2603_v29 = vadd.f32 %v2602_v31, %v5031_v30 }
 0x27c   : > { %v5044_v0 = vadd.f32 %v3464_v16, %v4914_v17  ;;  %v2633_v28 = vadd.f32 %v2632_v47, %v5038_v5  ;;  %v3191_v13 = vpop.f32.mrb[136].mxu1  ;;  %v2656_v59 = vmul.f32 0.015625, %v2627_v23 }
 0x27d   : > { %v2238_v3 = vpop.f32.mrb[8].mxu0  ;;  %v5053_v2 = vadd.f32 %v4926_v39, %v3191_v13  ;;  %v2563_v43 = vpop.f32.mrb[137].mxu1 }
 0x27e   : > { %v2634_v1 = vadd.f32 %v2633_v28, %v5035_v40  ;;  %v3466_v21 = vadd.f32 %v2238_v3, %v1564_v49  ;;  %v2240_v58 = vpop.f32.mrb[9].mxu0  ;;  %v5057_v17 = vadd.f32 %v4917_v25, %v2563_v43  ;;  %v2661_v54 = vmul.f32 %v5050_v27, %v2656_v59 }
 0x27f   : > { %v1579_v59 = vadd.f32 %v4800_v42, %v4732_v60 }
 0x280   : > { %v2635_v19 = vrot.slane %v2634_v1, 4  ;;  %v5063_v32 = vadd.f32 %v3466_v21, %v4928_v8  ;;  %v3194_v39 = vpop.f32.mrb[138].mxu1  ;;  %2666 = vadd.xlane.f32.xlu0 %v2661_v54  ;;  %v2641_v57 = vadd.f32 %v5053_v2, %v5057_v17 }
 0x281   : > { %v2243_v41 = vpop.f32.mrb[10].mxu0  ;;  %v5068_v9 = vadd.f32 %v4942_v22, %v3194_v39  ;;  %v2573_v25 = vpop.f32.mrb[139].mxu1 }
 0x282   : > { %v3468_v51 = vadd.f32 %v2243_v41, %v1569_v7  ;;  %v2245_v24 = vpop.f32.mrb[11].mxu0  ;;  %v5073_v45 = vadd.f32 %v4935_v35, %v2573_v25  ;;  %v2636_v8 = vadd.f32 %v2635_v19, %v2634_v1  ;;  %v2604_v35 = vadd.f32 %v2603_v29, %v5044_v0 }
 0x284   : > { %v5079_v16 = vadd.f32 %v3468_v51, %v4923_v61  ;;  %v2642_v22 = vadd.f32 %v2641_v57, %v5073_v45  ;;  %v3197_v56 = vpop.f32.mrb[140].mxu1  ;;  %v2637_v47 = vrot.slane %v2636_v8, 2  ;;  %v2605_v1 = vadd.f32 %v2604_v35, %v5063_v32 }
 0x285   : > { %v2248_v23 = vpop.f32.mrb[12].mxu0  ;;  %v5083_v49 = vadd.f32 %v4967_v53, %v3197_v56  ;;  %v2583_v28 = vpop.f32.mrb[141].mxu1 }
 0x286   : > { %v3470_v13 = vadd.f32 %v2248_v23, %v1574_v34  ;;  %v2250_v3 = vpop.f32.mrb[13].mxu0  ;;  %v5087_v44 = vadd.f32 %v4953_v37, %v2583_v28  ;;  %v2643_v43 = vadd.f32 %v2642_v22, %v5068_v9  ;;  %v2638_v61 = vadd.f32 %v2637_v47, %v2636_v8 }
 0x287   : > { %v2606_v39 = vadd.f32 %v2605_v1, %v5079_v16 }
 0x288   : > { %v5094_v21 = vadd.f32 %v3470_v13, %v4937_v6  ;;  %v2644_v53 = vadd.f32 %v2643_v43, %v5087_v44  ;;  %v3200_v58 = vpop.f32.mrb[142].mxu1  ;;  %v2639_v19 = vrot.slane %v2638_v61, 1 }
 0x289   : > { %v2253_v54 = vpop.f32.mrb[14].mxu0  ;;  %v5098_v7 = vadd.f32 %v4993_v26, %v3200_v58  ;;  %v2593_v37 = vpop.f32.mrb[143].mxu1  ;;  %v3876_v58 = vmov 0  }
 0x28a   : > { %v3472_v31 = vadd.f32 %v2253_v54, %v1579_v59  ;;  %v2255_v41 = vpop.f32.mrb[15].mxu0  ;;  %v5102_v60 = vadd.f32 %v4980_v15, %v2593_v37  ;;  %v2645_v42 = vadd.f32 %v2644_v53, %v5083_v49  ;;  %v2640_v6 = vadd.f32 %v2639_v19, %v2638_v61  ;;  %3690 = vset.pattern.permute.xlu0 %v3876_v58  ;;  %v3061_v54 = vld [vmem:[%s5285_s4] ss:$0 sm:$0xff] }
 0x28b   : > { %v2607_v25 = vadd.f32 %v2606_v39, %v5094_v21  ;;  %3689 = vset.pattern.permute.xlu1 %v3876_v58 }
 0x28c   : > { %v5107_v57 = vadd.f32 %v3472_v31, %v4932_v52  ;;  %v2646_v26 = vadd.f32 %v2645_v42, %v5102_v60  ;;  %v2657_v51 = vmul.f32 0.015625, %v2640_v6 }
 0x28e   : > { %v2608_v24 = vadd.f32 %v2607_v25, %v5107_v57  ;;  %v2647_v8 = vadd.f32 %v2646_v26, %v5098_v7  ;;  %v2662_v34 = vmul.f32 %v5050_v27, %v2657_v51 }
 0x290   : > { %v2609_v29 = vrot.slane %v2608_v24, 4  ;;  %v2648_v15 = vrot.slane %v2647_v8, 4  ;;  %2668 = vadd.xlane.f32.xlu1 %v2662_v34  ;;  %v2690_v34 = vld [vmem:[%s5286_s5] sm:$0xff] }
 0x292   : > { %v2610_v22 = vadd.f32 %v2609_v29, %v2608_v24  ;;  %v2649_v56 = vadd.f32 %v2648_v15, %v2647_v8 }
 0x294   : > { %v2611_v47 = vrot.slane %v2610_v22, 2  ;;  %v2650_v23 = vrot.slane %v2649_v56, 2 }
 0x296   : > { %v2612_v28 = vadd.f32 %v2611_v47, %v2610_v22  ;;  %v2651_v35 = vadd.f32 %v2650_v23, %v2649_v56 }
 0x298   : > { %v2613_v52 = vrot.slane %v2612_v28, 1  ;;  %v2652_v13 = vrot.slane %v2651_v35, 1 }
 0x29a   : > { %v2614_v3 = vadd.f32 %v2613_v52, %v2612_v28  ;;  %v2653_v43 = vadd.f32 %v2652_v13, %v2651_v35 }
 0x29c   : > { %v2655_v61 = vmul.f32 0.015625, %v2614_v3  ;;  %v2658_v59 = vmul.f32 0.015625, %v2653_v43 }
 0x29e   : > { %v2660_v1 = vmul.f32 %v5050_v27, %v2655_v61  ;;  %v2663_v53 = vmul.f32 %v5050_v27, %v2658_v59 }
 0x2a0   : > { %2664 = vadd.xlane.f32.xlu0 %v2660_v1  ;;  %2670 = vadd.xlane.f32.xlu1 %v2663_v53 }
 0x2b6   : > { %2679 = vbcast.lane.b32.xlu0 %v3061_v54, 256 }
 0x30d   : > { %v2667_v37 = vpop.xlane.xlu0 %2666 }
 0x31d   : > { %v2669_v19 = vpop.xlane.xlu1 %2668 }
 0x32d   : > { %v2665_v39 = vpop.xlane.xlu0 %2664  ;;  %v2671_v31 = vpop.xlane.xlu1 %2670 }
 0x331   : > { %v2680_v41 = vpop.permute.xlu0 %2679 }
 0x332   : > { %v2685_v42 = vadd.f32 %v2680_v41, %v2671_v31  ;;  %v2683_v6 = vadd.f32 %v2680_v41, %v2667_v37  ;;  %v2682_v27 = vadd.f32 %v2680_v41, %v2665_v39  ;;  %v2684_v24 = vadd.f32 %v2680_v41, %v2669_v19  ;;  %v3062_v41 = vld [vmem:[%s5287_s6] ss:$0 sm:$0xff] }
 0x334   : > { %v2689_v25 = vmax.f32 %v2685_v42, 0.0  ;;  %v2687_v26 = vmax.f32 %v2683_v6, 0.0  ;;  %v2686_v51 = vmax.f32 %v2682_v27, 0.0  ;;  %v2688_v8 = vmax.f32 %v2684_v24, 0.0 }
 0x336   : > { %2708 = vperm.xlu0 %3690, %v2689_v25   ;;  %2698 = vperm.xlu1 %3689, %v2687_v26  }
 0x33a   : > { %2693 = vperm.xlu1 %3689, %v2686_v51  }
 0x33e   : > { %2703 = vperm.xlu1 %3689, %v2688_v8  }
 0x3b5   : > { %v2709_v29 = vpop.permute.xlu0 %2708  ;;  %v2699_v15 = vpop.permute.xlu1 %2698 }
 0x3b6   : > { %v2714_v22 = vmul.f32 %v2709_v29, %v2690_v34  ;;  %v2712_v56 = vmul.f32 %v2699_v15, %v2690_v34 }
 0x3b8   : > { %v2733_v47 = vrot.slane %v2714_v22, 4  ;;  %v2721_v23 = vrot.slane %v2712_v56, 4 }
 0x3b9   : > { %v2694_v28 = vpop.permute.xlu1 %2693 }
 0x3ba   : > { %v2734_v35 = vadd.f32 %v2733_v47, %v2714_v22  ;;  %v2722_v52 = vadd.f32 %v2721_v23, %v2712_v56  ;;  %v2711_v13 = vmul.f32 %v2694_v28, %v2690_v34 }
 0x3bc   : > { %v2735_v3 = vrot.slane %v2734_v35, 2  ;;  %v2723_v43 = vrot.slane %v2722_v52, 2  ;;  %v2715_v61 = vrot.slane %v2711_v13, 4 }
 0x3bd   : > { %v2704_v59 = vpop.permute.xlu1 %2703 }
 0x3be   : > { %v2736_v1 = vadd.f32 %v2735_v3, %v2734_v35  ;;  %v2724_v53 = vadd.f32 %v2723_v43, %v2722_v52  ;;  %v2716_v58 = vadd.f32 %v2715_v61, %v2711_v13  ;;  %v2713_v54 = vmul.f32 %v2704_v59, %v2690_v34 }
 0x3c0   : > { %v2737_v37 = vrot.slane %v2736_v1, 1  ;;  %v2725_v19 = vrot.slane %v2724_v53, 1  ;;  %v2717_v39 = vrot.slane %v2716_v58, 2  ;;  %v2727_v31 = vrot.slane %v2713_v54, 4 }
 0x3c2   : > { %v2738_v42 = vadd.f32 %v2737_v37, %v2736_v1  ;;  %v2726_v6 = vadd.f32 %v2725_v19, %v2724_v53  ;;  %v2718_v25 = vadd.f32 %v2717_v39, %v2716_v58  ;;  %v2728_v26 = vadd.f32 %v2727_v31, %v2713_v54 }
 0x3c3   : > { %v2806_v58 = vlaneseq }
 0x3c4   : > { %v2749_v27 = vadd.f32 %v3062_v41, %v2738_v42  ;;  %v2747_v51 = vadd.f32 %v3062_v41, %v2726_v6  ;;  %v2719_v24 = vrot.slane %v2718_v25, 1  ;;  %v2729_v8 = vrot.slane %v2728_v26, 2 }
 0x3c5   : > { %v2807_v37 = vshrl.u32 %v2806_v58, 7 }
 0x3c6   : > { %v2753_v29 = vsub.f32 0.0, %v2749_v27  ;;  %v2751_v15 = vsub.f32 0.0, %v2747_v51  ;;  %v2720_v22 = vadd.f32 %v2719_v24, %v2718_v25  ;;  %v2730_v34 = vadd.f32 %v2729_v8, %v2728_v26  ;;  %v2798_v26 = vld [vmem:[%s4071_s15 + $0xc0] sm:$0xff]  ;;  %v2799_v27 = vld [vmem:[%s4071_s15 + $0xc8] sm:$0xff]  ;;  %v2800_v24 = vld [vmem:[%s4071_s15 + $0xd0] sm:$0xff] }
 0x3c7   : > { %v5124_v31 = vsub.s32 0, %v2807_v37  ;;  %v2801_v8 = vld [vmem:[%s4071_s15 + $0xd8] sm:$0xff]  ;;  %v2784_v37 = vld [vmem:[%s4071_s15 + $0x50] sm:$0xff] }
 0x3c8   : > { %v2760_v56 = vmul.f32 1.442695, %v2753_v29  ;;  %v2756_v47 = vmul.f32 1.442695, %v2751_v15  ;;  %v2746_v23 = vadd.f32 %v3062_v41, %v2720_v22  ;;  %v2731_v28 = vrot.slane %v2730_v34, 1  ;;  %v2802_v29 = vld [vmem:[%s4071_s15 + $0xe0] sm:$0xff] }
 0x3c9   : > { %v2803_v22 = vld [vmem:[%s4071_s15 + $0xe8] sm:$0xff] }
 0x3ca   : > { %3691 = vpow2.f32 %v2760_v56  ;;  %v2750_v35 = vsub.f32 0.0, %v2746_v23  ;;  %v2732_v52 = vadd.f32 %v2731_v28, %v2730_v34  ;;  %v2804_v34 = vld [vmem:[%s4071_s15 + $0xf0] sm:$0xff]  ;;  %v2805_v56 = vld [vmem:[%s4071_s15 + $0xf8] sm:$0xff] }
 0x3cb   : > { %3693 = vpow2.f32 %v2756_v47 }
 0x3cc   : > { %v2748_v13 = vadd.f32 %v3062_v41, %v2732_v52  ;;  %v2754_v3 = vmul.f32 1.442695, %v2750_v35 }
 0x3ce   : > { %v2752_v43 = vsub.f32 0.0, %v2748_v13  ;;  %3695 = vpow2.f32 %v2754_v3 }
 0x3d0   : > { %v2758_v61 = vmul.f32 1.442695, %v2752_v43 }
 0x3d2   : > { %3697 = vpow2.f32 %v2758_v61 }
 0x3d4   : > { %v3692_v59 = vpop.eup %3691 }
 0x3d5   : > { %v3694_v1 = vpop.eup %3693  ;;  %v2765_v53 = vadd.f32 1.0, %v3692_v59 }
 0x3d6   : > { %v2763_v54 = vadd.f32 1.0, %v3694_v1 }
 0x3d7   : > { %3699 = vrcp.f32 %v2765_v53 }
 0x3d8   : > { %3701 = vrcp.f32 %v2763_v54  ;;  %v3696_v19 = vpop.eup %3695 }
 0x3d9   : > { %v2762_v41 = vadd.f32 1.0, %v3696_v19 }
 0x3db   : > { %3703 = vrcp.f32 %v2762_v41 }
 0x3dc   : > { %v3698_v39 = vpop.eup %3697 }
 0x3dd   : > { %v2764_v42 = vadd.f32 1.0, %v3698_v39 }
 0x3df   : > { %3705 = vrcp.f32 %v2764_v42 }
 0x3e1   : > { %v3700_v6 = vpop.eup %3699 }
 0x3e2   : > { %v3702_v25 = vpop.eup %3701  ;;  %v2821_v51 = vrot.slane %v3700_v6, %v5124_v31  ;;  %v2785_v6 = vld [vmem:[%s4071_s15 + $0x58] sm:$0xff] }
 0x3e3   : > { %v2813_v15 = vrot.slane %v3702_v25, %v5124_v31  ;;  %v2786_v25 = vld [vmem:[%s4071_s15 + $0x60] sm:$0xff] }
 0x3e4   : > { %v2846_v47 = vmul.f32 %v2821_v51, %v5057_v17  ;;  %v2847_v23 = vmul.f32 %v2821_v51, %v5053_v2  ;;  %v2848_v28 = vmul.f32 %v2821_v51, %v5073_v45  ;;  %v2849_v35 = vmul.f32 %v2821_v51, %v5068_v9 }
 0x3e5   : > { %v2850_v52 = vmul.f32 %v2821_v51, %v5087_v44  ;;  %v2851_v13 = vmul.f32 %v2821_v51, %v5083_v49  ;;  %v2852_v3 = vmul.f32 %v2821_v51, %v5102_v60  ;;  %v2853_v43 = vmul.f32 %v2821_v51, %v5098_v7  ;;  %v2782_v44 = vld [vmem:[%s4071_s15 + $0x40] sm:$0xff]  ;;  %v2783_v7 = vld [vmem:[%s4071_s15 + $0x48] sm:$0xff]  ;;  %v2789_v51 = vld [vmem:[%s4071_s15 + $0x78] sm:$0xff] }
 0x3e6   : > { %v2878_v61 = vadd.f32 %v2846_v47, %v2798_v26  ;;  %v2879_v59 = vadd.f32 %v2847_v23, %v2799_v27  ;;  %v2880_v17 = vadd.f32 %v2848_v28, %v2800_v24  ;;  %v2881_v1 = vadd.f32 %v2849_v35, %v2801_v8  ;;  %v2787_v26 = vld [vmem:[%s4071_s15 + $0x68] sm:$0xff]  ;;  %v2788_v27 = vld [vmem:[%s4071_s15 + $0x70] sm:$0xff]  ;;  %v3704_v28 = vpop.eup %3703 }
 0x3e7   : > { %v2882_v2 = vadd.f32 %v2850_v52, %v2802_v29  ;;  %v2883_v45 = vadd.f32 %v2851_v13, %v2803_v22  ;;  %v2884_v9 = vadd.f32 %v2852_v3, %v2804_v34  ;;  %v2885_v53 = vadd.f32 %v2853_v43, %v2805_v56 }
 0x3e8   : > { %v2910_v58 = vmax.f32 %v2878_v61, 0.0  ;;  %v2911_v49 = vmax.f32 %v2879_v59, 0.0  ;;  %v2912_v54 = vmax.f32 %v2880_v17, 0.0  ;;  %v2913_v60 = vmax.f32 %v2881_v1, 0.0  ;;  %v2774_v1 = vld [vmem:[%s4071_s15] sm:$0xff] }
 0x3e9   : > { %v2914_v19 = vmax.f32 %v2882_v2, 0.0  ;;  %v2915_v39 = vmax.f32 %v2883_v45, 0.0  ;;  %v2916_v41 = vmax.f32 %v2884_v9, 0.0  ;;  %v2917_v42 = vmax.f32 %v2885_v53, 0.0  ;;  %v2775_v2 = vld [vmem:[%s4071_s15 + $0x8] sm:$0xff]  ;;  %v2776_v9 = vld [vmem:[%s4071_s15 + $0x10] sm:$0xff] }
 0x3ea   : > { %2942 = vst [vmem:[%s5151_s12 + $0xc0] sm:$0xff] %v2910_v58  ;;  %2943 = vst [vmem:[%s5151_s12 + $0xc8] sm:$0xff] %v2911_v49  ;;  %v2830_v24 = vmul.f32 %v2813_v15, %v4948_v48  ;;  %v2831_v8 = vmul.f32 %v2813_v15, %v4945_v33  ;;  %v2832_v29 = vmul.f32 %v2813_v15, %v4961_v36  ;;  %v2777_v53 = vld [vmem:[%s4071_s15 + $0x18] sm:$0xff]  ;;  %v2779_v49 = vld [vmem:[%s4071_s15 + $0x28] sm:$0xff] }
 0x3eb   : > { %2944 = vst [vmem:[%s5151_s12 + $0xd0] sm:$0xff] %v2912_v54  ;;  %2945 = vst [vmem:[%s5151_s12 + $0xd8] sm:$0xff] %v2913_v60  ;;  %v2833_v22 = vmul.f32 %v2813_v15, %v4956_v11  ;;  %v2834_v34 = vmul.f32 %v2813_v15, %v4973_v18  ;;  %v2835_v56 = vmul.f32 %v2813_v15, %v4970_v20  ;;  %v3706_v11 = vpop.eup %3705  ;;  %v2780_v54 = vld [vmem:[%s4071_s15 + $0x30] sm:$0xff]  ;;  %v2781_v60 = vld [vmem:[%s4071_s15 + $0x38] sm:$0xff] }
 0x3ec   : > { %2946 = vst [vmem:[%s5151_s12 + $0xe0] sm:$0xff] %v2914_v19  ;;  %2947 = vst [vmem:[%s5151_s12 + $0xe8] sm:$0xff] %v2915_v39  ;;  %v2836_v47 = vmul.f32 %v2813_v15, %v4986_v10  ;;  %v2837_v23 = vmul.f32 %v2813_v15, %v4983_v46  ;;  %v2862_v48 = vadd.f32 %v2830_v24, %v2782_v44  ;;  %v2778_v44 = vld [vmem:[%s4071_s15 + $0x20] sm:$0xff] }
 0x3ed   : > { %2948 = vst [vmem:[%s5151_s12 + $0xf0] sm:$0xff] %v2916_v41  ;;  %2949 = vst [vmem:[%s5151_s12 + $0xf8] sm:$0xff] %v2917_v42  ;;  %v2863_v35 = vadd.f32 %v2831_v8, %v2783_v7  ;;  %v2864_v33 = vadd.f32 %v2832_v29, %v2784_v37  ;;  %v2865_v36 = vadd.f32 %v2833_v22, %v2785_v6  ;;  %v2791_v8 = vld [vmem:[%s4071_s15 + $0x88] sm:$0xff]  ;;  %v2792_v29 = vld [vmem:[%s4071_s15 + $0x90] sm:$0xff] }
 0x3ee   : > { %v2866_v52 = vadd.f32 %v2834_v34, %v2786_v25  ;;  %v2867_v13 = vadd.f32 %v2835_v56, %v2787_v26  ;;  %v2868_v18 = vadd.f32 %v2836_v47, %v2788_v27  ;;  %v2869_v20 = vadd.f32 %v2837_v23, %v2789_v51  ;;  %v2793_v23 = vld [vmem:[%s4071_s15 + $0x98] sm:$0xff] }
 0x3ef   : > { %v2894_v10 = vmax.f32 %v2862_v48, 0.0  ;;  %v2895_v46 = vmax.f32 %v2863_v35, 0.0  ;;  %v2896_v15 = vmax.f32 %v2864_v33, 0.0  ;;  %v2897_v3 = vmax.f32 %v2865_v36, 0.0  ;;  %v2795_v48 = vld [vmem:[%s4071_s15 + $0xa8] sm:$0xff]  ;;  %v2796_v35 = vld [vmem:[%s4071_s15 + $0xb0] sm:$0xff] }
 0x3f0   : > { %v2898_v43 = vmax.f32 %v2866_v52, 0.0  ;;  %v2899_v61 = vmax.f32 %v2867_v13, 0.0  ;;  %v2900_v59 = vmax.f32 %v2868_v18, 0.0  ;;  %v2901_v17 = vmax.f32 %v2869_v20, 0.0  ;;  %v2797_v33 = vld [vmem:[%s4071_s15 + $0xb8] sm:$0xff] }
 0x3f1   : > { %2926 = vst [vmem:[%s5151_s12 + $0x40] sm:$0xff] %v2894_v10  ;;  %2927 = vst [vmem:[%s5151_s12 + $0x48] sm:$0xff] %v2895_v46  ;;  %v2809_v45 = vrot.slane %v3704_v28, %v5124_v31  ;;  %v2817_v58 = vrot.slane %v3706_v11, %v5124_v31  ;;  %v2794_v28 = vld [vmem:[%s4071_s15 + $0xa0] sm:$0xff] }
 0x3f2   : > { %2928 = vst [vmem:[%s5151_s12 + $0x50] sm:$0xff] %v2896_v15  ;;  %2929 = vst [vmem:[%s5151_s12 + $0x58] sm:$0xff] %v2897_v3 }
 0x3f3   : > { %2930 = vst [vmem:[%s5151_s12 + $0x60] sm:$0xff] %v2898_v43  ;;  %2931 = vst [vmem:[%s5151_s12 + $0x68] sm:$0xff] %v2899_v61  ;;  %v2822_v7 = vmul.f32 %v2809_v45, %v5005_v55  ;;  %v2823_v37 = vmul.f32 %v2809_v45, %v5018_v4  ;;  %v2824_v19 = vmul.f32 %v2809_v45, %v5031_v30 }
 0x3f4   : > { %2932 = vst [vmem:[%s5151_s12 + $0x70] sm:$0xff] %v2900_v59  ;;  %2933 = vst [vmem:[%s5151_s12 + $0x78] sm:$0xff] %v2901_v17  ;;  %v2825_v39 = vmul.f32 %v2809_v45, %v5044_v0  ;;  %v2826_v41 = vmul.f32 %v2809_v45, %v5063_v32  ;;  %v2827_v42 = vmul.f32 %v2809_v45, %v5079_v16  ;;  %v2790_v16 = vld [vmem:[%s4071_s15 + $0x80] sm:$0xff]  ;;  %s2965_s15 = sshll.u32 %s5151_s12, 4  ;;  %s5229_s15 = int_to_ptr.vmem [resolvable:$true] %s2965_s15 }
 0x3f5   : > { %v2828_v6 = vmul.f32 %v2809_v45, %v5094_v21  ;;  %v2829_v31 = vmul.f32 %v2809_v45, %v5107_v57  ;;  %v2854_v25 = vadd.f32 %v2822_v7, %v2774_v1  ;;  %v2855_v26 = vadd.f32 %v2823_v37, %v2775_v2  ;;  %s3798_s16 = scalar_lea.vmem %s5229_s15, 4096  ;;  %p3805_p10 = scmp.lt.s32.totalorder %s5229_s15, %s3803_s17 }
 0x3f6   : > { %v2856_v55 = vadd.f32 %v2824_v19, %v2776_v9  ;;  %v2857_v27 = vadd.f32 %v2825_v39, %v2777_v53  ;;  %v2858_v4 = vadd.f32 %v2826_v41, %v2778_v44  ;;  %v2859_v30 = vadd.f32 %v2827_v42, %v2779_v49  ;;  %p3799_p4 = scmp.ne.s32.totalorder %s5229_s15, %s3798_s16  ;;  %p3806_p13 = scmp.lt.s32.totalorder %s3804_s20, %s3798_s16 }
 0x3f7   : > { %v2860_v0 = vadd.f32 %v2828_v6, %v2780_v54  ;;  %v2861_v32 = vadd.f32 %v2829_v31, %v2781_v60  ;;  %v2886_v51 = vmax.f32 %v2854_v25, 0.0  ;;  %v2887_v21 = vmax.f32 %v2855_v26, 0.0 }
 0x3f8   : > { %v2888_v57 = vmax.f32 %v2856_v55, 0.0  ;;  %v2889_v24 = vmax.f32 %v2857_v27, 0.0  ;;  %v2890_v22 = vmax.f32 %v2858_v4, 0.0  ;;  %v2891_v34 = vmax.f32 %v2859_v30, 0.0  ;;  %p3800_p6 = pnand %p3799_p4, %p4014_p12  ;;  %p3807_p3 = por %p3806_p13, %p3805_p10 }
 0x3f9   : > { %v2892_v56 = vmax.f32 %v2860_v0, 0.0  ;;  %v2893_v47 = vmax.f32 %v2861_v32, 0.0  ;;  %2918 = vst [vmem:[%s5151_s12] sm:$0xff] %v2886_v51  ;;  %2919 = vst [vmem:[%s5151_s12 + $0x8] sm:$0xff] %v2887_v21  ;;  %v2838_v36 = vmul.f32 %v2817_v58, %v5000_v38  ;;  %v2839_v11 = vmul.f32 %v2817_v58, %v4996_v14 }
 0x3fa   : > { %2920 = vst [vmem:[%s5151_s12 + $0x10] sm:$0xff] %v2888_v57  ;;  %2921 = vst [vmem:[%s5151_s12 + $0x18] sm:$0xff] %v2889_v24  ;;  %v2840_v52 = vmul.f32 %v2817_v58, %v5013_v12  ;;  %v2841_v13 = vmul.f32 %v2817_v58, %v5008_v50  ;;  %v2842_v18 = vmul.f32 %v2817_v58, %v5025_v62  ;;  %p3801_p8 = pneg %p3800_p6 }
 0x3fb   : > { %2922 = vst [vmem:[%s5151_s12 + $0x20] sm:$0xff] %v2890_v22  ;;  %2923 = vst [vmem:[%s5151_s12 + $0x28] sm:$0xff] %v2891_v34  ;;  %v2843_v20 = vmul.f32 %v2817_v58, %v5022_v63  ;;  %v2844_v10 = vmul.f32 %v2817_v58, %v5038_v5  ;;  %v2845_v46 = vmul.f32 %v2817_v58, %v5035_v40 }
 0x3fc   : > { %2924 = vst [vmem:[%s5151_s12 + $0x30] sm:$0xff] %v2892_v56  ;;  %2925 = vst [vmem:[%s5151_s12 + $0x38] sm:$0xff] %v2893_v47  ;;  %v2870_v38 = vadd.f32 %v2838_v36, %v2790_v16  ;;  %v2871_v14 = vadd.f32 %v2839_v11, %v2791_v8  ;;  %v2872_v15 = vadd.f32 %v2840_v52, %v2792_v29  ;;  %p3808_p7 = pnand %p3807_p3, %p3801_p8 }
 0x3fd   : > { %v2873_v12 = vadd.f32 %v2841_v13, %v2793_v23  ;;  %v2874_v50 = vadd.f32 %v2842_v18, %v2794_v28  ;;  %v2875_v3 = vadd.f32 %v2843_v20, %v2795_v48  ;;  %v2876_v43 = vadd.f32 %v2844_v10, %v2796_v35 }
 0x3fe   : > { %v2877_v62 = vadd.f32 %v2845_v46, %v2797_v33  ;;  %v2902_v63 = vmax.f32 %v2870_v38, 0.0  ;;  %v2903_v5 = vmax.f32 %v2871_v14, 0.0  ;;  %v2904_v40 = vmax.f32 %v2872_v15, 0.0 }
 0x3ff   : > { %v2905_v61 = vmax.f32 %v2873_v12, 0.0  ;;  %v2906_v59 = vmax.f32 %v2874_v50, 0.0  ;;  %v2907_v17 = vmax.f32 %v2875_v3, 0.0  ;;  %v2908_v1 = vmax.f32 %v2876_v43, 0.0 }
 0x400   : > { %v2909_v2 = vmax.f32 %v2877_v62, 0.0  ;;  %2934 = vst [vmem:[%s5151_s12 + $0x80] sm:$0xff] %v2902_v63  ;;  %2935 = vst [vmem:[%s5151_s12 + $0x88] sm:$0xff] %v2903_v5 }
 0x401   : > { %2936 = vst [vmem:[%s5151_s12 + $0x90] sm:$0xff] %v2904_v40  ;;  %2937 = vst [vmem:[%s5151_s12 + $0x98] sm:$0xff] %v2905_v61 }
 0x402   : > { %2938 = vst [vmem:[%s5151_s12 + $0xa0] sm:$0xff] %v2906_v59  ;;  %2939 = vst [vmem:[%s5151_s12 + $0xa8] sm:$0xff] %v2907_v17 }
 0x403   : > { %2940 = vst [vmem:[%s5151_s12 + $0xb0] sm:$0xff] %v2908_v1  ;;  %2941 = vst [vmem:[%s5151_s12 + $0xb8] sm:$0xff] %v2909_v2 }
 0x404   : > { %3811 = shalt.err (!%p3808_p7)
}
 0x405   : > { %s3812_s21 = scalar_lea.hbm %s5227_s9, 4096  ;;  %s3816_s12 = scalar_lea.hbm %s5288_s7, 8192 }
 0x406   : > { %p3813_p9 = scmp.ne.s32.totalorder %s5227_s9, %s3812_s21  ;;  %p3817_p5 = scmp.lt.u32.totalorder %s5227_s9, %s5288_s7 }
 0x407   : > { %p3818_p11 = scmp.lt.u32.totalorder %s3816_s12, %s3812_s21  ;;  %p3820_p4 = scmp.lt.u32.totalorder %s3812_s21, %s5227_s9 }
 0x408   : > { %p3814_p1 = pnand %p3813_p9, %p4014_p12 }
 0x409   : > { %p3819_p2 = por %p3818_p11, %p3817_p5 }
 0x40a   : > { %p3815_p0 = pneg %p3814_p1 }
 0x40b   : > { %p3821_p6 = por %p3820_p4, %p3819_p2 }
 0x40d   : > { %p3822_p8 = pnand %p3821_p6, %p3815_p0 }
 0x40f   : > { %3825 = shalt.err (!%p3822_p8)
}
 0x410   : > { %s3878_s30 = smov 128   ;;  %s3879_s16 = smov 8  }
 0x411   : > { %3631 = dma.vmem_to_hbm [thread:$0]  (%p4014_p12), %s5229_s15, 4096, %s5227_s9, %s2951_s10, %s3878_s30, %s3878_s30, %s3879_s16  }
 0x412 PF: > { %s2980_s14 = sand.u32 1, %s3856_s24   ;;  %p5407_p10 = scmp.ne.s32.totalorder %s5333_s8, 0 }
 0x413   : > { %p5408_p13 = scmp.ge.s32.totalorder %s3868_s27, 2  ;;  %s2981_s17 = scalar_lea.sflag [#allocation6], %s2980_s14 }
 0x415   : > { %p3642_p3 = pnand %p5408_p13, %p5407_p10 }
 0x417   : > { %3851 = dma.done.wait (!%p3642_p3), %s2981_s17, 4096  }
 0x418   : > { %3853 = vsyncadd (!%p3642_p3), %s2981_s17, 4294963200  ;;  %p21_p7 = scmp.ge.s32.totalorder %s3976_s13, 4   ;;  %s5409_s24 = smov %s3860_s25 }
 0x419   : > { %s5410_s25 = smov %s3864_s26  ;;  %s5411_s26 = smov %s4010_s18 }
 0x41a   : > { %s5412_s27 = smov %s3976_s13  ;;  %23 = sbr.rel (!%p21_p7) target bundleno = 6 (0x6), region = 100 }
 0x421   :  { %2986 = vsyncpa [#allocation5], 1 }
 0x422   :  { %2988 = vsyncpa [#allocation5 + $0x1], 1 }
 0x423   :  { %2989 = vsyncpa [#allocation8], 1 }
 0x424   :  { %2990 = vsyncpa [#allocation6], 1 }
 0x425   :  { %2992 = vsyncpa [#allocation6 + $0x1], 1 }

</bundles_post_ra>
